<compile_context>
chip_gen: v6e
topology: v6e:2x2x1
jax: 0.10.0
libtpu: 0.0.40
codegen_flags: <defaults>
</compile_context>

<pallas_src>
import functools

import jax
import jax.numpy as jnp
from jax import lax
from jax.experimental import pallas as pl
from jax.experimental.pallas import tpu as pltpu


def _combined_loss_kernel(pred_ref, tgt_ref, out_ref,
                          e_sc, carry_sm, carry_hw, carry_t, *,
                          focal_alpha, focal_gamma):
    # pred_ref : (C, TD, H, W)  native dtype (batch dim squeezed by BlockSpec)
    # tgt_ref  : (TD, H, W)     int32
    # out_ref  : (1, 128)       f32 stats row per batch element, accumulated
    #            across D tiles: lanes [0..C-1]=inter_c, [C..2C-1]=union_c,
    #            [2C]=focal sum, [2C+1]=boundary squared-diff sum.
    # e_sc     : (C, TD, H, W)  f32 scratch caching exp(p_c - m)
    # carry_sm : (C, H, W)      f32 prev D-tile's last-slice softmax probs
    # carry_hw : (C, H, W)      f32 prev D-tile's last-slice H/W-grad diff
    # carry_t  : (H, W)         i32 prev D-tile's last-slice target labels
    C, TD, H, W = pred_ref.shape
    d = pl.program_id(1)
    nd = pl.num_programs(1)
    is_first = d == 0
    is_last = d == nd - 1

    lane = lax.broadcasted_iota(jnp.int32, (1, 128), 1)
    bnd_lane = 2 * C + 1

    @pl.when(is_first)
    def _():
        out_ref[...] = jnp.zeros_like(out_ref)

    t = tgt_ref[...]                                        # (TD, H, W) i32

    # ---- pass 1: running max over classes (softmax stability) ---------------
    m = pred_ref[0].astype(jnp.float32)
    for c in range(1, C):
        m = jnp.maximum(m, pred_ref[c].astype(jnp.float32))

    # ---- pass 2: cache e_c = exp(p_c - m), accumulate the softmax denom -----
    se = jnp.zeros((TD, H, W), jnp.float32)
    for c in range(C):
        e_c = jnp.exp(pred_ref[c].astype(jnp.float32) - m)
        e_sc[c] = e_c
        se = se + e_c
    inv_se = 1.0 / se                       # exact; sm_c = e_c * inv_se (no exp)

    # ---- constants hoisted out of the class loop -----------------------------
    mask_h = (lax.broadcasted_iota(jnp.int32, (1, H, W), 1)
              < (H - 1)).astype(jnp.float32)
    mask_w = (lax.broadcasted_iota(jnp.int32, (1, H, W), 2)
              < (W - 1)).astype(jnp.float32)
    # Target map rolled once per tile (f32 labels are exact for small ints);
    # per-class one-hot gradients become compares instead of per-class rolls.
    tf = t.astype(jnp.float32)
    tf_h = pltpu.roll(tf, shift=H - 1, axis=1)              # t[:, i+1, :]
    tf_w = pltpu.roll(tf, shift=W - 1, axis=2)              # t[:, :, j+1]

    # ---- cross-tile D seam: finish the previous tile's last slice exactly ----
    @pl.when(d != 0)
    def _():
        t0 = t[0]                                            # (H, W) i32
        ct = carry_t[...]                                    # (H, W) i32
        inv0 = inv_se[0]
        seam = jnp.float32(0.0)
        for c in range(C):
            sm_c0 = e_sc[c, 0] * inv0
            gd_oh = ((t0 == c) != (ct == c)).astype(jnp.float32)
            dprev = carry_hw[c] + jnp.abs(sm_c0 - carry_sm[c]) - gd_oh
            seam = seam + jnp.sum(dprev * dprev)
        out_ref[...] = out_ref[...] + jnp.where(lane == bnd_lane, seam, 0.0)

    # ---- per-class streaming: dice partials / focal pt / boundary ------------
    if TD > 1:
        t_lo = t[:-1]
        t_hi = t[1:]

    pt = jnp.zeros((TD, H, W), jnp.float32)   # softmax prob of the target class
    inters = []
    unions = []
    bnd_sum = jnp.float32(0.0)

    for c in range(C):
        cf = float(c)
        sm_c = e_sc[c] * inv_se
        tc = t == c
        prod = jnp.where(tc, sm_c, 0.0)
        pt = pt + prod
        inters.append(jnp.sum(prod))
        unions.append(jnp.sum(sm_c) + jnp.sum(tc.astype(jnp.float32)))

        # Fused boundary diff (|grad sm| - |grad oh|) along H and W; the
        # trailing-edge mask is applied once to the difference.
        gh_sm = jnp.abs(pltpu.roll(sm_c, shift=H - 1, axis=1) - sm_c)
        gw_sm = jnp.abs(pltpu.roll(sm_c, shift=W - 1, axis=2) - sm_c)
        gh_oh = ((tf_h == cf) != tc).astype(jnp.float32)
        gw_oh = ((tf_w == cf) != tc).astype(jnp.float32)
        hw_diff = (gh_sm - gh_oh) * mask_h + (gw_sm - gw_oh) * mask_w

        if TD > 1:
            # In-tile D gradient for slices 0 .. TD-2.
            gd_sm = jnp.abs(sm_c[1:] - sm_c[:-1])
            gd_oh = ((t_hi == c) != (t_lo == c)).astype(jnp.float32)
            diff_inner = hw_diff[:-1] + (gd_sm - gd_oh)
            bnd_sum = bnd_sum + jnp.sum(diff_inner * diff_inner)

        # Carry this tile's last slice forward for the next D tile.
        carry_sm[c] = sm_c[TD - 1]
        carry_hw[c] = hw_diff[TD - 1]

    carry_t[...] = t[TD - 1]

    # ---- true end of the volume: trailing D gradient is exactly zero --------
    @pl.when(is_last)
    def _():
        edge = jnp.float32(0.0)
        for c in range(C):
            lhw = carry_hw[c]
            edge = edge + jnp.sum(lhw * lhw)
        out_ref[...] = out_ref[...] + jnp.where(lane == bnd_lane, edge, 0.0)

    # ---- focal partial sum (pt is the streamed softmax target prob) ---------
    # TODO(synk): out-of-range labels give pt=0 -> ce=-log(eps) here; PyTorch's
    # one_hot/cross_entropy semantics for invalid labels differ (never occurs
    # for valid targets in [0, C)).
    ce = -jnp.log(jnp.maximum(pt, 1e-30))
    if focal_gamma == 2.0:
        mod = (1.0 - pt) * (1.0 - pt)
    else:
        mod = jnp.maximum(1.0 - pt, 0.0) ** focal_gamma
    focal_sum = jnp.sum(focal_alpha * mod * ce)

    # ---- accumulate this tile's stats into the (1, 128) row ------------------
    vals = inters + unions + [focal_sum, bnd_sum]
    delta = jnp.zeros((1, 128), jnp.float32)
    for k, v in enumerate(vals):
        delta = jnp.where(lane == k, v, delta)
    out_ref[...] = out_ref[...] + delta


def _tpu_vmem_capacity_bytes():
    try:
        cap = int(pltpu.get_tpu_info().vmem_capacity_bytes)
        if cap > 0:
            return cap
    except Exception:
        pass
    return 128 * 1024 * 1024


def _choose_d_tile(C, D, H, W, itemsize, budget_bytes):
    """Largest divisor of D whose pred block fits the per-block byte budget."""
    per_slice = C * H * W * itemsize
    max_td = max(1, budget_bytes // per_slice)
    td = 1
    for cand in range(1, D + 1):
        if D % cand == 0 and cand <= max_td:
            td = cand
    return td


def combined_loss_3d(pred, target, *, alpha=0.5, beta=0.3, gamma=0.2,
                     smooth=1e-5, focal_alpha=0.25, focal_gamma=2.0,
                     d_tile=None):
    B, C, D, H, W = pred.shape
    assert 2 * C + 2 <= 128, "stats row supports up to 63 classes"
    target = target.astype(jnp.int32)
    itemsize = jnp.dtype(pred.dtype).itemsize

    vmem_cap = _tpu_vmem_capacity_bytes()
    # v7x has 64 MiB VMEM per TensorCore -> keep pred blocks <= ~4 MiB; the
    # 128 MiB v5e/v6e generations take larger blocks to amortize the fixed
    # per-grid-step cost of this compute-bound kernel.
    block_budget = (4 << 20) if vmem_cap <= (96 << 20) else (8 << 20)
    if d_tile is None:
        d_tile = _choose_d_tile(C, D, H, W, itemsize, block_budget)
    assert D % d_tile == 0, "d_tile must divide D"
    nd = D // d_tile

    kernel = functools.partial(_combined_loss_kernel,
                               focal_alpha=focal_alpha,
                               focal_gamma=focal_gamma)

    # VMEM budget: double-buffered input blocks + exp cache + live f32 slabs
    # + carries, with headroom; clamp to the per-core capacity.
    slab_f32 = d_tile * H * W * 4
    pred_blk = C * d_tile * H * W * itemsize
    tgt_blk = d_tile * H * W * 4
    carries = (2 * C + 1) * H * W * 4
    needed = (2 * (pred_blk + tgt_blk)
              + C * slab_f32            # exp(p - m) scratch
              + 16 * slab_f32           # live f32 temporaries (upper bound)
              + carries + (2 << 20))
    vmem_limit = int(min(max(needed, 32 << 20), int(vmem_cap * 0.8)))

    stats = pl.pallas_call(
        kernel,
        out_shape=jax.ShapeDtypeStruct((B, 1, 128), jnp.float32),
        grid_spec=pltpu.PrefetchScalarGridSpec(
            num_scalar_prefetch=0,
            grid=(B, nd),
            in_specs=[
                pl.BlockSpec((None, C, d_tile, H, W),
                             lambda b, d: (b, 0, d, 0, 0)),
                pl.BlockSpec((None, d_tile, H, W),
                             lambda b, d: (b, d, 0, 0)),
            ],
            out_specs=pl.BlockSpec((None, 1, 128), lambda b, d: (b, 0, 0)),
            scratch_shapes=[
                pltpu.VMEM((C, d_tile, H, W), jnp.float32),  # exp(p - m) cache
                pltpu.VMEM((C, H, W), jnp.float32),   # carry: softmax last slice
                pltpu.VMEM((C, H, W), jnp.float32),   # carry: H/W grad-diff last slice
                pltpu.VMEM((H, W), jnp.int32),        # carry: target last slice
            ],
        ),
        compiler_params=pltpu.CompilerParams(
            dimension_semantics=("parallel", "arbitrary"),
            vmem_limit_bytes=vmem_limit,
        ),
    )(pred, target)

    # O(B*C) epilogue: weighted combination of the per-batch partial reductions.
    inter = stats[:, 0, 0:C]
    union = stats[:, 0, C:2 * C]
    dice_score = (2.0 * inter + smooth) / (union + smooth)
    dice = 1.0 - jnp.mean(dice_score)
    focal = jnp.sum(stats[:, 0, 2 * C]) / (B * D * H * W)
    boundary = jnp.sum(stats[:, 0, 2 * C + 1]) / (B * C * D * H * W)
    total = alpha * dice + beta * focal + gamma * boundary
    # TODO(synk): PyTorch returns python floats via .item(); values stay JAX scalars here.
    return total, {"dice_loss": dice, "focal_loss": focal,
                   "boundary_loss": boundary, "total_loss": total}


def _reference(pred, target, alpha=0.5, beta=0.3, gamma=0.2, smooth=1e-5):
    """Pure-JAX reference mirroring the PyTorch forward, for validation."""
    pred = pred.astype(jnp.float32)
    B, C, D, H, W = pred.shape
    sm = jax.nn.softmax(pred, axis=1)
    oh = jax.nn.one_hot(target, C, axis=1, dtype=jnp.float32)     # (B,C,D,H,W)

    inter = jnp.sum(sm * oh, axis=(2, 3, 4))
    union = jnp.sum(sm, axis=(2, 3, 4)) + jnp.sum(oh, axis=(2, 3, 4))
    dice = 1.0 - jnp.mean((2.0 * inter + smooth) / (union + smooth))

    logp = jax.nn.log_softmax(pred, axis=1)
    ce = -jnp.sum(oh * logp, axis=1)
    pt = jnp.exp(-ce)
    focal = jnp.mean(0.25 * (1.0 - pt) ** 2 * ce)

    def grad3d(x):
        gx = jnp.pad(jnp.abs(x[:, :, 1:] - x[:, :, :-1]),
                     ((0, 0), (0, 0), (0, 1), (0, 0), (0, 0)))
        gy = jnp.pad(jnp.abs(x[:, :, :, 1:] - x[:, :, :, :-1]),
                     ((0, 0), (0, 0), (0, 0), (0, 1), (0, 0)))
        gz = jnp.pad(jnp.abs(x[..., 1:] - x[..., :-1]),
                     ((0, 0), (0, 0), (0, 0), (0, 0), (0, 1)))
        return gx + gy + gz

    boundary = jnp.mean((grad3d(sm) - grad3d(oh)) ** 2)
    total = alpha * dice + beta * focal + gamma * boundary
    return total, dice, focal, boundary


if __name__ == "__main__":
    key = jax.random.PRNGKey(0)
    k1, k2 = jax.random.split(key)
    # Lane-dense layout: W = 128 maps exactly onto the 128-lane axis.
    B, C, D, H, W = 2, 4, 8, 8, 128
    pred = jax.random.normal(k1, (B, C, D, H, W), dtype=jnp.float32)
    target = jax.random.randint(k2, (B, D, H, W), 0, C, dtype=jnp.int32)

    ref_total, ref_dice, ref_focal, ref_bnd = _reference(pred, target)

    # d_tile=4 exercises the cross-tile D-gradient seam carry (2 tiles per
    # batch element); d_tile=None takes the auto (single-tile here) path.
    for d_tile in (4, None):
        total, parts = combined_loss_3d(pred, target, d_tile=d_tile)
        total = jax.block_until_ready(total)
        assert jnp.allclose(total, ref_total, atol=2e-4, rtol=2e-4)
        assert jnp.allclose(parts["dice_loss"], ref_dice, atol=2e-4, rtol=2e-4)
        assert jnp.allclose(parts["focal_loss"], ref_focal, atol=2e-4, rtol=2e-4)
        assert jnp.allclose(parts["boundary_loss"], ref_bnd, atol=2e-4, rtol=2e-4)

    print("KERNEL_OK")
</pallas_src>

<mosaic_0001>
module attributes {stable_mosaic.version = 11 : i64} {
  func.func @_combined_loss_kernel(%arg0: i32, %arg1: i32, %arg2: memref<1x4x4x8x128xf32, #tpu.memory_space<vmem>>, %arg3: memref<1x4x8x128xi32, #tpu.memory_space<vmem>>, %arg4: memref<1x1x128xf32, #tpu.memory_space<vmem>>, %arg5: memref<4x4x8x128xf32, #tpu.memory_space<vmem>>, %arg6: memref<4x8x128xf32, #tpu.memory_space<vmem>>, %arg7: memref<4x8x128xf32, #tpu.memory_space<vmem>>, %arg8: memref<8x128xi32, #tpu.memory_space<vmem>>) attributes {dimension_semantics = [#tpu.dimension_semantics<parallel>, #tpu.dimension_semantics<arbitrary>], iteration_bounds = array<i64: 2, 2>, scalar_prefetch = 0 : i64, scratch_operands = 4 : i64, tpu.core_type = #tpu.core_type<tc>, window_params = [{transform_indices = @transform_0, window_bounds = array<i64: 1, 4, 4, 8, 128>}, {transform_indices = @transform_1, window_bounds = array<i64: 1, 4, 8, 128>}, {transform_indices = @transform_2, window_bounds = array<i64: 1, 1, 128>}]} {
    %c0_i32 = arith.constant 0 : i32
    %0 = arith.cmpi eq, %arg1, %c0_i32 : i32
    %c1_i32 = arith.constant 1 : i32
    %1 = arith.cmpi eq, %arg1, %c1_i32 : i32
    %2 = tpu.iota {dimensions = array<i32: 1>} : vector<1x128xi32>
    %3 = arith.extui %0 : i1 to i32
    %c0_i32_0 = arith.constant 0 : i32
    %4 = arith.cmpi ne, %3, %c0_i32_0 : i32
    scf.if %4 {
      %cst_171 = arith.constant 0.000000e+00 : f32
      %445 = vector.broadcast %cst_171 : f32 to vector<1x128xf32>
      %c0_172 = arith.constant 0 : index
      %c0_173 = arith.constant 0 : index
      %c0_174 = arith.constant 0 : index
      %446 = vector.load %arg4[%c0_172, %c0_173, %c0_174] : memref<1x1x128xf32, #tpu.memory_space<vmem>>, vector<1x1x128xf32>
      %447 = vector.shape_cast %446 : vector<1x1x128xf32> to vector<1x128xf32>
      %448 = vector.shape_cast %445 : vector<1x128xf32> to vector<1x1x128xf32>
      tpu.vector_store %arg4[%c0_172, %c0_173, %c0_174], %448 {strides = array<i32>} : memref<1x1x128xf32, #tpu.memory_space<vmem>>, vector<1x1x128xf32>,
    } else {
    }
    %c0 = arith.constant 0 : index
    %c0_1 = arith.constant 0 : index
    %c0_2 = arith.constant 0 : index
    %c0_3 = arith.constant 0 : index
    %5 = vector.load %arg3[%c0, %c0_1, %c0_2, %c0_3] : memref<1x4x8x128xi32, #tpu.memory_space<vmem>>, vector<1x4x8x128xi32>
    %6 = vector.shape_cast %5 : vector<1x4x8x128xi32> to vector<4x8x128xi32>
    %c0_4 = arith.constant 0 : index
    %c0_5 = arith.constant 0 : index
    %c0_6 = arith.constant 0 : index
    %c0_7 = arith.constant 0 : index
    %c0_8 = arith.constant 0 : index
    %7 = vector.load %arg2[%c0_4, %c0_5, %c0_6, %c0_7, %c0_8] : memref<1x4x4x8x128xf32, #tpu.memory_space<vmem>>, vector<1x1x4x8x128xf32>
    %8 = vector.shape_cast %7 : vector<1x1x4x8x128xf32> to vector<4x8x128xf32>
    %c0_9 = arith.constant 0 : index
    %c1 = arith.constant 1 : index
    %c0_10 = arith.constant 0 : index
    %c0_11 = arith.constant 0 : index
    %c0_12 = arith.constant 0 : index
    %9 = vector.load %arg2[%c0_9, %c1, %c0_10, %c0_11, %c0_12] : memref<1x4x4x8x128xf32, #tpu.memory_space<vmem>>, vector<1x1x4x8x128xf32>
    %10 = vector.shape_cast %9 : vector<1x1x4x8x128xf32> to vector<4x8x128xf32>
    %11 = arith.maximumf %8, %10 : vector<4x8x128xf32>
    %c0_13 = arith.constant 0 : index
    %c2 = arith.constant 2 : index
    %c0_14 = arith.constant 0 : index
    %c0_15 = arith.constant 0 : index
    %c0_16 = arith.constant 0 : index
    %12 = vector.load %arg2[%c0_13, %c2, %c0_14, %c0_15, %c0_16] : memref<1x4x4x8x128xf32, #tpu.memory_space<vmem>>, vector<1x1x4x8x128xf32>
    %13 = vector.shape_cast %12 : vector<1x1x4x8x128xf32> to vector<4x8x128xf32>
    %14 = arith.maximumf %11, %13 : vector<4x8x128xf32>
    %c0_17 = arith.constant 0 : index
    %c3 = arith.constant 3 : index
    %c0_18 = arith.constant 0 : index
    %c0_19 = arith.constant 0 : index
    %c0_20 = arith.constant 0 : index
    %15 = vector.load %arg2[%c0_17, %c3, %c0_18, %c0_19, %c0_20] : memref<1x4x4x8x128xf32, #tpu.memory_space<vmem>>, vector<1x1x4x8x128xf32>
    %16 = vector.shape_cast %15 : vector<1x1x4x8x128xf32> to vector<4x8x128xf32>
    %17 = arith.maximumf %14, %16 : vector<4x8x128xf32>
    %cst = arith.constant 0.000000e+00 : f32
    %18 = vector.broadcast %cst : f32 to vector<4x8x128xf32>
    %c0_21 = arith.constant 0 : index
    %c0_22 = arith.constant 0 : index
    %c0_23 = arith.constant 0 : index
    %c0_24 = arith.constant 0 : index
    %c0_25 = arith.constant 0 : index
    %19 = vector.load %arg2[%c0_21, %c0_22, %c0_23, %c0_24, %c0_25] : memref<1x4x4x8x128xf32, #tpu.memory_space<vmem>>, vector<1x1x4x8x128xf32>
    %20 = vector.shape_cast %19 : vector<1x1x4x8x128xf32> to vector<4x8x128xf32>
    %21 = arith.subf %20, %17 : vector<4x8x128xf32>
    %22 = math.exp %21 : vector<4x8x128xf32>
    %c0_26 = arith.constant 0 : index
    %c0_27 = arith.constant 0 : index
    %c0_28 = arith.constant 0 : index
    %c0_29 = arith.constant 0 : index
    %23 = vector.load %arg5[%c0_26, %c0_27, %c0_28, %c0_29] : memref<4x4x8x128xf32, #tpu.memory_space<vmem>>, vector<1x4x8x128xf32>
    %24 = vector.shape_cast %23 : vector<1x4x8x128xf32> to vector<4x8x128xf32>
    %25 = vector.shape_cast %22 : vector<4x8x128xf32> to vector<1x4x8x128xf32>
    tpu.vector_store %arg5[%c0_26, %c0_27, %c0_28, %c0_29], %25 {strides = array<i32>} : memref<4x4x8x128xf32, #tpu.memory_space<vmem>>, vector<1x4x8x128xf32>,
    %26 = arith.addf %18, %22 : vector<4x8x128xf32>
    %c0_30 = arith.constant 0 : index
    %c1_31 = arith.constant 1 : index
    %c0_32 = arith.constant 0 : index
    %c0_33 = arith.constant 0 : index
    %c0_34 = arith.constant 0 : index
    %27 = vector.load %arg2[%c0_30, %c1_31, %c0_32, %c0_33, %c0_34] : memref<1x4x4x8x128xf32, #tpu.memory_space<vmem>>, vector<1x1x4x8x128xf32>
    %28 = vector.shape_cast %27 : vector<1x1x4x8x128xf32> to vector<4x8x128xf32>
    %29 = arith.subf %28, %17 : vector<4x8x128xf32>
    %30 = math.exp %29 : vector<4x8x128xf32>
    %c1_35 = arith.constant 1 : index
    %c0_36 = arith.constant 0 : index
    %c0_37 = arith.constant 0 : index
    %c0_38 = arith.constant 0 : index
    %31 = vector.load %arg5[%c1_35, %c0_36, %c0_37, %c0_38] : memref<4x4x8x128xf32, #tpu.memory_space<vmem>>, vector<1x4x8x128xf32>
    %32 = vector.shape_cast %31 : vector<1x4x8x128xf32> to vector<4x8x128xf32>
    %33 = vector.shape_cast %30 : vector<4x8x128xf32> to vector<1x4x8x128xf32>
    tpu.vector_store %arg5[%c1_35, %c0_36, %c0_37, %c0_38], %33 {strides = array<i32>} : memref<4x4x8x128xf32, #tpu.memory_space<vmem>>, vector<1x4x8x128xf32>,
    %34 = arith.addf %26, %30 : vector<4x8x128xf32>
    %c0_39 = arith.constant 0 : index
    %c2_40 = arith.constant 2 : index
    %c0_41 = arith.constant 0 : index
    %c0_42 = arith.constant 0 : index
    %c0_43 = arith.constant 0 : index
    %35 = vector.load %arg2[%c0_39, %c2_40, %c0_41, %c0_42, %c0_43] : memref<1x4x4x8x128xf32, #tpu.memory_space<vmem>>, vector<1x1x4x8x128xf32>
    %36 = vector.shape_cast %35 : vector<1x1x4x8x128xf32> to vector<4x8x128xf32>
    %37 = arith.subf %36, %17 : vector<4x8x128xf32>
    %38 = math.exp %37 : vector<4x8x128xf32>
    %c2_44 = arith.constant 2 : index
    %c0_45 = arith.constant 0 : index
    %c0_46 = arith.constant 0 : index
    %c0_47 = arith.constant 0 : index
    %39 = vector.load %arg5[%c2_44, %c0_45, %c0_46, %c0_47] : memref<4x4x8x128xf32, #tpu.memory_space<vmem>>, vector<1x4x8x128xf32>
    %40 = vector.shape_cast %39 : vector<1x4x8x128xf32> to vector<4x8x128xf32>
    %41 = vector.shape_cast %38 : vector<4x8x128xf32> to vector<1x4x8x128xf32>
    tpu.vector_store %arg5[%c2_44, %c0_45, %c0_46, %c0_47], %41 {strides = array<i32>} : memref<4x4x8x128xf32, #tpu.memory_space<vmem>>, vector<1x4x8x128xf32>,
    %42 = arith.addf %34, %38 : vector<4x8x128xf32>
    %c0_48 = arith.constant 0 : index
    %c3_49 = arith.constant 3 : index
    %c0_50 = arith.constant 0 : index
    %c0_51 = arith.constant 0 : index
    %c0_52 = arith.constant 0 : index
    %43 = vector.load %arg2[%c0_48, %c3_49, %c0_50, %c0_51, %c0_52] : memref<1x4x4x8x128xf32, #tpu.memory_space<vmem>>, vector<1x1x4x8x128xf32>
    %44 = vector.shape_cast %43 : vector<1x1x4x8x128xf32> to vector<4x8x128xf32>
    %45 = arith.subf %44, %17 : vector<4x8x128xf32>
    %46 = math.exp %45 : vector<4x8x128xf32>
    %c3_53 = arith.constant 3 : index
    %c0_54 = arith.constant 0 : index
    %c0_55 = arith.constant 0 : index
    %c0_56 = arith.constant 0 : index
    %47 = vector.load %arg5[%c3_53, %c0_54, %c0_55, %c0_56] : memref<4x4x8x128xf32, #tpu.memory_space<vmem>>, vector<1x4x8x128xf32>
    %48 = vector.shape_cast %47 : vector<1x4x8x128xf32> to vector<4x8x128xf32>
    %49 = vector.shape_cast %46 : vector<4x8x128xf32> to vector<1x4x8x128xf32>
    tpu.vector_store %arg5[%c3_53, %c0_54, %c0_55, %c0_56], %49 {strides = array<i32>} : memref<4x4x8x128xf32, #tpu.memory_space<vmem>>, vector<1x4x8x128xf32>,
    %50 = arith.addf %42, %46 : vector<4x8x128xf32>
    %cst_57 = arith.constant 1.000000e+00 : f32
    %51 = vector.broadcast %cst_57 : f32 to vector<4x8x128xf32>
    %52 = arith.divf %51, %50 : vector<4x8x128xf32>
    %53 = tpu.iota {dimensions = array<i32: 1>} : vector<1x8x128xi32>
    %c7_i32 = arith.constant 7 : i32
    %54 = vector.broadcast %c7_i32 : i32 to vector<1x8x128xi32>
    %55 = arith.cmpi slt, %53, %54 : vector<1x8x128xi32>
    %56 = arith.extui %55 : vector<1x8x128xi1> to vector<1x8x128xi32>
    %57 = arith.sitofp %56 : vector<1x8x128xi32> to vector<1x8x128xf32>
    %58 = tpu.iota {dimensions = array<i32: 2>} : vector<1x8x128xi32>
    %c127_i32 = arith.constant 127 : i32
    %59 = vector.broadcast %c127_i32 : i32 to vector<1x8x128xi32>
    %60 = arith.cmpi slt, %58, %59 : vector<1x8x128xi32>
    %61 = arith.extui %60 : vector<1x8x128xi1> to vector<1x8x128xi32>
    %62 = arith.sitofp %61 : vector<1x8x128xi32> to vector<1x8x128xf32>
    %63 = arith.sitofp %6 : vector<4x8x128xi32> to vector<4x8x128xf32>
    %c7_i32_58 = arith.constant 7 : i32
    %64 = tpu.dynamic_rotate %63 by %c7_i32_58 dim 1 : vector<4x8x128xf32>, i32 -> vector<4x8x128xf32>
    %c127_i32_59 = arith.constant 127 : i32
    %65 = tpu.dynamic_rotate %63 by %c127_i32_59 dim 2 : vector<4x8x128xf32>, i32 -> vector<4x8x128xf32>
    %c0_i32_60 = arith.constant 0 : i32
    %66 = arith.cmpi ne, %arg1, %c0_i32_60 : i32
    %67 = arith.extui %66 : i1 to i32
    %c0_i32_61 = arith.constant 0 : i32
    %68 = arith.cmpi ne, %67, %c0_i32_61 : i32
    scf.if %68 {
      %445 = vector.extract_strided_slice %6 {offsets = [0, 0, 0], sizes = [1, 8, 128], strides = [1, 1, 1]} : vector<4x8x128xi32> to vector<1x8x128xi32>
      %446 = vector.shape_cast %445 : vector<1x8x128xi32> to vector<8x128xi32>
      %c0_171 = arith.constant 0 : index
      %c0_172 = arith.constant 0 : index
      %447 = vector.load %arg8[%c0_171, %c0_172] : memref<8x128xi32, #tpu.memory_space<vmem>>, vector<8x128xi32>
      %448 = vector.extract_strided_slice %52 {offsets = [0, 0, 0], sizes = [1, 8, 128], strides = [1, 1, 1]} : vector<4x8x128xf32> to vector<1x8x128xf32>
      %449 = vector.shape_cast %448 : vector<1x8x128xf32> to vector<8x128xf32>
      %c0_173 = arith.constant 0 : index
      %c0_174 = arith.constant 0 : index
      %c0_175 = arith.constant 0 : index
      %c0_176 = arith.constant 0 : index
      %450 = vector.load %arg5[%c0_173, %c0_174, %c0_175, %c0_176] : memref<4x4x8x128xf32, #tpu.memory_space<vmem>>, vector<1x1x8x128xf32>
      %451 = vector.shape_cast %450 : vector<1x1x8x128xf32> to vector<8x128xf32>
      %452 = arith.mulf %451, %449 : vector<8x128xf32>
      %c0_i32_177 = arith.constant 0 : i32
      %453 = vector.broadcast %c0_i32_177 : i32 to vector<8x128xi32>
      %454 = arith.cmpi eq, %446, %453 : vector<8x128xi32>
      %c0_i32_178 = arith.constant 0 : i32
      %455 = vector.broadcast %c0_i32_178 : i32 to vector<8x128xi32>
      %456 = arith.cmpi eq, %447, %455 : vector<8x128xi32>
      %457 = arith.xori %454, %456 : vector<8x128xi1>
      %458 = arith.extui %457 : vector<8x128xi1> to vector<8x128xi32>
      %459 = arith.sitofp %458 : vector<8x128xi32> to vector<8x128xf32>
      %c0_179 = arith.constant 0 : index
      %c0_180 = arith.constant 0 : index
      %c0_181 = arith.constant 0 : index
      %460 = vector.load %arg7[%c0_179, %c0_180, %c0_181] : memref<4x8x128xf32, #tpu.memory_space<vmem>>, vector<1x8x128xf32>
      %461 = vector.shape_cast %460 : vector<1x8x128xf32> to vector<8x128xf32>
      %c0_182 = arith.constant 0 : index
      %c0_183 = arith.constant 0 : index
      %c0_184 = arith.constant 0 : index
      %462 = vector.load %arg6[%c0_182, %c0_183, %c0_184] : memref<4x8x128xf32, #tpu.memory_space<vmem>>, vector<1x8x128xf32>
      %463 = vector.shape_cast %462 : vector<1x8x128xf32> to vector<8x128xf32>
      %464 = arith.subf %452, %463 : vector<8x128xf32>
      %465 = math.absf %464 : vector<8x128xf32>
      %466 = arith.addf %461, %465 : vector<8x128xf32>
      %467 = arith.subf %466, %459 : vector<8x128xf32>
      %468 = arith.mulf %467, %467 : vector<8x128xf32>
      %469 = vector.shape_cast %468 : vector<8x128xf32> to vector<1x8x128xf32>
      %cst_185 = arith.constant dense<0.000000e+00> : vector<1xf32>
      %470 = vector.multi_reduction <add>, %469, %cst_185 [1, 2] : vector<1x8x128xf32> to vector<1xf32>
      %471 = vector.shape_cast %470 : vector<1xf32> to vector<1x1x1xf32>
      %472 = vector.extract %471[0, 0, 0] : f32 from vector<1x1x1xf32>
      %cst_186 = arith.constant 0.000000e+00 : f32
      %473 = arith.addf %cst_186, %472 : f32
      %c1_187 = arith.constant 1 : index
      %c0_188 = arith.constant 0 : index
      %c0_189 = arith.constant 0 : index
      %c0_190 = arith.constant 0 : index
      %474 = vector.load %arg5[%c1_187, %c0_188, %c0_189, %c0_190] : memref<4x4x8x128xf32, #tpu.memory_space<vmem>>, vector<1x1x8x128xf32>
      %475 = vector.shape_cast %474 : vector<1x1x8x128xf32> to vector<8x128xf32>
      %476 = arith.mulf %475, %449 : vector<8x128xf32>
      %c1_i32_191 = arith.constant 1 : i32
      %477 = vector.broadcast %c1_i32_191 : i32 to vector<8x128xi32>
      %478 = arith.cmpi eq, %446, %477 : vector<8x128xi32>
      %c1_i32_192 = arith.constant 1 : i32
      %479 = vector.broadcast %c1_i32_192 : i32 to vector<8x128xi32>
      %480 = arith.cmpi eq, %447, %479 : vector<8x128xi32>
      %481 = arith.xori %478, %480 : vector<8x128xi1>
      %482 = arith.extui %481 : vector<8x128xi1> to vector<8x128xi32>
      %483 = arith.sitofp %482 : vector<8x128xi32> to vector<8x128xf32>
      %c1_193 = arith.constant 1 : index
      %c0_194 = arith.constant 0 : index
      %c0_195 = arith.constant 0 : index
      %484 = vector.load %arg7[%c1_193, %c0_194, %c0_195] : memref<4x8x128xf32, #tpu.memory_space<vmem>>, vector<1x8x128xf32>
      %485 = vector.shape_cast %484 : vector<1x8x128xf32> to vector<8x128xf32>
      %c1_196 = arith.constant 1 : index
      %c0_197 = arith.constant 0 : index
      %c0_198 = arith.constant 0 : index
      %486 = vector.load %arg6[%c1_196, %c0_197, %c0_198] : memref<4x8x128xf32, #tpu.memory_space<vmem>>, vector<1x8x128xf32>
      %487 = vector.shape_cast %486 : vector<1x8x128xf32> to vector<8x128xf32>
      %488 = arith.subf %476, %487 : vector<8x128xf32>
      %489 = math.absf %488 : vector<8x128xf32>
      %490 = arith.addf %485, %489 : vector<8x128xf32>
      %491 = arith.subf %490, %483 : vector<8x128xf32>
      %492 = arith.mulf %491, %491 : vector<8x128xf32>
      %493 = vector.shape_cast %492 : vector<8x128xf32> to vector<1x8x128xf32>
      %cst_199 = arith.constant dense<0.000000e+00> : vector<1xf32>
      %494 = vector.multi_reduction <add>, %493, %cst_199 [1, 2] : vector<1x8x128xf32> to vector<1xf32>
      %495 = vector.shape_cast %494 : vector<1xf32> to vector<1x1x1xf32>
      %496 = vector.extract %495[0, 0, 0] : f32 from vector<1x1x1xf32>
      %497 = arith.addf %473, %496 : f32
      %c2_200 = arith.constant 2 : index
      %c0_201 = arith.constant 0 : index
      %c0_202 = arith.constant 0 : index
      %c0_203 = arith.constant 0 : index
      %498 = vector.load %arg5[%c2_200, %c0_201, %c0_202, %c0_203] : memref<4x4x8x128xf32, #tpu.memory_space<vmem>>, vector<1x1x8x128xf32>
      %499 = vector.shape_cast %498 : vector<1x1x8x128xf32> to vector<8x128xf32>
      %500 = arith.mulf %499, %449 : vector<8x128xf32>
      %c2_i32_204 = arith.constant 2 : i32
      %501 = vector.broadcast %c2_i32_204 : i32 to vector<8x128xi32>
      %502 = arith.cmpi eq, %446, %501 : vector<8x128xi32>
      %c2_i32_205 = arith.constant 2 : i32
      %503 = vector.broadcast %c2_i32_205 : i32 to vector<8x128xi32>
      %504 = arith.cmpi eq, %447, %503 : vector<8x128xi32>
      %505 = arith.xori %502, %504 : vector<8x128xi1>
      %506 = arith.extui %505 : vector<8x128xi1> to vector<8x128xi32>
      %507 = arith.sitofp %506 : vector<8x128xi32> to vector<8x128xf32>
      %c2_206 = arith.constant 2 : index
      %c0_207 = arith.constant 0 : index
      %c0_208 = arith.constant 0 : index
      %508 = vector.load %arg7[%c2_206, %c0_207, %c0_208] : memref<4x8x128xf32, #tpu.memory_space<vmem>>, vector<1x8x128xf32>
      %509 = vector.shape_cast %508 : vector<1x8x128xf32> to vector<8x128xf32>
      %c2_209 = arith.constant 2 : index
      %c0_210 = arith.constant 0 : index
      %c0_211 = arith.constant 0 : index
      %510 = vector.load %arg6[%c2_209, %c0_210, %c0_211] : memref<4x8x128xf32, #tpu.memory_space<vmem>>, vector<1x8x128xf32>
      %511 = vector.shape_cast %510 : vector<1x8x128xf32> to vector<8x128xf32>
      %512 = arith.subf %500, %511 : vector<8x128xf32>
      %513 = math.absf %512 : vector<8x128xf32>
      %514 = arith.addf %509, %513 : vector<8x128xf32>
      %515 = arith.subf %514, %507 : vector<8x128xf32>
      %516 = arith.mulf %515, %515 : vector<8x128xf32>
      %517 = vector.shape_cast %516 : vector<8x128xf32> to vector<1x8x128xf32>
      %cst_212 = arith.constant dense<0.000000e+00> : vector<1xf32>
      %518 = vector.multi_reduction <add>, %517, %cst_212 [1, 2] : vector<1x8x128xf32> to vector<1xf32>
      %519 = vector.shape_cast %518 : vector<1xf32> to vector<1x1x1xf32>
      %520 = vector.extract %519[0, 0, 0] : f32 from vector<1x1x1xf32>
      %521 = arith.addf %497, %520 : f32
      %c3_213 = arith.constant 3 : index
      %c0_214 = arith.constant 0 : index
      %c0_215 = arith.constant 0 : index
      %c0_216 = arith.constant 0 : index
      %522 = vector.load %arg5[%c3_213, %c0_214, %c0_215, %c0_216] : memref<4x4x8x128xf32, #tpu.memory_space<vmem>>, vector<1x1x8x128xf32>
      %523 = vector.shape_cast %522 : vector<1x1x8x128xf32> to vector<8x128xf32>
      %524 = arith.mulf %523, %449 : vector<8x128xf32>
      %c3_i32_217 = arith.constant 3 : i32
      %525 = vector.broadcast %c3_i32_217 : i32 to vector<8x128xi32>
      %526 = arith.cmpi eq, %446, %525 : vector<8x128xi32>
      %c3_i32_218 = arith.constant 3 : i32
      %527 = vector.broadcast %c3_i32_218 : i32 to vector<8x128xi32>
      %528 = arith.cmpi eq, %447, %527 : vector<8x128xi32>
      %529 = arith.xori %526, %528 : vector<8x128xi1>
      %530 = arith.extui %529 : vector<8x128xi1> to vector<8x128xi32>
      %531 = arith.sitofp %530 : vector<8x128xi32> to vector<8x128xf32>
      %c3_219 = arith.constant 3 : index
      %c0_220 = arith.constant 0 : index
      %c0_221 = arith.constant 0 : index
      %532 = vector.load %arg7[%c3_219, %c0_220, %c0_221] : memref<4x8x128xf32, #tpu.memory_space<vmem>>, vector<1x8x128xf32>
      %533 = vector.shape_cast %532 : vector<1x8x128xf32> to vector<8x128xf32>
      %c3_222 = arith.constant 3 : index
      %c0_223 = arith.constant 0 : index
      %c0_224 = arith.constant 0 : index
      %534 = vector.load %arg6[%c3_222, %c0_223, %c0_224] : memref<4x8x128xf32, #tpu.memory_space<vmem>>, vector<1x8x128xf32>
      %535 = vector.shape_cast %534 : vector<1x8x128xf32> to vector<8x128xf32>
      %536 = arith.subf %524, %535 : vector<8x128xf32>
      %537 = math.absf %536 : vector<8x128xf32>
      %538 = arith.addf %533, %537 : vector<8x128xf32>
      %539 = arith.subf %538, %531 : vector<8x128xf32>
      %540 = arith.mulf %539, %539 : vector<8x128xf32>
      %541 = vector.shape_cast %540 : vector<8x128xf32> to vector<1x8x128xf32>
      %cst_225 = arith.constant dense<0.000000e+00> : vector<1xf32>
      %542 = vector.multi_reduction <add>, %541, %cst_225 [1, 2] : vector<1x8x128xf32> to vector<1xf32>
      %543 = vector.shape_cast %542 : vector<1xf32> to vector<1x1x1xf32>
      %544 = vector.extract %543[0, 0, 0] : f32 from vector<1x1x1xf32>
      %545 = arith.addf %521, %544 : f32
      %c0_226 = arith.constant 0 : index
      %c0_227 = arith.constant 0 : index
      %c0_228 = arith.constant 0 : index
      %546 = vector.load %arg4[%c0_226, %c0_227, %c0_228] : memref<1x1x128xf32, #tpu.memory_space<vmem>>, vector<1x1x128xf32>
      %547 = vector.shape_cast %546 : vector<1x1x128xf32> to vector<1x128xf32>
      %c9_i32_229 = arith.constant 9 : i32
      %548 = vector.broadcast %c9_i32_229 : i32 to vector<1x128xi32>
      %549 = arith.cmpi eq, %2, %548 : vector<1x128xi32>
      %cst_230 = arith.constant 0.000000e+00 : f32
      %550 = vector.broadcast %545 : f32 to vector<1x128xf32>
      %551 = vector.broadcast %cst_230 : f32 to vector<1x128xf32>
      %552 = arith.select %549, %550, %551 : vector<1x128xi1>, vector<1x128xf32>
      %553 = arith.addf %547, %552 : vector<1x128xf32>
      %c0_231 = arith.constant 0 : index
      %c0_232 = arith.constant 0 : index
      %c0_233 = arith.constant 0 : index
      %554 = vector.load %arg4[%c0_231, %c0_232, %c0_233] : memref<1x1x128xf32, #tpu.memory_space<vmem>>, vector<1x1x128xf32>
      %555 = vector.shape_cast %554 : vector<1x1x128xf32> to vector<1x128xf32>
      %556 = vector.shape_cast %553 : vector<1x128xf32> to vector<1x1x128xf32>
      tpu.vector_store %arg4[%c0_231, %c0_232, %c0_233], %556 {strides = array<i32>} : memref<1x1x128xf32, #tpu.memory_space<vmem>>, vector<1x1x128xf32>,
    } else {
    }
    %69 = vector.extract_strided_slice %6 {offsets = [0, 0, 0], sizes = [3, 8, 128], strides = [1, 1, 1]} : vector<4x8x128xi32> to vector<3x8x128xi32>
    %70 = vector.extract_strided_slice %6 {offsets = [1, 0, 0], sizes = [3, 8, 128], strides = [1, 1, 1]} : vector<4x8x128xi32> to vector<3x8x128xi32>
    %cst_62 = arith.constant 0.000000e+00 : f32
    %71 = vector.broadcast %cst_62 : f32 to vector<4x8x128xf32>
    %c0_63 = arith.constant 0 : index
    %c0_64 = arith.constant 0 : index
    %c0_65 = arith.constant 0 : index
    %c0_66 = arith.constant 0 : index
    %72 = vector.load %arg5[%c0_63, %c0_64, %c0_65, %c0_66] : memref<4x4x8x128xf32, #tpu.memory_space<vmem>>, vector<1x4x8x128xf32>
    %73 = vector.shape_cast %72 : vector<1x4x8x128xf32> to vector<4x8x128xf32>
    %74 = arith.mulf %73, %52 : vector<4x8x128xf32>
    %c0_i32_67 = arith.constant 0 : i32
    %75 = vector.broadcast %c0_i32_67 : i32 to vector<4x8x128xi32>
    %76 = arith.cmpi eq, %6, %75 : vector<4x8x128xi32>
    %cst_68 = arith.constant 0.000000e+00 : f32
    %77 = vector.broadcast %cst_68 : f32 to vector<4x8x128xf32>
    %78 = arith.select %76, %74, %77 : vector<4x8x128xi1>, vector<4x8x128xf32>
    %79 = arith.addf %71, %78 : vector<4x8x128xf32>
    %80 = vector.shape_cast %78 : vector<4x8x128xf32> to vector<1x4x8x128xf32>
    %cst_69 = arith.constant dense<0.000000e+00> : vector<1xf32>
    %81 = vector.multi_reduction <add>, %80, %cst_69 [1, 2, 3] : vector<1x4x8x128xf32> to vector<1xf32>
    %82 = vector.shape_cast %81 : vector<1xf32> to vector<1x1x1x1xf32>
    %83 = vector.extract %82[0, 0, 0, 0] : f32 from vector<1x1x1x1xf32>
    %84 = vector.shape_cast %74 : vector<4x8x128xf32> to vector<1x4x8x128xf32>
    %cst_70 = arith.constant dense<0.000000e+00> : vector<1xf32>
    %85 = vector.multi_reduction <add>, %84, %cst_70 [1, 2, 3] : vector<1x4x8x128xf32> to vector<1xf32>
    %86 = vector.shape_cast %85 : vector<1xf32> to vector<1x1x1x1xf32>
    %87 = vector.extract %86[0, 0, 0, 0] : f32 from vector<1x1x1x1xf32>
    %88 = arith.extui %76 : vector<4x8x128xi1> to vector<4x8x128xi32>
    %89 = arith.sitofp %88 : vector<4x8x128xi32> to vector<4x8x128xf32>
    %90 = vector.shape_cast %89 : vector<4x8x128xf32> to vector<1x4x8x128xf32>
    %cst_71 = arith.constant dense<0.000000e+00> : vector<1xf32>
    %91 = vector.multi_reduction <add>, %90, %cst_71 [1, 2, 3] : vector<1x4x8x128xf32> to vector<1xf32>
    %92 = vector.shape_cast %91 : vector<1xf32> to vector<1x1x1x1xf32>
    %93 = vector.extract %92[0, 0, 0, 0] : f32 from vector<1x1x1x1xf32>
    %94 = arith.addf %87, %93 : f32
    %c7_i32_72 = arith.constant 7 : i32
    %95 = tpu.dynamic_rotate %74 by %c7_i32_72 dim 1 : vector<4x8x128xf32>, i32 -> vector<4x8x128xf32>
    %96 = arith.subf %95, %74 : vector<4x8x128xf32>
    %97 = math.absf %96 : vector<4x8x128xf32>
    %c127_i32_73 = arith.constant 127 : i32
    %98 = tpu.dynamic_rotate %74 by %c127_i32_73 dim 2 : vector<4x8x128xf32>, i32 -> vector<4x8x128xf32>
    %99 = arith.subf %98, %74 : vector<4x8x128xf32>
    %100 = math.absf %99 : vector<4x8x128xf32>
    %cst_74 = arith.constant 0.000000e+00 : f32
    %101 = vector.broadcast %cst_74 : f32 to vector<4x8x128xf32>
    %102 = arith.cmpf oeq, %64, %101 : vector<4x8x128xf32>
    %103 = arith.xori %102, %76 : vector<4x8x128xi1>
    %104 = arith.extui %103 : vector<4x8x128xi1> to vector<4x8x128xi32>
    %105 = arith.sitofp %104 : vector<4x8x128xi32> to vector<4x8x128xf32>
    %cst_75 = arith.constant 0.000000e+00 : f32
    %106 = vector.broadcast %cst_75 : f32 to vector<4x8x128xf32>
    %107 = arith.cmpf oeq, %65, %106 : vector<4x8x128xf32>
    %108 = arith.xori %107, %76 : vector<4x8x128xi1>
    %109 = arith.extui %108 : vector<4x8x128xi1> to vector<4x8x128xi32>
    %110 = arith.sitofp %109 : vector<4x8x128xi32> to vector<4x8x128xf32>
    %111 = arith.subf %97, %105 : vector<4x8x128xf32>
    %112 = vector.broadcast %57 : vector<1x8x128xf32> to vector<4x8x128xf32>
    %113 = arith.mulf %111, %112 : vector<4x8x128xf32>
    %114 = arith.subf %100, %110 : vector<4x8x128xf32>
    %115 = vector.broadcast %62 : vector<1x8x128xf32> to vector<4x8x128xf32>
    %116 = arith.mulf %114, %115 : vector<4x8x128xf32>
    %117 = arith.addf %113, %116 : vector<4x8x128xf32>
    %118 = vector.extract_strided_slice %74 {offsets = [1, 0, 0], sizes = [3, 8, 128], strides = [1, 1, 1]} : vector<4x8x128xf32> to vector<3x8x128xf32>
    %119 = vector.extract_strided_slice %74 {offsets = [0, 0, 0], sizes = [3, 8, 128], strides = [1, 1, 1]} : vector<4x8x128xf32> to vector<3x8x128xf32>
    %120 = arith.subf %118, %119 : vector<3x8x128xf32>
    %121 = math.absf %120 : vector<3x8x128xf32>
    %c0_i32_76 = arith.constant 0 : i32
    %122 = vector.broadcast %c0_i32_76 : i32 to vector<3x8x128xi32>
    %123 = arith.cmpi eq, %70, %122 : vector<3x8x128xi32>
    %c0_i32_77 = arith.constant 0 : i32
    %124 = vector.broadcast %c0_i32_77 : i32 to vector<3x8x128xi32>
    %125 = arith.cmpi eq, %69, %124 : vector<3x8x128xi32>
    %126 = arith.xori %123, %125 : vector<3x8x128xi1>
    %127 = arith.extui %126 : vector<3x8x128xi1> to vector<3x8x128xi32>
    %128 = arith.sitofp %127 : vector<3x8x128xi32> to vector<3x8x128xf32>
    %129 = vector.extract_strided_slice %117 {offsets = [0, 0, 0], sizes = [3, 8, 128], strides = [1, 1, 1]} : vector<4x8x128xf32> to vector<3x8x128xf32>
    %130 = arith.subf %121, %128 : vector<3x8x128xf32>
    %131 = arith.addf %129, %130 : vector<3x8x128xf32>
    %132 = arith.mulf %131, %131 : vector<3x8x128xf32>
    %133 = vector.shape_cast %132 : vector<3x8x128xf32> to vector<1x3x8x128xf32>
    %cst_78 = arith.constant dense<0.000000e+00> : vector<1xf32>
    %134 = vector.multi_reduction <add>, %133, %cst_78 [1, 2, 3] : vector<1x3x8x128xf32> to vector<1xf32>
    %135 = vector.shape_cast %134 : vector<1xf32> to vector<1x1x1x1xf32>
    %136 = vector.extract %135[0, 0, 0, 0] : f32 from vector<1x1x1x1xf32>
    %cst_79 = arith.constant 0.000000e+00 : f32
    %137 = arith.addf %cst_79, %136 : f32
    %138 = vector.extract_strided_slice %74 {offsets = [3, 0, 0], sizes = [1, 8, 128], strides = [1, 1, 1]} : vector<4x8x128xf32> to vector<1x8x128xf32>
    %139 = vector.shape_cast %138 : vector<1x8x128xf32> to vector<8x128xf32>
    %c0_80 = arith.constant 0 : index
    %c0_81 = arith.constant 0 : index
    %c0_82 = arith.constant 0 : index
    %140 = vector.load %arg6[%c0_80, %c0_81, %c0_82] : memref<4x8x128xf32, #tpu.memory_space<vmem>>, vector<1x8x128xf32>
    %141 = vector.shape_cast %140 : vector<1x8x128xf32> to vector<8x128xf32>
    %142 = vector.shape_cast %139 : vector<8x128xf32> to vector<1x8x128xf32>
    tpu.vector_store %arg6[%c0_80, %c0_81, %c0_82], %142 {strides = array<i32>} : memref<4x8x128xf32, #tpu.memory_space<vmem>>, vector<1x8x128xf32>,
    %143 = vector.extract_strided_slice %117 {offsets = [3, 0, 0], sizes = [1, 8, 128], strides = [1, 1, 1]} : vector<4x8x128xf32> to vector<1x8x128xf32>
    %144 = vector.shape_cast %143 : vector<1x8x128xf32> to vector<8x128xf32>
    %c0_83 = arith.constant 0 : index
    %c0_84 = arith.constant 0 : index
    %c0_85 = arith.constant 0 : index
    %145 = vector.load %arg7[%c0_83, %c0_84, %c0_85] : memref<4x8x128xf32, #tpu.memory_space<vmem>>, vector<1x8x128xf32>
    %146 = vector.shape_cast %145 : vector<1x8x128xf32> to vector<8x128xf32>
    %147 = vector.shape_cast %144 : vector<8x128xf32> to vector<1x8x128xf32>
    tpu.vector_store %arg7[%c0_83, %c0_84, %c0_85], %147 {strides = array<i32>} : memref<4x8x128xf32, #tpu.memory_space<vmem>>, vector<1x8x128xf32>,
    %c1_86 = arith.constant 1 : index
    %c0_87 = arith.constant 0 : index
    %c0_88 = arith.constant 0 : index
    %c0_89 = arith.constant 0 : index
    %148 = vector.load %arg5[%c1_86, %c0_87, %c0_88, %c0_89] : memref<4x4x8x128xf32, #tpu.memory_space<vmem>>, vector<1x4x8x128xf32>
    %149 = vector.shape_cast %148 : vector<1x4x8x128xf32> to vector<4x8x128xf32>
    %150 = arith.mulf %149, %52 : vector<4x8x128xf32>
    %c1_i32_90 = arith.constant 1 : i32
    %151 = vector.broadcast %c1_i32_90 : i32 to vector<4x8x128xi32>
    %152 = arith.cmpi eq, %6, %151 : vector<4x8x128xi32>
    %cst_91 = arith.constant 0.000000e+00 : f32
    %153 = vector.broadcast %cst_91 : f32 to vector<4x8x128xf32>
    %154 = arith.select %152, %150, %153 : vector<4x8x128xi1>, vector<4x8x128xf32>
    %155 = arith.addf %79, %154 : vector<4x8x128xf32>
    %156 = vector.shape_cast %154 : vector<4x8x128xf32> to vector<1x4x8x128xf32>
    %cst_92 = arith.constant dense<0.000000e+00> : vector<1xf32>
    %157 = vector.multi_reduction <add>, %156, %cst_92 [1, 2, 3] : vector<1x4x8x128xf32> to vector<1xf32>
    %158 = vector.shape_cast %157 : vector<1xf32> to vector<1x1x1x1xf32>
    %159 = vector.extract %158[0, 0, 0, 0] : f32 from vector<1x1x1x1xf32>
    %160 = vector.shape_cast %150 : vector<4x8x128xf32> to vector<1x4x8x128xf32>
    %cst_93 = arith.constant dense<0.000000e+00> : vector<1xf32>
    %161 = vector.multi_reduction <add>, %160, %cst_93 [1, 2, 3] : vector<1x4x8x128xf32> to vector<1xf32>
    %162 = vector.shape_cast %161 : vector<1xf32> to vector<1x1x1x1xf32>
    %163 = vector.extract %162[0, 0, 0, 0] : f32 from vector<1x1x1x1xf32>
    %164 = arith.extui %152 : vector<4x8x128xi1> to vector<4x8x128xi32>
    %165 = arith.sitofp %164 : vector<4x8x128xi32> to vector<4x8x128xf32>
    %166 = vector.shape_cast %165 : vector<4x8x128xf32> to vector<1x4x8x128xf32>
    %cst_94 = arith.constant dense<0.000000e+00> : vector<1xf32>
    %167 = vector.multi_reduction <add>, %166, %cst_94 [1, 2, 3] : vector<1x4x8x128xf32> to vector<1xf32>
    %168 = vector.shape_cast %167 : vector<1xf32> to vector<1x1x1x1xf32>
    %169 = vector.extract %168[0, 0, 0, 0] : f32 from vector<1x1x1x1xf32>
    %170 = arith.addf %163, %169 : f32
    %c7_i32_95 = arith.constant 7 : i32
    %171 = tpu.dynamic_rotate %150 by %c7_i32_95 dim 1 : vector<4x8x128xf32>, i32 -> vector<4x8x128xf32>
    %172 = arith.subf %171, %150 : vector<4x8x128xf32>
    %173 = math.absf %172 : vector<4x8x128xf32>
    %c127_i32_96 = arith.constant 127 : i32
    %174 = tpu.dynamic_rotate %150 by %c127_i32_96 dim 2 : vector<4x8x128xf32>, i32 -> vector<4x8x128xf32>
    %175 = arith.subf %174, %150 : vector<4x8x128xf32>
    %176 = math.absf %175 : vector<4x8x128xf32>
    %cst_97 = arith.constant 1.000000e+00 : f32
    %177 = vector.broadcast %cst_97 : f32 to vector<4x8x128xf32>
    %178 = arith.cmpf oeq, %64, %177 : vector<4x8x128xf32>
    %179 = arith.xori %178, %152 : vector<4x8x128xi1>
    %180 = arith.extui %179 : vector<4x8x128xi1> to vector<4x8x128xi32>
    %181 = arith.sitofp %180 : vector<4x8x128xi32> to vector<4x8x128xf32>
    %cst_98 = arith.constant 1.000000e+00 : f32
    %182 = vector.broadcast %cst_98 : f32 to vector<4x8x128xf32>
    %183 = arith.cmpf oeq, %65, %182 : vector<4x8x128xf32>
    %184 = arith.xori %183, %152 : vector<4x8x128xi1>
    %185 = arith.extui %184 : vector<4x8x128xi1> to vector<4x8x128xi32>
    %186 = arith.sitofp %185 : vector<4x8x128xi32> to vector<4x8x128xf32>
    %187 = arith.subf %173, %181 : vector<4x8x128xf32>
    %188 = vector.broadcast %57 : vector<1x8x128xf32> to vector<4x8x128xf32>
    %189 = arith.mulf %187, %188 : vector<4x8x128xf32>
    %190 = arith.subf %176, %186 : vector<4x8x128xf32>
    %191 = vector.broadcast %62 : vector<1x8x128xf32> to vector<4x8x128xf32>
    %192 = arith.mulf %190, %191 : vector<4x8x128xf32>
    %193 = arith.addf %189, %192 : vector<4x8x128xf32>
    %194 = vector.extract_strided_slice %150 {offsets = [1, 0, 0], sizes = [3, 8, 128], strides = [1, 1, 1]} : vector<4x8x128xf32> to vector<3x8x128xf32>
    %195 = vector.extract_strided_slice %150 {offsets = [0, 0, 0], sizes = [3, 8, 128], strides = [1, 1, 1]} : vector<4x8x128xf32> to vector<3x8x128xf32>
    %196 = arith.subf %194, %195 : vector<3x8x128xf32>
    %197 = math.absf %196 : vector<3x8x128xf32>
    %c1_i32_99 = arith.constant 1 : i32
    %198 = vector.broadcast %c1_i32_99 : i32 to vector<3x8x128xi32>
    %199 = arith.cmpi eq, %70, %198 : vector<3x8x128xi32>
    %c1_i32_100 = arith.constant 1 : i32
    %200 = vector.broadcast %c1_i32_100 : i32 to vector<3x8x128xi32>
    %201 = arith.cmpi eq, %69, %200 : vector<3x8x128xi32>
    %202 = arith.xori %199, %201 : vector<3x8x128xi1>
    %203 = arith.extui %202 : vector<3x8x128xi1> to vector<3x8x128xi32>
    %204 = arith.sitofp %203 : vector<3x8x128xi32> to vector<3x8x128xf32>
    %205 = vector.extract_strided_slice %193 {offsets = [0, 0, 0], sizes = [3, 8, 128], strides = [1, 1, 1]} : vector<4x8x128xf32> to vector<3x8x128xf32>
    %206 = arith.subf %197, %204 : vector<3x8x128xf32>
    %207 = arith.addf %205, %206 : vector<3x8x128xf32>
    %208 = arith.mulf %207, %207 : vector<3x8x128xf32>
    %209 = vector.shape_cast %208 : vector<3x8x128xf32> to vector<1x3x8x128xf32>
    %cst_101 = arith.constant dense<0.000000e+00> : vector<1xf32>
    %210 = vector.multi_reduction <add>, %209, %cst_101 [1, 2, 3] : vector<1x3x8x128xf32> to vector<1xf32>
    %211 = vector.shape_cast %210 : vector<1xf32> to vector<1x1x1x1xf32>
    %212 = vector.extract %211[0, 0, 0, 0] : f32 from vector<1x1x1x1xf32>
    %213 = arith.addf %137, %212 : f32
    %214 = vector.extract_strided_slice %150 {offsets = [3, 0, 0], sizes = [1, 8, 128], strides = [1, 1, 1]} : vector<4x8x128xf32> to vector<1x8x128xf32>
    %215 = vector.shape_cast %214 : vector<1x8x128xf32> to vector<8x128xf32>
    %c1_102 = arith.constant 1 : index
    %c0_103 = arith.constant 0 : index
    %c0_104 = arith.constant 0 : index
    %216 = vector.load %arg6[%c1_102, %c0_103, %c0_104] : memref<4x8x128xf32, #tpu.memory_space<vmem>>, vector<1x8x128xf32>
    %217 = vector.shape_cast %216 : vector<1x8x128xf32> to vector<8x128xf32>
    %218 = vector.shape_cast %215 : vector<8x128xf32> to vector<1x8x128xf32>
    tpu.vector_store %arg6[%c1_102, %c0_103, %c0_104], %218 {strides = array<i32>} : memref<4x8x128xf32, #tpu.memory_space<vmem>>, vector<1x8x128xf32>,
    %219 = vector.extract_strided_slice %193 {offsets = [3, 0, 0], sizes = [1, 8, 128], strides = [1, 1, 1]} : vector<4x8x128xf32> to vector<1x8x128xf32>
    %220 = vector.shape_cast %219 : vector<1x8x128xf32> to vector<8x128xf32>
    %c1_105 = arith.constant 1 : index
    %c0_106 = arith.constant 0 : index
    %c0_107 = arith.constant 0 : index
    %221 = vector.load %arg7[%c1_105, %c0_106, %c0_107] : memref<4x8x128xf32, #tpu.memory_space<vmem>>, vector<1x8x128xf32>
    %222 = vector.shape_cast %221 : vector<1x8x128xf32> to vector<8x128xf32>
    %223 = vector.shape_cast %220 : vector<8x128xf32> to vector<1x8x128xf32>
    tpu.vector_store %arg7[%c1_105, %c0_106, %c0_107], %223 {strides = array<i32>} : memref<4x8x128xf32, #tpu.memory_space<vmem>>, vector<1x8x128xf32>,
    %c2_108 = arith.constant 2 : index
    %c0_109 = arith.constant 0 : index
    %c0_110 = arith.constant 0 : index
    %c0_111 = arith.constant 0 : index
    %224 = vector.load %arg5[%c2_108, %c0_109, %c0_110, %c0_111] : memref<4x4x8x128xf32, #tpu.memory_space<vmem>>, vector<1x4x8x128xf32>
    %225 = vector.shape_cast %224 : vector<1x4x8x128xf32> to vector<4x8x128xf32>
    %226 = arith.mulf %225, %52 : vector<4x8x128xf32>
    %c2_i32 = arith.constant 2 : i32
    %227 = vector.broadcast %c2_i32 : i32 to vector<4x8x128xi32>
    %228 = arith.cmpi eq, %6, %227 : vector<4x8x128xi32>
    %cst_112 = arith.constant 0.000000e+00 : f32
    %229 = vector.broadcast %cst_112 : f32 to vector<4x8x128xf32>
    %230 = arith.select %228, %226, %229 : vector<4x8x128xi1>, vector<4x8x128xf32>
    %231 = arith.addf %155, %230 : vector<4x8x128xf32>
    %232 = vector.shape_cast %230 : vector<4x8x128xf32> to vector<1x4x8x128xf32>
    %cst_113 = arith.constant dense<0.000000e+00> : vector<1xf32>
    %233 = vector.multi_reduction <add>, %232, %cst_113 [1, 2, 3] : vector<1x4x8x128xf32> to vector<1xf32>
    %234 = vector.shape_cast %233 : vector<1xf32> to vector<1x1x1x1xf32>
    %235 = vector.extract %234[0, 0, 0, 0] : f32 from vector<1x1x1x1xf32>
    %236 = vector.shape_cast %226 : vector<4x8x128xf32> to vector<1x4x8x128xf32>
    %cst_114 = arith.constant dense<0.000000e+00> : vector<1xf32>
    %237 = vector.multi_reduction <add>, %236, %cst_114 [1, 2, 3] : vector<1x4x8x128xf32> to vector<1xf32>
    %238 = vector.shape_cast %237 : vector<1xf32> to vector<1x1x1x1xf32>
    %239 = vector.extract %238[0, 0, 0, 0] : f32 from vector<1x1x1x1xf32>
    %240 = arith.extui %228 : vector<4x8x128xi1> to vector<4x8x128xi32>
    %241 = arith.sitofp %240 : vector<4x8x128xi32> to vector<4x8x128xf32>
    %242 = vector.shape_cast %241 : vector<4x8x128xf32> to vector<1x4x8x128xf32>
    %cst_115 = arith.constant dense<0.000000e+00> : vector<1xf32>
    %243 = vector.multi_reduction <add>, %242, %cst_115 [1, 2, 3] : vector<1x4x8x128xf32> to vector<1xf32>
    %244 = vector.shape_cast %243 : vector<1xf32> to vector<1x1x1x1xf32>
    %245 = vector.extract %244[0, 0, 0, 0] : f32 from vector<1x1x1x1xf32>
    %246 = arith.addf %239, %245 : f32
    %c7_i32_116 = arith.constant 7 : i32
    %247 = tpu.dynamic_rotate %226 by %c7_i32_116 dim 1 : vector<4x8x128xf32>, i32 -> vector<4x8x128xf32>
    %248 = arith.subf %247, %226 : vector<4x8x128xf32>
    %249 = math.absf %248 : vector<4x8x128xf32>
    %c127_i32_117 = arith.constant 127 : i32
    %250 = tpu.dynamic_rotate %226 by %c127_i32_117 dim 2 : vector<4x8x128xf32>, i32 -> vector<4x8x128xf32>
    %251 = arith.subf %250, %226 : vector<4x8x128xf32>
    %252 = math.absf %251 : vector<4x8x128xf32>
    %cst_118 = arith.constant 2.000000e+00 : f32
    %253 = vector.broadcast %cst_118 : f32 to vector<4x8x128xf32>
    %254 = arith.cmpf oeq, %64, %253 : vector<4x8x128xf32>
    %255 = arith.xori %254, %228 : vector<4x8x128xi1>
    %256 = arith.extui %255 : vector<4x8x128xi1> to vector<4x8x128xi32>
    %257 = arith.sitofp %256 : vector<4x8x128xi32> to vector<4x8x128xf32>
    %cst_119 = arith.constant 2.000000e+00 : f32
    %258 = vector.broadcast %cst_119 : f32 to vector<4x8x128xf32>
    %259 = arith.cmpf oeq, %65, %258 : vector<4x8x128xf32>
    %260 = arith.xori %259, %228 : vector<4x8x128xi1>
    %261 = arith.extui %260 : vector<4x8x128xi1> to vector<4x8x128xi32>
    %262 = arith.sitofp %261 : vector<4x8x128xi32> to vector<4x8x128xf32>
    %263 = arith.subf %249, %257 : vector<4x8x128xf32>
    %264 = vector.broadcast %57 : vector<1x8x128xf32> to vector<4x8x128xf32>
    %265 = arith.mulf %263, %264 : vector<4x8x128xf32>
    %266 = arith.subf %252, %262 : vector<4x8x128xf32>
    %267 = vector.broadcast %62 : vector<1x8x128xf32> to vector<4x8x128xf32>
    %268 = arith.mulf %266, %267 : vector<4x8x128xf32>
    %269 = arith.addf %265, %268 : vector<4x8x128xf32>
    %270 = vector.extract_strided_slice %226 {offsets = [1, 0, 0], sizes = [3, 8, 128], strides = [1, 1, 1]} : vector<4x8x128xf32> to vector<3x8x128xf32>
    %271 = vector.extract_strided_slice %226 {offsets = [0, 0, 0], sizes = [3, 8, 128], strides = [1, 1, 1]} : vector<4x8x128xf32> to vector<3x8x128xf32>
    %272 = arith.subf %270, %271 : vector<3x8x128xf32>
    %273 = math.absf %272 : vector<3x8x128xf32>
    %c2_i32_120 = arith.constant 2 : i32
    %274 = vector.broadcast %c2_i32_120 : i32 to vector<3x8x128xi32>
    %275 = arith.cmpi eq, %70, %274 : vector<3x8x128xi32>
    %c2_i32_121 = arith.constant 2 : i32
    %276 = vector.broadcast %c2_i32_121 : i32 to vector<3x8x128xi32>
    %277 = arith.cmpi eq, %69, %276 : vector<3x8x128xi32>
    %278 = arith.xori %275, %277 : vector<3x8x128xi1>
    %279 = arith.extui %278 : vector<3x8x128xi1> to vector<3x8x128xi32>
    %280 = arith.sitofp %279 : vector<3x8x128xi32> to vector<3x8x128xf32>
    %281 = vector.extract_strided_slice %269 {offsets = [0, 0, 0], sizes = [3, 8, 128], strides = [1, 1, 1]} : vector<4x8x128xf32> to vector<3x8x128xf32>
    %282 = arith.subf %273, %280 : vector<3x8x128xf32>
    %283 = arith.addf %281, %282 : vector<3x8x128xf32>
    %284 = arith.mulf %283, %283 : vector<3x8x128xf32>
    %285 = vector.shape_cast %284 : vector<3x8x128xf32> to vector<1x3x8x128xf32>
    %cst_122 = arith.constant dense<0.000000e+00> : vector<1xf32>
    %286 = vector.multi_reduction <add>, %285, %cst_122 [1, 2, 3] : vector<1x3x8x128xf32> to vector<1xf32>
    %287 = vector.shape_cast %286 : vector<1xf32> to vector<1x1x1x1xf32>
    %288 = vector.extract %287[0, 0, 0, 0] : f32 from vector<1x1x1x1xf32>
    %289 = arith.addf %213, %288 : f32
    %290 = vector.extract_strided_slice %226 {offsets = [3, 0, 0], sizes = [1, 8, 128], strides = [1, 1, 1]} : vector<4x8x128xf32> to vector<1x8x128xf32>
    %291 = vector.shape_cast %290 : vector<1x8x128xf32> to vector<8x128xf32>
    %c2_123 = arith.constant 2 : index
    %c0_124 = arith.constant 0 : index
    %c0_125 = arith.constant 0 : index
    %292 = vector.load %arg6[%c2_123, %c0_124, %c0_125] : memref<4x8x128xf32, #tpu.memory_space<vmem>>, vector<1x8x128xf32>
    %293 = vector.shape_cast %292 : vector<1x8x128xf32> to vector<8x128xf32>
    %294 = vector.shape_cast %291 : vector<8x128xf32> to vector<1x8x128xf32>
    tpu.vector_store %arg6[%c2_123, %c0_124, %c0_125], %294 {strides = array<i32>} : memref<4x8x128xf32, #tpu.memory_space<vmem>>, vector<1x8x128xf32>,
    %295 = vector.extract_strided_slice %269 {offsets = [3, 0, 0], sizes = [1, 8, 128], strides = [1, 1, 1]} : vector<4x8x128xf32> to vector<1x8x128xf32>
    %296 = vector.shape_cast %295 : vector<1x8x128xf32> to vector<8x128xf32>
    %c2_126 = arith.constant 2 : index
    %c0_127 = arith.constant 0 : index
    %c0_128 = arith.constant 0 : index
    %297 = vector.load %arg7[%c2_126, %c0_127, %c0_128] : memref<4x8x128xf32, #tpu.memory_space<vmem>>, vector<1x8x128xf32>
    %298 = vector.shape_cast %297 : vector<1x8x128xf32> to vector<8x128xf32>
    %299 = vector.shape_cast %296 : vector<8x128xf32> to vector<1x8x128xf32>
    tpu.vector_store %arg7[%c2_126, %c0_127, %c0_128], %299 {strides = array<i32>} : memref<4x8x128xf32, #tpu.memory_space<vmem>>, vector<1x8x128xf32>,
    %c3_129 = arith.constant 3 : index
    %c0_130 = arith.constant 0 : index
    %c0_131 = arith.constant 0 : index
    %c0_132 = arith.constant 0 : index
    %300 = vector.load %arg5[%c3_129, %c0_130, %c0_131, %c0_132] : memref<4x4x8x128xf32, #tpu.memory_space<vmem>>, vector<1x4x8x128xf32>
    %301 = vector.shape_cast %300 : vector<1x4x8x128xf32> to vector<4x8x128xf32>
    %302 = arith.mulf %301, %52 : vector<4x8x128xf32>
    %c3_i32 = arith.constant 3 : i32
    %303 = vector.broadcast %c3_i32 : i32 to vector<4x8x128xi32>
    %304 = arith.cmpi eq, %6, %303 : vector<4x8x128xi32>
    %cst_133 = arith.constant 0.000000e+00 : f32
    %305 = vector.broadcast %cst_133 : f32 to vector<4x8x128xf32>
    %306 = arith.select %304, %302, %305 : vector<4x8x128xi1>, vector<4x8x128xf32>
    %307 = arith.addf %231, %306 : vector<4x8x128xf32>
    %308 = vector.shape_cast %306 : vector<4x8x128xf32> to vector<1x4x8x128xf32>
    %cst_134 = arith.constant dense<0.000000e+00> : vector<1xf32>
    %309 = vector.multi_reduction <add>, %308, %cst_134 [1, 2, 3] : vector<1x4x8x128xf32> to vector<1xf32>
    %310 = vector.shape_cast %309 : vector<1xf32> to vector<1x1x1x1xf32>
    %311 = vector.extract %310[0, 0, 0, 0] : f32 from vector<1x1x1x1xf32>
    %312 = vector.shape_cast %302 : vector<4x8x128xf32> to vector<1x4x8x128xf32>
    %cst_135 = arith.constant dense<0.000000e+00> : vector<1xf32>
    %313 = vector.multi_reduction <add>, %312, %cst_135 [1, 2, 3] : vector<1x4x8x128xf32> to vector<1xf32>
    %314 = vector.shape_cast %313 : vector<1xf32> to vector<1x1x1x1xf32>
    %315 = vector.extract %314[0, 0, 0, 0] : f32 from vector<1x1x1x1xf32>
    %316 = arith.extui %304 : vector<4x8x128xi1> to vector<4x8x128xi32>
    %317 = arith.sitofp %316 : vector<4x8x128xi32> to vector<4x8x128xf32>
    %318 = vector.shape_cast %317 : vector<4x8x128xf32> to vector<1x4x8x128xf32>
    %cst_136 = arith.constant dense<0.000000e+00> : vector<1xf32>
    %319 = vector.multi_reduction <add>, %318, %cst_136 [1, 2, 3] : vector<1x4x8x128xf32> to vector<1xf32>
    %320 = vector.shape_cast %319 : vector<1xf32> to vector<1x1x1x1xf32>
    %321 = vector.extract %320[0, 0, 0, 0] : f32 from vector<1x1x1x1xf32>
    %322 = arith.addf %315, %321 : f32
    %c7_i32_137 = arith.constant 7 : i32
    %323 = tpu.dynamic_rotate %302 by %c7_i32_137 dim 1 : vector<4x8x128xf32>, i32 -> vector<4x8x128xf32>
    %324 = arith.subf %323, %302 : vector<4x8x128xf32>
    %325 = math.absf %324 : vector<4x8x128xf32>
    %c127_i32_138 = arith.constant 127 : i32
    %326 = tpu.dynamic_rotate %302 by %c127_i32_138 dim 2 : vector<4x8x128xf32>, i32 -> vector<4x8x128xf32>
    %327 = arith.subf %326, %302 : vector<4x8x128xf32>
    %328 = math.absf %327 : vector<4x8x128xf32>
    %cst_139 = arith.constant 3.000000e+00 : f32
    %329 = vector.broadcast %cst_139 : f32 to vector<4x8x128xf32>
    %330 = arith.cmpf oeq, %64, %329 : vector<4x8x128xf32>
    %331 = arith.xori %330, %304 : vector<4x8x128xi1>
    %332 = arith.extui %331 : vector<4x8x128xi1> to vector<4x8x128xi32>
    %333 = arith.sitofp %332 : vector<4x8x128xi32> to vector<4x8x128xf32>
    %cst_140 = arith.constant 3.000000e+00 : f32
    %334 = vector.broadcast %cst_140 : f32 to vector<4x8x128xf32>
    %335 = arith.cmpf oeq, %65, %334 : vector<4x8x128xf32>
    %336 = arith.xori %335, %304 : vector<4x8x128xi1>
    %337 = arith.extui %336 : vector<4x8x128xi1> to vector<4x8x128xi32>
    %338 = arith.sitofp %337 : vector<4x8x128xi32> to vector<4x8x128xf32>
    %339 = arith.subf %325, %333 : vector<4x8x128xf32>
    %340 = vector.broadcast %57 : vector<1x8x128xf32> to vector<4x8x128xf32>
    %341 = arith.mulf %339, %340 : vector<4x8x128xf32>
    %342 = arith.subf %328, %338 : vector<4x8x128xf32>
    %343 = vector.broadcast %62 : vector<1x8x128xf32> to vector<4x8x128xf32>
    %344 = arith.mulf %342, %343 : vector<4x8x128xf32>
    %345 = arith.addf %341, %344 : vector<4x8x128xf32>
    %346 = vector.extract_strided_slice %302 {offsets = [1, 0, 0], sizes = [3, 8, 128], strides = [1, 1, 1]} : vector<4x8x128xf32> to vector<3x8x128xf32>
    %347 = vector.extract_strided_slice %302 {offsets = [0, 0, 0], sizes = [3, 8, 128], strides = [1, 1, 1]} : vector<4x8x128xf32> to vector<3x8x128xf32>
    %348 = arith.subf %346, %347 : vector<3x8x128xf32>
    %349 = math.absf %348 : vector<3x8x128xf32>
    %c3_i32_141 = arith.constant 3 : i32
    %350 = vector.broadcast %c3_i32_141 : i32 to vector<3x8x128xi32>
    %351 = arith.cmpi eq, %70, %350 : vector<3x8x128xi32>
    %c3_i32_142 = arith.constant 3 : i32
    %352 = vector.broadcast %c3_i32_142 : i32 to vector<3x8x128xi32>
    %353 = arith.cmpi eq, %69, %352 : vector<3x8x128xi32>
    %354 = arith.xori %351, %353 : vector<3x8x128xi1>
    %355 = arith.extui %354 : vector<3x8x128xi1> to vector<3x8x128xi32>
    %356 = arith.sitofp %355 : vector<3x8x128xi32> to vector<3x8x128xf32>
    %357 = vector.extract_strided_slice %345 {offsets = [0, 0, 0], sizes = [3, 8, 128], strides = [1, 1, 1]} : vector<4x8x128xf32> to vector<3x8x128xf32>
    %358 = arith.subf %349, %356 : vector<3x8x128xf32>
    %359 = arith.addf %357, %358 : vector<3x8x128xf32>
    %360 = arith.mulf %359, %359 : vector<3x8x128xf32>
    %361 = vector.shape_cast %360 : vector<3x8x128xf32> to vector<1x3x8x128xf32>
    %cst_143 = arith.constant dense<0.000000e+00> : vector<1xf32>
    %362 = vector.multi_reduction <add>, %361, %cst_143 [1, 2, 3] : vector<1x3x8x128xf32> to vector<1xf32>
    %363 = vector.shape_cast %362 : vector<1xf32> to vector<1x1x1x1xf32>
    %364 = vector.extract %363[0, 0, 0, 0] : f32 from vector<1x1x1x1xf32>
    %365 = arith.addf %289, %364 : f32
    %366 = vector.extract_strided_slice %302 {offsets = [3, 0, 0], sizes = [1, 8, 128], strides = [1, 1, 1]} : vector<4x8x128xf32> to vector<1x8x128xf32>
    %367 = vector.shape_cast %366 : vector<1x8x128xf32> to vector<8x128xf32>
    %c3_144 = arith.constant 3 : index
    %c0_145 = arith.constant 0 : index
    %c0_146 = arith.constant 0 : index
    %368 = vector.load %arg6[%c3_144, %c0_145, %c0_146] : memref<4x8x128xf32, #tpu.memory_space<vmem>>, vector<1x8x128xf32>
    %369 = vector.shape_cast %368 : vector<1x8x128xf32> to vector<8x128xf32>
    %370 = vector.shape_cast %367 : vector<8x128xf32> to vector<1x8x128xf32>
    tpu.vector_store %arg6[%c3_144, %c0_145, %c0_146], %370 {strides = array<i32>} : memref<4x8x128xf32, #tpu.memory_space<vmem>>, vector<1x8x128xf32>,
    %371 = vector.extract_strided_slice %345 {offsets = [3, 0, 0], sizes = [1, 8, 128], strides = [1, 1, 1]} : vector<4x8x128xf32> to vector<1x8x128xf32>
    %372 = vector.shape_cast %371 : vector<1x8x128xf32> to vector<8x128xf32>
    %c3_147 = arith.constant 3 : index
    %c0_148 = arith.constant 0 : index
    %c0_149 = arith.constant 0 : index
    %373 = vector.load %arg7[%c3_147, %c0_148, %c0_149] : memref<4x8x128xf32, #tpu.memory_space<vmem>>, vector<1x8x128xf32>
    %374 = vector.shape_cast %373 : vector<1x8x128xf32> to vector<8x128xf32>
    %375 = vector.shape_cast %372 : vector<8x128xf32> to vector<1x8x128xf32>
    tpu.vector_store %arg7[%c3_147, %c0_148, %c0_149], %375 {strides = array<i32>} : memref<4x8x128xf32, #tpu.memory_space<vmem>>, vector<1x8x128xf32>,
    %376 = vector.extract_strided_slice %6 {offsets = [3, 0, 0], sizes = [1, 8, 128], strides = [1, 1, 1]} : vector<4x8x128xi32> to vector<1x8x128xi32>
    %377 = vector.shape_cast %376 : vector<1x8x128xi32> to vector<8x128xi32>
    %c0_150 = arith.constant 0 : index
    %c0_151 = arith.constant 0 : index
    %378 = vector.load %arg8[%c0_150, %c0_151] : memref<8x128xi32, #tpu.memory_space<vmem>>, vector<8x128xi32>
    tpu.vector_store %arg8[%c0_150, %c0_151], %377 {strides = array<i32>} : memref<8x128xi32, #tpu.memory_space<vmem>>, vector<8x128xi32>,
    %379 = arith.extui %1 : i1 to i32
    %c0_i32_152 = arith.constant 0 : i32
    %380 = arith.cmpi ne, %379, %c0_i32_152 : i32
    scf.if %380 {
      %c0_171 = arith.constant 0 : index
      %c0_172 = arith.constant 0 : index
      %c0_173 = arith.constant 0 : index
      %445 = vector.load %arg7[%c0_171, %c0_172, %c0_173] : memref<4x8x128xf32, #tpu.memory_space<vmem>>, vector<1x8x128xf32>
      %446 = vector.shape_cast %445 : vector<1x8x128xf32> to vector<8x128xf32>
      %447 = arith.mulf %446, %446 : vector<8x128xf32>
      %448 = vector.shape_cast %447 : vector<8x128xf32> to vector<1x8x128xf32>
      %cst_174 = arith.constant dense<0.000000e+00> : vector<1xf32>
      %449 = vector.multi_reduction <add>, %448, %cst_174 [1, 2] : vector<1x8x128xf32> to vector<1xf32>
      %450 = vector.shape_cast %449 : vector<1xf32> to vector<1x1x1xf32>
      %451 = vector.extract %450[0, 0, 0] : f32 from vector<1x1x1xf32>
      %cst_175 = arith.constant 0.000000e+00 : f32
      %452 = arith.addf %cst_175, %451 : f32
      %c1_176 = arith.constant 1 : index
      %c0_177 = arith.constant 0 : index
      %c0_178 = arith.constant 0 : index
      %453 = vector.load %arg7[%c1_176, %c0_177, %c0_178] : memref<4x8x128xf32, #tpu.memory_space<vmem>>, vector<1x8x128xf32>
      %454 = vector.shape_cast %453 : vector<1x8x128xf32> to vector<8x128xf32>
      %455 = arith.mulf %454, %454 : vector<8x128xf32>
      %456 = vector.shape_cast %455 : vector<8x128xf32> to vector<1x8x128xf32>
      %cst_179 = arith.constant dense<0.000000e+00> : vector<1xf32>
      %457 = vector.multi_reduction <add>, %456, %cst_179 [1, 2] : vector<1x8x128xf32> to vector<1xf32>
      %458 = vector.shape_cast %457 : vector<1xf32> to vector<1x1x1xf32>
      %459 = vector.extract %458[0, 0, 0] : f32 from vector<1x1x1xf32>
      %460 = arith.addf %452, %459 : f32
      %c2_180 = arith.constant 2 : index
      %c0_181 = arith.constant 0 : index
      %c0_182 = arith.constant 0 : index
      %461 = vector.load %arg7[%c2_180, %c0_181, %c0_182] : memref<4x8x128xf32, #tpu.memory_space<vmem>>, vector<1x8x128xf32>
      %462 = vector.shape_cast %461 : vector<1x8x128xf32> to vector<8x128xf32>
      %463 = arith.mulf %462, %462 : vector<8x128xf32>
      %464 = vector.shape_cast %463 : vector<8x128xf32> to vector<1x8x128xf32>
      %cst_183 = arith.constant dense<0.000000e+00> : vector<1xf32>
      %465 = vector.multi_reduction <add>, %464, %cst_183 [1, 2] : vector<1x8x128xf32> to vector<1xf32>
      %466 = vector.shape_cast %465 : vector<1xf32> to vector<1x1x1xf32>
      %467 = vector.extract %466[0, 0, 0] : f32 from vector<1x1x1xf32>
      %468 = arith.addf %460, %467 : f32
      %c3_184 = arith.constant 3 : index
      %c0_185 = arith.constant 0 : index
      %c0_186 = arith.constant 0 : index
      %469 = vector.load %arg7[%c3_184, %c0_185, %c0_186] : memref<4x8x128xf32, #tpu.memory_space<vmem>>, vector<1x8x128xf32>
      %470 = vector.shape_cast %469 : vector<1x8x128xf32> to vector<8x128xf32>
      %471 = arith.mulf %470, %470 : vector<8x128xf32>
      %472 = vector.shape_cast %471 : vector<8x128xf32> to vector<1x8x128xf32>
      %cst_187 = arith.constant dense<0.000000e+00> : vector<1xf32>
      %473 = vector.multi_reduction <add>, %472, %cst_187 [1, 2] : vector<1x8x128xf32> to vector<1xf32>
      %474 = vector.shape_cast %473 : vector<1xf32> to vector<1x1x1xf32>
      %475 = vector.extract %474[0, 0, 0] : f32 from vector<1x1x1xf32>
      %476 = arith.addf %468, %475 : f32
      %c0_188 = arith.constant 0 : index
      %c0_189 = arith.constant 0 : index
      %c0_190 = arith.constant 0 : index
      %477 = vector.load %arg4[%c0_188, %c0_189, %c0_190] : memref<1x1x128xf32, #tpu.memory_space<vmem>>, vector<1x1x128xf32>
      %478 = vector.shape_cast %477 : vector<1x1x128xf32> to vector<1x128xf32>
      %c9_i32_191 = arith.constant 9 : i32
      %479 = vector.broadcast %c9_i32_191 : i32 to vector<1x128xi32>
      %480 = arith.cmpi eq, %2, %479 : vector<1x128xi32>
      %cst_192 = arith.constant 0.000000e+00 : f32
      %481 = vector.broadcast %476 : f32 to vector<1x128xf32>
      %482 = vector.broadcast %cst_192 : f32 to vector<1x128xf32>
      %483 = arith.select %480, %481, %482 : vector<1x128xi1>, vector<1x128xf32>
      %484 = arith.addf %478, %483 : vector<1x128xf32>
      %c0_193 = arith.constant 0 : index
      %c0_194 = arith.constant 0 : index
      %c0_195 = arith.constant 0 : index
      %485 = vector.load %arg4[%c0_193, %c0_194, %c0_195] : memref<1x1x128xf32, #tpu.memory_space<vmem>>, vector<1x1x128xf32>
      %486 = vector.shape_cast %485 : vector<1x1x128xf32> to vector<1x128xf32>
      %487 = vector.shape_cast %484 : vector<1x128xf32> to vector<1x1x128xf32>
      tpu.vector_store %arg4[%c0_193, %c0_194, %c0_195], %487 {strides = array<i32>} : memref<1x1x128xf32, #tpu.memory_space<vmem>>, vector<1x1x128xf32>,
    } else {
    }
    %cst_153 = arith.constant 1.000000e-30 : f32
    %381 = vector.broadcast %cst_153 : f32 to vector<4x8x128xf32>
    %382 = arith.maximumf %307, %381 : vector<4x8x128xf32>
    %383 = math.log %382 : vector<4x8x128xf32>
    %cst_154 = arith.constant 0.000000e+00 : f32
    %384 = vector.broadcast %cst_154 : f32 to vector<4x8x128xf32>
    %385 = arith.subf %384, %383 : vector<4x8x128xf32>
    %cst_155 = arith.constant 1.000000e+00 : f32
    %386 = vector.broadcast %cst_155 : f32 to vector<4x8x128xf32>
    %387 = arith.subf %386, %307 : vector<4x8x128xf32>
    %cst_156 = arith.constant 1.000000e+00 : f32
    %388 = vector.broadcast %cst_156 : f32 to vector<4x8x128xf32>
    %389 = arith.subf %388, %307 : vector<4x8x128xf32>
    %390 = arith.mulf %387, %389 : vector<4x8x128xf32>
    %cst_157 = arith.constant 2.500000e-01 : f32
    %391 = vector.broadcast %cst_157 : f32 to vector<4x8x128xf32>
    %392 = arith.mulf %391, %390 : vector<4x8x128xf32>
    %393 = arith.mulf %392, %385 : vector<4x8x128xf32>
    %394 = vector.shape_cast %393 : vector<4x8x128xf32> to vector<1x4x8x128xf32>
    %cst_158 = arith.constant dense<0.000000e+00> : vector<1xf32>
    %395 = vector.multi_reduction <add>, %394, %cst_158 [1, 2, 3] : vector<1x4x8x128xf32> to vector<1xf32>
    %396 = vector.shape_cast %395 : vector<1xf32> to vector<1x1x1x1xf32>
    %397 = vector.extract %396[0, 0, 0, 0] : f32 from vector<1x1x1x1xf32>
    %cst_159 = arith.constant 0.000000e+00 : f32
    %398 = vector.broadcast %cst_159 : f32 to vector<1x128xf32>
    %c0_i32_160 = arith.constant 0 : i32
    %399 = vector.broadcast %c0_i32_160 : i32 to vector<1x128xi32>
    %400 = arith.cmpi eq, %2, %399 : vector<1x128xi32>
    %401 = vector.broadcast %83 : f32 to vector<1x128xf32>
    %402 = arith.select %400, %401, %398 : vector<1x128xi1>, vector<1x128xf32>
    %c1_i32_161 = arith.constant 1 : i32
    %403 = vector.broadcast %c1_i32_161 : i32 to vector<1x128xi32>
    %404 = arith.cmpi eq, %2, %403 : vector<1x128xi32>
    %405 = vector.broadcast %159 : f32 to vector<1x128xf32>
    %406 = arith.select %404, %405, %402 : vector<1x128xi1>, vector<1x128xf32>
    %c2_i32_162 = arith.constant 2 : i32
    %407 = vector.broadcast %c2_i32_162 : i32 to vector<1x128xi32>
    %408 = arith.cmpi eq, %2, %407 : vector<1x128xi32>
    %409 = vector.broadcast %235 : f32 to vector<1x128xf32>
    %410 = arith.select %408, %409, %406 : vector<1x128xi1>, vector<1x128xf32>
    %c3_i32_163 = arith.constant 3 : i32
    %411 = vector.broadcast %c3_i32_163 : i32 to vector<1x128xi32>
    %412 = arith.cmpi eq, %2, %411 : vector<1x128xi32>
    %413 = vector.broadcast %311 : f32 to vector<1x128xf32>
    %414 = arith.select %412, %413, %410 : vector<1x128xi1>, vector<1x128xf32>
    %c4_i32 = arith.constant 4 : i32
    %415 = vector.broadcast %c4_i32 : i32 to vector<1x128xi32>
    %416 = arith.cmpi eq, %2, %415 : vector<1x128xi32>
    %417 = vector.broadcast %94 : f32 to vector<1x128xf32>
    %418 = arith.select %416, %417, %414 : vector<1x128xi1>, vector<1x128xf32>
    %c5_i32 = arith.constant 5 : i32
    %419 = vector.broadcast %c5_i32 : i32 to vector<1x128xi32>
    %420 = arith.cmpi eq, %2, %419 : vector<1x128xi32>
    %421 = vector.broadcast %170 : f32 to vector<1x128xf32>
    %422 = arith.select %420, %421, %418 : vector<1x128xi1>, vector<1x128xf32>
    %c6_i32 = arith.constant 6 : i32
    %423 = vector.broadcast %c6_i32 : i32 to vector<1x128xi32>
    %424 = arith.cmpi eq, %2, %423 : vector<1x128xi32>
    %425 = vector.broadcast %246 : f32 to vector<1x128xf32>
    %426 = arith.select %424, %425, %422 : vector<1x128xi1>, vector<1x128xf32>
    %c7_i32_164 = arith.constant 7 : i32
    %427 = vector.broadcast %c7_i32_164 : i32 to vector<1x128xi32>
    %428 = arith.cmpi eq, %2, %427 : vector<1x128xi32>
    %429 = vector.broadcast %322 : f32 to vector<1x128xf32>
    %430 = arith.select %428, %429, %426 : vector<1x128xi1>, vector<1x128xf32>
    %c8_i32 = arith.constant 8 : i32
    %431 = vector.broadcast %c8_i32 : i32 to vector<1x128xi32>
    %432 = arith.cmpi eq, %2, %431 : vector<1x128xi32>
    %433 = vector.broadcast %397 : f32 to vector<1x128xf32>
    %434 = arith.select %432, %433, %430 : vector<1x128xi1>, vector<1x128xf32>
    %c9_i32 = arith.constant 9 : i32
    %435 = vector.broadcast %c9_i32 : i32 to vector<1x128xi32>
    %436 = arith.cmpi eq, %2, %435 : vector<1x128xi32>
    %437 = vector.broadcast %365 : f32 to vector<1x128xf32>
    %438 = arith.select %436, %437, %434 : vector<1x128xi1>, vector<1x128xf32>
    %c0_165 = arith.constant 0 : index
    %c0_166 = arith.constant 0 : index
    %c0_167 = arith.constant 0 : index
    %439 = vector.load %arg4[%c0_165, %c0_166, %c0_167] : memref<1x1x128xf32, #tpu.memory_space<vmem>>, vector<1x1x128xf32>
    %440 = vector.shape_cast %439 : vector<1x1x128xf32> to vector<1x128xf32>
    %441 = arith.addf %440, %438 : vector<1x128xf32>
    %c0_168 = arith.constant 0 : index
    %c0_169 = arith.constant 0 : index
    %c0_170 = arith.constant 0 : index
    %442 = vector.load %arg4[%c0_168, %c0_169, %c0_170] : memref<1x1x128xf32, #tpu.memory_space<vmem>>, vector<1x1x128xf32>
    %443 = vector.shape_cast %442 : vector<1x1x128xf32> to vector<1x128xf32>
    %444 = vector.shape_cast %441 : vector<1x128xf32> to vector<1x1x128xf32>
    tpu.vector_store %arg4[%c0_168, %c0_169, %c0_170], %444 {strides = array<i32>} : memref<1x1x128xf32, #tpu.memory_space<vmem>>, vector<1x1x128xf32>,
    return
  }
  func.func @transform_0(%arg0: i32, %arg1: i32) -> (i32, i32, i32, i32, i32) {
    %c0_i32 = arith.constant 0 : i32
    %c0_i32_0 = arith.constant 0 : i32
    %c0_i32_1 = arith.constant 0 : i32
    %c0_i32_2 = arith.constant 0 : i32
    return %arg0, %c0_i32, %arg1, %c0_i32_0, %c0_i32_1 : i32, i32, i32, i32, i32
  }
  func.func @transform_1(%arg0: i32, %arg1: i32) -> (i32, i32, i32, i32) {
    %c0_i32 = arith.constant 0 : i32
    %c0_i32_0 = arith.constant 0 : i32
    %c0_i32_1 = arith.constant 0 : i32
    return %arg0, %arg1, %c0_i32, %c0_i32_0 : i32, i32, i32, i32
  }
  func.func @transform_2(%arg0: i32, %arg1: i32) -> (i32, i32, i32) {
    %c0_i32 = arith.constant 0 : i32
    %c0_i32_0 = arith.constant 0 : i32
    %c0_i32_1 = arith.constant 0 : i32
    return %arg0, %c0_i32, %c0_i32_0 : i32, i32, i32
  }
}

</mosaic_0001>

<bundles_post_ra>
// kernel: tpu_custom_call.1
= control target key start
LH: loop header
LB: loop body
LE: loop exit
PB: predicated region body
PF: predicated region fallthrough
CT: control target
= control target key end

     0   :  { %s3237_s0 = inlined_call_operand.hbm [shape: f32[2,4,8,8,128], index: 0, kind: input, shape index: {}]   ;;  %s3238_s1 = inlined_call_operand.hbm [shape: s32[2,8,8,128], index: 1, kind: input, shape index: {}]   ;;  %s3239_s2 = inlined_call_operand.hbm [shape: f32[2,1,128], index: 2, kind: output, shape index: {}]  }
   0x1   :  { %3282 = sst [smem:[#allocation44_spill]] %s3237_s0 }
   0x2   :  { %3283 = sst [smem:[#allocation45_spill]] %s3238_s1 }
   0x3   :  { %7 = vsyncpa [#allocation7], 0 }
   0x4   :  { %9 = vsyncpa [#allocation7 + $0x1], 0 }
   0x5   :  { %10 = vsyncpa [#allocation10], 0 }
   0x6   :  { %12 = vsyncpa [#allocation10 + $0x1], 0 }
   0x7   :  { %13 = vsyncpa [#allocation8], 0 }
   0x8   :  { %15 = vsyncpa [#allocation8 + $0x1], 0  ;;  %s2034_s9 = smov 0   ;;  %s2036_s10 = smov 0  }
   0x9   :  { %s2038_s11 = smov 0   ;;  %s2040_s12 = smov 0  }
   0xa   :  { %s2042_s13 = smov 0   ;;  %s2044_s14 = smov 0  }
   0xb   :  { %s2046_s15 = smov 0   ;;  %s2048_s16 = smov 0  }
   0xc   :  { %s2050_s17 = smov 0   ;;  %s2052_s18 = smov 0  }
   0xd   :  { %s2054_s19 = smov 0  }
   0xe LB: > { %3284 = sst [smem:[#allocation18_spill]] %s1971_s11  ;;  %s1523_s20 = sadd.s32 4294967295, %s2003_s19   ;;  %s2003_s19 = sphi %s2054_s19, %s21_s19   ;;  %s1999_s18 = sphi %s2052_s18, %s3445_s18   ;;  %s1995_s17 = sphi %s2050_s17, %s3451_s17   ;;  %s1991_s16 = sphi %s2048_s16, %s3443_s16   ;;  %s1987_s15 = sphi %s2046_s15, %s3450_s15   ;;  %s1983_s14 = sphi %s2044_s14, %s3442_s14   ;;  %s1979_s13 = sphi %s2042_s13, %s3449_s13   ;;  %s1975_s12 = sphi %s2040_s12, %s3448_s12   ;;  %s1971_s11 = sphi %s2038_s11, %s3440_s11   ;;  %s1967_s10 = sphi %s2036_s10, %s3447_s10   ;;  %s1963_s9 = sphi %s2034_s9, %s3446_s9  }
   0xf   : > { %3285 = sst [smem:[#allocation19_spill]] %s1983_s14  ;;  %s1524_s21 = sadd.s32 4294967294, %s2003_s19  }
  0x10   : > { %3286 = sst [smem:[#allocation20_spill]] %s1999_s18  ;;  %s30_s22 = sadd.s32 1, %s1995_s17 }
  0x11   : > { %s33_s23 = sadd.s32 1, %s1999_s18  ;;  %p31_p0 = scmp.ge.s32.totalorder %s30_s22, 2 }
  0x12   : > { %s42_s24 = sadd.s32 1, %s1983_s14  ;;  %p49_p1 = scmp.ne.s32.totalorder %s1983_s14, %s1979_s13 }
  0x13   : > { %p50_p2 = scmp.eq.s32.totalorder %s2003_s19, 0  ;;  %s3453_s22 = smov (%p31_p0, %s30_s22), 0 }
  0x14   : > { %3287 = sst [smem:[#allocation21_spill]] %s3453_s22  ;;  %s3455_s23 = smov (!%p31_p0, %s33_s23), %s1999_s18 }
  0x15   : > { %s38_s25 = ssub.s32 %s1995_s17, %s3453_s22  ;;  %p2100_p3 = por %p50_p2, %p49_p1 }
  0x16   : > { %p35_p4 = scmp.ge.s32.totalorder %s3455_s23, 2  ;;  %p55_p5 = scmp.ne.s32.totalorder %s1979_s13, %s1975_s12 }
  0x17   : > { %p56_p6 = scmp.eq.s32.totalorder %s1523_s20, 0  ;;  %s96_s27 = sadd.s32 1, %s1971_s11 }
  0x18   : > { %s3457_s23 = smov (%p35_p4, %s3455_s23), 0  ;;  %p106_p8 = scmp.ne.s32.totalorder %s1971_s11, %s1967_s10 }
  0x19   : > { %3289 = sst [smem:[#allocation22_spill]] %s3457_s23  ;;  %p2108_p7 = por %p56_p6, %p55_p5 }
  0x1a   : > { %s37_s29 = ssub.s32 %s1999_s18, %s3457_s23  ;;  %p107_p9 = scmp.eq.s32.totalorder %s1523_s20, 3 }
  0x1b   : > { %s39_s30 = sor.u32 %s38_s25, %s37_s29  ;;  %p94_p10 = scmp.eq.s32.totalorder %s37_s29, 0 }
  0x1c   : > { %p40_p11 = scmp.eq.s32.totalorder %s39_s30, 0  ;;  %p2116_p12 = por %p107_p9, %p106_p8 }
  0x1d   : > { %s2121_s4 = scalar_select %p94_p10, %s1971_s11, %s96_s27  }
  0x1e   : > { %s2124_s5 = scalar_select %p40_p11, %s1983_s14, %s42_s24  }
  0x1f   : > { %3292 = sst [smem:[#allocation23_spill]] %s2121_s4  ;;  %p112_p13 = scmp.ne.s32.totalorder %s1967_s10, %s1963_s9 }
  0x20   : > { %3293 = sst [smem:[#allocation24_spill]] %s2124_s5  ;;  %p113_p0 = scmp.eq.s32.totalorder %s1524_s21, 3 }
  0x21   : > { %p1526_p2 = scmp.ge.s32.totalorder %s2003_s19, 4 }
  0x22   : > { %p2128_p1 = por %p113_p0, %p112_p13 }
  0x23   : > { %129 = sbr.rel (%p1526_p2) target bundleno = 73 (0x49), region = 16 }
  0x24   : > { %s3294_s6 = scalar_select %p2128_p1, 1, 0 }
  0x26   : > { %3295 = sst [smem:[#allocation25_spill]] %s3294_s6 }
  0x28   : > { %s2134_s7 = sand.u32 1, %s1983_s14   ;;  %s3242_s8 = sshll.u32 %s1995_s17, 2 }
  0x29   : > { %s1527_s12 = sshll.u32 %s2134_s7, 7  ;;  %s1529_s20 = sshll.u32 %s1999_s18, 5 }
  0x2a   : > { %s143_s21 = sadd.s32 %s1529_s20, %s3242_s8  ;;  %s137_s24 = scalar_lea.vmem [#allocation6], %s1527_s12 }
  0x2b   : > { %s158_s25 = sshll.u32 %s137_s24, 4  ;;  %s1530_s27 = sshll.u32 %s143_s21, 7  ;;  %s159_s25 = int_to_ptr.vmem [resolvable:$true] %s158_s25 }
  0x2c   : > { %s1686_s29 = scalar_select %p2100_p3, [#allocation0], [#allocation14] }
  0x2d   : > { %s2005_s30 = smov 1024   ;;  %s2006_s22 = smov 512  }
  0x2e   : > { %1687 = sst [smem:[#allocation13]] (%p2100_p3), %s2005_s30  ;;  %s2007_s5 = smov 4  }
  0x2f   : > { %s150_s23 = sld [smem:[%s1686_s29]]   ;;  %s2008_s20 = smov 128  }
  0x30   : > { %1688 = sst [smem:[#allocation13 + $0x1]] (%p2100_p3), %s2006_s22  ;;  %s2009_s8 = smov 8  }
  0x31   : > { %1689 = sst [smem:[#allocation13 + $0x2]] (%p2100_p3), %s2007_s5  ;;  %s134_s14 = scalar_lea.sflag [#allocation7], %s2134_s7 }
  0x32   : > { %1690 = sst [smem:[#allocation13 + $0x3]] (%p2100_p3), %s2008_s20  ;;  %s2010_s22 = smov 131072  }
  0x33   : > { %s3296_s0 = sld [smem:[#allocation44_spill]]  ;;  %s1533_s5 = sshll.u32 %s2134_s7, 5 }
  0x34   : > { %1691 = sst [smem:[#allocation13 + $0x4]] (%p2100_p3), %s2008_s20  ;;  %s1535_s4 = sshll.u32 %s1999_s18, 3 }
  0x35   : > { %1692 = sst [smem:[#allocation13 + $0x5]] (%p2100_p3), %s2009_s8  ;;  %s1531_s29 = sshll.u32 %s150_s23, 26 }
  0x36   : > { %s1532_s30 = sadd.s32 134217728, %s1531_s29  ;;  %s3297_s12 = sshll.u32 %s1995_s17, 2 }
  0x37   : > { %s185_s21 = scalar_lea.vmem [#allocation9], %s1533_s5  ;;  %s182_s11 = scalar_lea.sflag [#allocation10], %s2134_s7 }
  0x38   : > { %s194_s20 = sshll.u32 %s185_s21, 4  ;;  %s195_s20 = int_to_ptr.vmem [resolvable:$true] %s194_s20 }
  0x39   : > { %s145_s24 = scalar_lea.hbm %s3296_s0, %s1530_s27  ;;  %s191_s27 = sadd.s32 %s1535_s4, %s3297_s12 }
  0x3a   : > { %1693 = dma.general (%p2100_p3), %s145_s24, 2048, %s159_s25, %s134_s14, %s2010_s22, [#allocation13], %s1532_s30, 0  }
  0x3b   : > { %s1536_s0 = sshll.u32 %s191_s27, 7  ;;  %s3298_s1 = sld [smem:[#allocation45_spill]] }
  0x3c   : > { %s1865_s6 = scalar_lea.vmem %s195_s20, 512  ;;  %s2011_s14 = smov [#allocation9]  }
  0x3d   : > { %p1866_p4 = scmp.ne.s32.totalorder %s195_s20, %s1865_s6  ;;  %s1869_s25 = sshll.u32 %s2011_s14, 4  ;;  %s1870_s25 = int_to_ptr.vmem [resolvable:$false] %s1869_s25 }
  0x3e   : > { %s1871_s24 = scalar_lea.vmem %s1870_s25, 1024  ;;  %p1872_p8 = scmp.lt.s32.totalorder %s195_s20, %s1870_s25 }
  0x3f   : > { %p1867_p5 = pnand %p1866_p4, %p2100_p3  ;;  %p1873_p9 = scmp.lt.s32.totalorder %s1871_s24, %s1865_s6 }
  0x41   : > { %s193_s29 = scalar_lea.hbm %s3298_s1, %s1536_s0  ;;  %p1868_p6 = pneg %p1867_p5 }
  0x42   : > { %p1874_p10 = por %p1873_p9, %p1872_p8 }
  0x44   : > { %p1875_p11 = pnand %p1874_p10, %p1868_p6 }
  0x46   : > { %1878 = shalt.err (!%p1875_p11)
}
  0x47   : > { %s2012_s4 = smov 128   ;;  %s2013_s30 = smov 8  }
  0x48   : > { %1694 = dma.hbm_to_vmem [thread:$0]  (%p2100_p3), %s193_s29, 512, %s195_s20, %s182_s11, %s2012_s4, %s2012_s4, %s2013_s30  }
  0x49 PF: > { %p1537_p13 = scmp.ge.s32.totalorder %s2003_s19, 1  ;;  %p202_p0 = scmp.lt.s32.totalorder %s2003_s19, 5 }
  0x4b   : > { %p203_p2 = pnand %p1537_p13, %p202_p0 }
  0x4d   : > { %206 = sbr.rel (%p203_p2) target bundleno = 1274 (0x4fa), region = 28 }
  0x52   : > { %s208_s0 = sand.u32 1, %s1979_s13  }
  0x53   : > { %s1538_s7 = sshll.u32 %s208_s0, 7  ;;  %s209_s6 = scalar_lea.sflag [#allocation7], %s208_s0 }
  0x54   : > { %s2176_s22 = scalar_lea.vmem [#allocation6], %s1538_s7 }
  0x55   : > { %1950 = dma.done.wait (%p2108_p7), %s209_s6, 2048  }
  0x56   : > { %1952 = vsyncadd (%p2108_p7), %s209_s6, 4294965248  ;;  %s1539_s11 = sshll.u32 %s208_s0, 5  ;;  %s218_s26 = scalar_lea.sflag [#allocation10], %s208_s0 }
  0x57   : > { %s221_s5 = scalar_lea.vmem [#allocation9], %s1539_s11 }
  0x58   : > { %1954 = dma.done.wait (%p2108_p7), %s218_s26, 512  }
  0x59   : > { %1956 = vsyncadd (%p2108_p7), %s218_s26, 4294966784  ;;  %s3280_s12 = sand.u32 1, %s1967_s10   ;;  %v250_v0 = vlaneseq  ;;  %p1540_p3 = scmp.ne.s32.totalorder %s1987_s15, 0 }
  0x5a   : > { %s2191_s27 = scalar_lea.vmem [#allocation11], %s3280_s12 }
  0x5b   : > { %v2187_v1 = vand.u32 127, %v250_v0  ;;  %254 = sbr.rel (%p1540_p3) target bundleno = 98 (0x62), region = 40 }
  0x5d   : > { %3299 = vst [vmem:[#allocation26_spill] sm:$0xff] %v2187_v1 }
  0x60   : > { %v2014_v2 = vmov 0.0  }
  0x61   : > { %255 = vst [vmem:[%s2191_s27] sm:$0x1] %v2014_v2 }
  0x62 PF: > { %v2195_v3 = vld [vmem:[%s221_s5 + $0x10] sm:$0xff]  ;;  %v2197_v4 = vld [vmem:[%s221_s5] sm:$0xff]  ;;  %v2199_v5 = vld [vmem:[%s221_s5 + $0x18] sm:$0xff]  ;;  %v395_v6 = vshrl.u32 %v250_v0, 7  ;;  %vm399_vm0 = vcmp.lt.s32.totalorder %v2187_v1, 127  ;;  %v2015_v17 = vmov 0.0  }
  0x63   : > { %v404_v7 = vcvt.s32.f32 %v2195_v3  ;;  %v402_v8 = vcvt.s32.f32 %v2197_v4  ;;  %v405_v9 = vcvt.s32.f32 %v2199_v5  ;;  %v2204_v10 = vld [vmem:[%s221_s5 + $0x8] sm:$0xff]  ;;  %v260_v11 = vld [vmem:[%s2176_s22] sm:$0xff]  ;;  %v262_v14 = vld [vmem:[%s2176_s22 + $0x10] sm:$0xff]  ;;  %v2214_v18 = vsel %vm399_vm0, 1.0, %v2015_v17  ;;  %s2016_s28 = smov 127   ;;  %p1567_p7 = scmp.eq.s32.totalorder %s1987_s15, 0 }
  0x64   : > { %v261_v12 = vld [vmem:[%s2176_s22 + $0x8] sm:$0xff]  ;;  %v403_v13 = vcvt.s32.f32 %v2204_v10  ;;  %v263_v15 = vld [vmem:[%s2176_s22 + $0x18] sm:$0xff]  ;;  %v1541_v16 = vld [vmem:[%s2176_s22 + $0x20] sm:$0xff]  ;;  %vm396_vm1 = vcmp.lt.s32.totalorder %v395_v6, 7 }
  0x65   : > { %414 = vrot.lane.b32.xlu1 %v404_v7, %s2016_s28  ;;  %v2217_v19 = vrot.slane %v404_v7, 1  ;;  %410 = vrot.lane.b32.xlu0 %v402_v8, %s2016_s28  ;;  %v2220_v20 = vrot.slane %v402_v8, 1  ;;  %v2222_v21 = vrot.slane %v405_v9, 1  ;;  %v1542_v22 = vld [vmem:[%s2176_s22 + $0x28] sm:$0xff]  ;;  %v1543_v23 = vld [vmem:[%s2176_s22 + $0x30] sm:$0xff]  ;;  %v269_v24 = vmax.f32 %v260_v11, %v1541_v16 }
  0x66   : > { %v2226_v25 = vrot.slane %v403_v13, 1  ;;  %v1544_v26 = vld [vmem:[%s2176_s22 + $0x38] sm:$0xff]  ;;  %v270_v27 = vmax.f32 %v261_v12, %v1542_v22  ;;  %v271_v28 = vmax.f32 %v262_v14, %v1543_v23  ;;  %v1545_v29 = vld [vmem:[%s2176_s22 + $0x40] sm:$0xff]  ;;  %v1546_v30 = vld [vmem:[%s2176_s22 + $0x48] sm:$0xff]  ;;  %v2233_v31 = vsel %vm396_vm1, 1.0, %v2015_v17 }
  0x67   : > { %3300 = vst [vmem:[#allocation27_spill] sm:$0xff] %v2222_v21  ;;  %3301 = vst [vmem:[#allocation28_spill] sm:$0xff] %v2233_v31  ;;  %v272_v32 = vmax.f32 %v263_v15, %v1544_v26  ;;  %v1547_v33 = vld [vmem:[%s2176_s22 + $0x50] sm:$0xff]  ;;  %v1548_v34 = vld [vmem:[%s2176_s22 + $0x58] sm:$0xff]  ;;  %v278_v35 = vmax.f32 %v269_v24, %v1545_v29 }
  0x68   : > { %v1549_v36 = vld [vmem:[%s2176_s22 + $0x60] sm:$0xff]  ;;  %v279_v37 = vmax.f32 %v270_v27, %v1546_v30  ;;  %v280_v38 = vmax.f32 %v271_v28, %v1547_v33  ;;  %v1550_v39 = vld [vmem:[%s2176_s22 + $0x68] sm:$0xff]  ;;  %v1551_v40 = vld [vmem:[%s2176_s22 + $0x70] sm:$0xff] }
  0x69   : > { %v1552_v41 = vld [vmem:[%s2176_s22 + $0x78] sm:$0xff]  ;;  %416 = vrot.lane.b32.xlu1 %v405_v9, %s2016_s28  ;;  %412 = vrot.lane.b32.xlu0 %v403_v13, %s2016_s28  ;;  %v281_v42 = vmax.f32 %v272_v32, %v1548_v34  ;;  %v287_v43 = vmax.f32 %v278_v35, %v1549_v36 }
  0x6a   : > { %v288_v44 = vmax.f32 %v279_v37, %v1550_v39  ;;  %v289_v45 = vmax.f32 %v280_v38, %v1551_v40 }
  0x6b   : > { %v290_v46 = vmax.f32 %v281_v42, %v1552_v41  ;;  %v291_v47 = vsub.f32 %v260_v11, %v287_v43  ;;  %v315_v48 = vsub.f32 %v1541_v16, %v287_v43  ;;  %v340_v60 = vsub.f32 %v1545_v29, %v287_v43 }
  0x6c   : > { %v292_v49 = vsub.f32 %v261_v12, %v288_v44  ;;  %v293_v50 = vsub.f32 %v262_v14, %v289_v45  ;;  %v316_v51 = vsub.f32 %v1542_v22, %v288_v44  ;;  %v317_v54 = vsub.f32 %v1543_v23, %v289_v45 }
  0x6d   : > { %v294_v52 = vsub.f32 %v263_v15, %v290_v46  ;;  %v295_v53 = vmul.f32 1.442695, %v291_v47  ;;  %v318_v57 = vsub.f32 %v1544_v26, %v290_v46  ;;  %v319_v59 = vmul.f32 1.442695, %v315_v48 }
  0x6e   : > { %v297_v55 = vmul.f32 1.442695, %v292_v49  ;;  %v299_v56 = vmul.f32 1.442695, %v293_v50  ;;  %v321_v61 = vmul.f32 1.442695, %v316_v51  ;;  %v341_v62 = vsub.f32 %v1546_v30, %v288_v44 }
  0x6f   : > { %1804 = vpow2.f32 %v295_v53  ;;  %v301_v58 = vmul.f32 1.442695, %v294_v52  ;;  %v323_v63 = vmul.f32 1.442695, %v317_v54  ;;  %v342_v0 = vsub.f32 %v1547_v33, %v289_v45 }
  0x70   : > { %1806 = vpow2.f32 %v297_v55  ;;  %v325_v2 = vmul.f32 1.442695, %v318_v57  ;;  %v343_v6 = vsub.f32 %v1548_v34, %v290_v46  ;;  %v344_v7 = vmul.f32 1.442695, %v340_v60 }
  0x71   : > { %1808 = vpow2.f32 %v299_v56  ;;  %v365_v8 = vsub.f32 %v1549_v36, %v287_v43  ;;  %v346_v9 = vmul.f32 1.442695, %v341_v62  ;;  %v366_v11 = vsub.f32 %v1550_v39, %v288_v44 }
  0x72   : > { %1810 = vpow2.f32 %v301_v58  ;;  %v348_v12 = vmul.f32 1.442695, %v342_v0  ;;  %v367_v13 = vsub.f32 %v1551_v40, %v289_v45  ;;  %v350_v14 = vmul.f32 1.442695, %v343_v6 }
  0x73   : > { %1812 = vpow2.f32 %v319_v59  ;;  %v368_v15 = vsub.f32 %v1552_v41, %v290_v46  ;;  %v369_v16 = vmul.f32 1.442695, %v365_v8  ;;  %v371_v22 = vmul.f32 1.442695, %v366_v11 }
  0x74   : > { %1814 = vpow2.f32 %v321_v61  ;;  %v373_v23 = vmul.f32 1.442695, %v367_v13 }
  0x75   : > { %1816 = vpow2.f32 %v323_v63  ;;  %v375_v24 = vmul.f32 1.442695, %v368_v15 }
  0x76   : > { %1818 = vpow2.f32 %v325_v2 }
  0x77   : > { %1820 = vpow2.f32 %v344_v7 }
  0x78   : > { %1822 = vpow2.f32 %v346_v9 }
  0x79   : > { %1824 = vpow2.f32 %v348_v12 }
  0x7a   : > { %1826 = vpow2.f32 %v350_v14 }
  0x7b   : > { %1828 = vpow2.f32 %v369_v16 }
  0x7c   : > { %v1805_v26 = vpop.eup %1804  ;;  %1830 = vpow2.f32 %v371_v22 }
  0x7d   : > { %v1807_v27 = vpop.eup %1806  ;;  %303 = vst [vmem:[#allocation2 + $0x30] sm:$0xff] %v1805_v26  ;;  %1832 = vpow2.f32 %v373_v23 }
  0x7e   : > { %v1809_v28 = vpop.eup %1808  ;;  %304 = vst [vmem:[#allocation2] sm:$0xff] %v1807_v27  ;;  %1834 = vpow2.f32 %v375_v24 }
  0x7f   : > { %v1811_v29 = vpop.eup %1810  ;;  %305 = vst [vmem:[#allocation2 + $0x58] sm:$0xff] %v1809_v28 }
  0x80   : > { %v1813_v30 = vpop.eup %1812  ;;  %306 = vst [vmem:[#allocation2 + $0x18] sm:$0xff] %v1811_v29 }
  0x81   : > { %v1815_v32 = vpop.eup %1814  ;;  %328 = vst [vmem:[#allocation2 + $0x50] sm:$0xff] %v1813_v30  ;;  %v332_v33 = vadd.f32 %v1813_v30, %v1805_v26 }
  0x82   : > { %v1817_v34 = vpop.eup %1816  ;;  %329 = vst [vmem:[#allocation2 + $0x68] sm:$0xff] %v1815_v32  ;;  %v333_v35 = vadd.f32 %v1815_v32, %v1807_v27 }
  0x83   : > { %v1819_v36 = vpop.eup %1818  ;;  %330 = vst [vmem:[#allocation2 + $0x8] sm:$0xff] %v1817_v34  ;;  %v334_v37 = vadd.f32 %v1817_v34, %v1809_v28 }
  0x84   : > { %v1821_v38 = vpop.eup %1820  ;;  %331 = vst [vmem:[#allocation2 + $0x48] sm:$0xff] %v1819_v36  ;;  %v335_v39 = vadd.f32 %v1819_v36, %v1811_v29 }
  0x85   : > { %v1823_v40 = vpop.eup %1822  ;;  %353 = vst [vmem:[#allocation2 + $0x40] sm:$0xff] %v1821_v38  ;;  %v357_v41 = vadd.f32 %v1821_v38, %v332_v33 }
  0x86   : > { %v1825_v42 = vpop.eup %1824  ;;  %354 = vst [vmem:[#allocation2 + $0x20] sm:$0xff] %v1823_v40  ;;  %v358_v43 = vadd.f32 %v1823_v40, %v333_v35 }
  0x87   : > { %v1827_v44 = vpop.eup %1826  ;;  %355 = vst [vmem:[#allocation2 + $0x10] sm:$0xff] %v1825_v42  ;;  %v359_v45 = vadd.f32 %v1825_v42, %v334_v37 }
  0x88   : > { %v1829_v46 = vpop.eup %1828  ;;  %356 = vst [vmem:[#allocation2 + $0x38] sm:$0xff] %v1827_v44  ;;  %v360_v47 = vadd.f32 %v1827_v44, %v335_v39 }
  0x89   : > { %v1831_v48 = vpop.eup %1830  ;;  %378 = vst [vmem:[#allocation2 + $0x60] sm:$0xff] %v1829_v46  ;;  %v382_v49 = vadd.f32 %v1829_v46, %v357_v41 }
  0x8a   : > { %v1833_v50 = vpop.eup %1832  ;;  %379 = vst [vmem:[#allocation2 + $0x70] sm:$0xff] %v1831_v48  ;;  %v383_v51 = vadd.f32 %v1831_v48, %v358_v43 }
  0x8b   : > { %v1835_v52 = vpop.eup %1834  ;;  %380 = vst [vmem:[#allocation2 + $0x78] sm:$0xff] %v1833_v50  ;;  %v384_v53 = vadd.f32 %v1833_v50, %v359_v45  ;;  %1836 = vrcp.f32 %v382_v49 }
  0x8c   : > { %381 = vst [vmem:[#allocation2 + $0x28] sm:$0xff] %v1835_v52  ;;  %v385_v54 = vadd.f32 %v1835_v52, %v360_v47  ;;  %1838 = vrcp.f32 %v383_v51 }
  0x8d   : > { %1840 = vrcp.f32 %v384_v53 }
  0x8e   : > { %1842 = vrcp.f32 %v385_v54 }
  0x98   : > { %v2243_v55 = vpop.eup %1836 }
  0x99   : > { %v2245_v56 = vpop.eup %1838 }
  0x9a   : > { %v2247_v57 = vpop.eup %1840 }
  0x9b   : > { %v2249_v58 = vpop.eup %1842 }
  0xd7   : > { %v2251_v59 = vpop.permute.xlu1 %414  ;;  %v2253_v60 = vpop.permute.xlu0 %410 }
  0xd8   : > { %421 = sbr.rel (%p1567_p7) target bundleno = 450 (0x1c2), region = 44 }
  0xdb   : > { %v2255_v61 = vpop.permute.xlu1 %416  ;;  %v2257_v62 = vpop.permute.xlu0 %412 }
  0xdc   : > { %3302 = vst [vmem:[#allocation29_spill] sm:$0xff] %v2255_v61 }
  0xdd   : > { %v422_v63 = vld [vmem:[#allocation5] sm:$0xff]  ;;  %vm475_vm2 = vcmp.eq.s32.totalorder %v2197_v4, 2  ;;  %v483_v6 = vld [vmem:[#allocation3 + $0x10] sm:$0xff]  ;;  %vm425_vm4 = vcmp.eq.s32.totalorder %v2197_v4, 0  ;;  %v431_v9 = vld [vmem:[#allocation3 + $0x8] sm:$0xff]  ;;  %vm501_vm6 = vcmp.eq.s32.totalorder %v2197_v4, 3 }
  0xde   : > { %v473_v0 = vld [vmem:[#allocation2 + $0x40] sm:$0xff]  ;;  %vm476_vm3 = vcmp.eq.s32.totalorder %v422_v63, 2  ;;  %v423_v7 = vld [vmem:[#allocation2 + $0x30] sm:$0xff]  ;;  %vm426_vm5 = vcmp.eq.s32.totalorder %v422_v63, 0  ;;  %vm502_vm7 = vcmp.eq.s32.totalorder %v422_v63, 3  ;;  %v509_v15 = vld [vmem:[#allocation3 + $0x18] sm:$0xff] }
  0xdf   : > { %v474_v2 = vmul.f32 %v2243_v55, %v473_v0  ;;  %v424_v8 = vmul.f32 %v2243_v55, %v423_v7  ;;  %v499_v11 = vld [vmem:[#allocation2 + $0x60] sm:$0xff]  ;;  %vm2265_vm8 = vmxor %vm475_vm2, %vm476_vm3  ;;  %v481_v16 = vld [vmem:[#allocation4 + $0x18] sm:$0xff]  ;;  %vm449_vm10 = vcmp.eq.s32.totalorder %v2197_v4, 1  ;;  %vm450_vm11 = vcmp.eq.s32.totalorder %v422_v63, 1 }
  0xe0   : > { %v500_v14 = vmul.f32 %v2243_v55, %v499_v11  ;;  %vm2270_vm9 = vmxor %vm425_vm4, %vm426_vm5  ;;  %v447_v24 = vld [vmem:[#allocation2 + $0x50] sm:$0xff]  ;;  %v430_v27 = vld [vmem:[#allocation4 + $0x8] sm:$0xff]  ;;  %v2017_v32 = vmov 0.0   ;;  %vm526_vm14 = vcmp.eq.s32.totalorder %v2187_v1, 9 }
  0xe1   : > { %v484_v13 = vsub.f32 %v474_v2, %v483_v6  ;;  %v432_v23 = vsub.f32 %v424_v8, %v431_v9  ;;  %vm503_vm12 = vmxor %vm501_vm6, %vm502_vm7  ;;  %v448_v29 = vmul.f32 %v2243_v55, %v447_v24  ;;  %v457_v30 = vld [vmem:[#allocation3] sm:$0xff]  ;;  %v1570_v33 = vsel %vm2265_vm8, 1.0, %v2017_v32  ;;  %v455_v42 = vld [vmem:[#allocation4 + $0x10] sm:$0xff] }
  0xe2   : > { %v510_v28 = vsub.f32 %v500_v14, %v509_v15  ;;  %v507_v35 = vld [vmem:[#allocation4] sm:$0xff]  ;;  %v1568_v37 = vsel %vm2270_vm9, 1.0, %v2017_v32  ;;  %vm451_vm13 = vmxor %vm449_vm10, %vm450_vm11  ;;  %v1571_v41 = vsel %vm503_vm12, 1.0, %v2017_v32 }
  0xe3   : > { %v485_v26 = vand.u32 2147483647, %v484_v13  ;;  %v433_v34 = vand.u32 2147483647, %v432_v23  ;;  %v458_v39 = vsub.f32 %v448_v29, %v457_v30  ;;  %v1569_v47 = vsel %vm451_vm13, 1.0, %v2017_v32 }
  0xe4   : > { %v511_v38 = vand.u32 2147483647, %v510_v28 }
  0xe5   : > { %v486_v36 = vadd.f32 %v485_v26, %v481_v16  ;;  %v434_v40 = vadd.f32 %v433_v34, %v430_v27  ;;  %v459_v45 = vand.u32 2147483647, %v458_v39  ;;  %v525_v39 = vld [vmem:[%s2191_s27] sm:$0x1] }
  0xe6   : > { %v512_v44 = vadd.f32 %v511_v38, %v507_v35 }
  0xe7   : > { %v487_v43 = vsub.f32 %v486_v36, %v1570_v33  ;;  %v435_v46 = vsub.f32 %v434_v40, %v1568_v37  ;;  %v460_v50 = vadd.f32 %v459_v45, %v455_v42 }
  0xe8   : > { %v513_v49 = vsub.f32 %v512_v44, %v1571_v41 }
  0xe9   : > { %v488_v48 = vmul.f32 %v487_v43, %v487_v43  ;;  %v436_v51 = vmul.f32 %v435_v46, %v435_v46  ;;  %v461_v53 = vsub.f32 %v460_v50, %v1569_v47 }
  0xea   : > { %v514_v52 = vmul.f32 %v513_v49, %v513_v49 }
  0xeb   : > { %489 = vadd.xlane.f32.xlu1 %v488_v48  ;;  %437 = vadd.xlane.f32.xlu0 %v436_v51  ;;  %v462_v54 = vmul.f32 %v461_v53, %v461_v53 }
  0xef   : > { %515 = vadd.xlane.f32.xlu1 %v514_v52  ;;  %463 = vadd.xlane.f32.xlu0 %v462_v54 }
 0x174   : > { %v490_v63 = vpop.xlane.xlu1 %489  ;;  %v438_v2 = vpop.xlane.xlu0 %437 }
 0x175   : > { %v491_v0 = vrot.slane %v490_v63, 4  ;;  %v439_v6 = vrot.slane %v438_v2, 4 }
 0x177   : > { %v492_v7 = vadd.f32 %v491_v0, %v490_v63  ;;  %v440_v8 = vadd.f32 %v439_v6, %v438_v2 }
 0x178   : > { %v516_v9 = vpop.xlane.xlu1 %515  ;;  %v464_v13 = vpop.xlane.xlu0 %463 }
 0x179   : > { %v493_v11 = vrot.slane %v492_v7, 2  ;;  %v517_v12 = vrot.slane %v516_v9, 4  ;;  %v441_v14 = vrot.slane %v440_v8, 2  ;;  %v465_v15 = vrot.slane %v464_v13, 4 }
 0x17b   : > { %v518_v16 = vadd.f32 %v517_v12, %v516_v9  ;;  %v466_v22 = vadd.f32 %v465_v15, %v464_v13  ;;  %v442_v23 = vadd.f32 %v441_v14, %v440_v8  ;;  %v494_v26 = vadd.f32 %v493_v11, %v492_v7 }
 0x17d   : > { %v519_v24 = vrot.slane %v518_v16, 2  ;;  %v467_v27 = vrot.slane %v466_v22, 2  ;;  %v443_v28 = vrot.slane %v442_v23, 1  ;;  %v495_v33 = vrot.slane %v494_v26, 1 }
 0x17f   : > { %v520_v29 = vadd.f32 %v519_v24, %v518_v16  ;;  %v468_v30 = vadd.f32 %v467_v27, %v466_v22  ;;  %v444_v32 = vadd.f32 %v443_v28, %v442_v23  ;;  %v496_v38 = vadd.f32 %v495_v33, %v494_v26 }
 0x181   : > { %v521_v34 = vrot.slane %v520_v29, 1  ;;  %1636 = vpush %v444_v32  ;;  %v469_v35 = vrot.slane %v468_v30, 1 }
 0x183   : > { %v470_v36 = vadd.f32 %v469_v35, %v468_v30  ;;  %v522_v37 = vadd.f32 %v521_v34, %v520_v29 }
 0x185   : > { %1638 = vpush %v470_v36 }
 0x186   : > { %1640 = vpush %v496_v38 }
 0x187   : > { %1642 = vpush %v522_v37 }
 0x1b2   : > { %s1637_s21 = spop %1636 }
 0x1b6   : > { %s1639_s20 = spop %1638 }
 0x1b7   : > { %s472_s8 = sadd.f32 %s1639_s20, %s1637_s21  ;;  %s1641_s23 = spop %1640 }
 0x1b8   : > { %s1643_s14 = spop %1642 }
 0x1b9   : > { %s498_s29 = sadd.f32 %s1641_s23, %s472_s8 }
 0x1bb   : > { %s524_s25 = sadd.f32 %s1643_s14, %s498_s29 }
 0x1bd   : > { %v527_v40 = vstv %s524_s25 }
 0x1be   : > { %v528_v41 = vsel %vm526_vm14, %v527_v40, 0.0 }
 0x1bf   : > { %v529_v42 = vadd.f32 %v528_v41, %v525_v39 }
 0x1c1   : > { %530 = vst [vmem:[%s2191_s27] sm:$0x1] %v529_v42 }
 0x1c2 PF: > { %v714_v43 = vld [vmem:[#allocation2 + $0x50] sm:$0xff]  ;;  %v715_v45 = vld [vmem:[#allocation2 + $0x68] sm:$0xff]  ;;  %1269 = vst [vmem:[#allocation5] sm:$0xff] %v2199_v5  ;;  %v532_v48 = vld [vmem:[#allocation2] sm:$0xff]  ;;  %vm3252_vm15 = vcmp.eq.s32.totalorder %v2197_v4, 0  ;;  %vm3251_vm0 = vcmp.eq.s32.totalorder %v2204_v10, 0 }
 0x1c3   : > { %v531_v44 = vld [vmem:[#allocation2 + $0x30] sm:$0xff]  ;;  %v2287_v46 = vmul.f32 %v2243_v55, %v714_v43  ;;  %v2297_v49 = vmul.f32 %v2245_v56, %v715_v45  ;;  %v2300_v50 = vmul.f32 %v2245_v56, %v532_v48  ;;  %v716_v51 = vld [vmem:[#allocation2 + $0x8] sm:$0xff]  ;;  %v533_v52 = vld [vmem:[#allocation2 + $0x58] sm:$0xff]  ;;  %vm3256_vm1 = vcmp.eq.s32.totalorder %v2195_v3, 0  ;;  %p1632_p4 = scmp.ne.s32.totalorder %s1987_s15, 1 }
 0x1c4   : > { %v2290_v47 = vmul.f32 %v2243_v55, %v531_v44  ;;  %v534_v53 = vld [vmem:[#allocation2 + $0x18] sm:$0xff]  ;;  %v2310_v63 = vmul.f32 %v2247_v57, %v716_v51  ;;  %v2313_v0 = vmul.f32 %v2247_v57, %v533_v52  ;;  %v900_v2 = vld [vmem:[#allocation2 + $0x20] sm:$0xff]  ;;  %vm2323_vm2 = vmxor %vm3251_vm0, %vm3252_vm15  ;;  %vm3249_vm4 = vcmp.eq.s32.totalorder %v2197_v4, 1 }
 0x1c5   : > { %791 = vrot.lane.b32.xlu1 %v2287_v46, %s2016_s28  ;;  %v2303_v54 = vmul.f32 %v2249_v58, %v534_v53  ;;  %v899_v6 = vld [vmem:[#allocation2 + $0x40] sm:$0xff]  ;;  %vm2331_vm3 = vmxor %vm3256_vm1, %vm3251_vm0  ;;  %v2340_v9 = vmul.f32 %v2245_v56, %v900_v2  ;;  %v901_v12 = vld [vmem:[#allocation2 + $0x10] sm:$0xff]  ;;  %vm3248_vm5 = vcmp.eq.s32.totalorder %v2204_v10, 1  ;;  %v3312_v16 = vmov 0 }
 0x1c6   : > { %608 = vrot.lane.b32.xlu0 %v2290_v47, %s2016_s28  ;;  %v2343_v11 = vmul.f32 %v2243_v55, %v899_v6  ;;  %v1084_v13 = vld [vmem:[#allocation2 + $0x60] sm:$0xff]  ;;  %v2352_v14 = vmul.f32 %v2247_v57, %v901_v12  ;;  %vm2361_vm6 = vmxor %vm3248_vm5, %vm3249_vm4  ;;  %v1085_v22 = vld [vmem:[#allocation2 + $0x70] sm:$0xff]  ;;  %vm3247_vm7 = vcmp.eq.s32.totalorder %v2195_v3, 1  ;;  %v3315_v28 = vmov 0 }
 0x1c7   : > { %3307 = vst [vmem:[#allocation30_spill] sm:$0xff] %v2303_v54  ;;  %712 = vst [vmem:[#allocation3 + $0x8] sm:$0xff] %v2303_v54  ;;  %v2355_v15 = vmul.f32 %v2243_v55, %v1084_v13  ;;  %v3313_v16 = vsel %vm2361_vm6, 4294967295, %v3312_v16  ;;  %v1086_v23 = vld [vmem:[#allocation2 + $0x78] sm:$0xff]  ;;  %v717_v24 = vld [vmem:[#allocation2 + $0x48] sm:$0xff]  ;;  %v2370_v55 = vmul.f32 %v2245_v56, %v1085_v22  ;;  %vm3259_vm9 = vcmp.eq.s32.totalorder %v2204_v10, 2 }
 0x1c8   : > { %v2373_v26 = vmul.f32 %v2247_v57, %v1086_v23  ;;  %v2376_v27 = vmul.f32 %v2249_v58, %v717_v24  ;;  %vm2384_vm8 = vmxor %vm3247_vm7, %vm3248_vm5  ;;  %vm3267_vm10 = vcmp.eq.s32.totalorder %v2197_v4, 2  ;;  %v3317_v56 = vmov 0  ;;  %v902_v33 = vld [vmem:[#allocation2 + $0x38] sm:$0xff]  ;;  %v1087_v44 = vld [vmem:[#allocation2 + $0x28] sm:$0xff] }
 0x1c9   : > { %793 = vrot.lane.b32.xlu1 %v2297_v49, %s2016_s28  ;;  %v3316_v28 = vsel %vm2384_vm8, 4294967295, %v3315_v28  ;;  %vm2398_vm11 = vmxor %vm3259_vm9, %vm3267_vm10  ;;  %vm3250_vm12 = vcmp.eq.s32.totalorder %v2199_v5, 0  ;;  %vm3246_vm13 = vcmp.eq.s32.totalorder %v2199_v5, 1  ;;  %v544_v57 = vsel %vm3251_vm0, %v2300_v50, 0.0 }
 0x1ca   : > { %610 = vrot.lane.b32.xlu0 %v2300_v50, %s2016_s28  ;;  %3314 = vst [vmem:[#allocation31_spill] sm:$0xff] %v2376_v27  ;;  %896 = vst [vmem:[#allocation3] sm:$0xff] %v2376_v27  ;;  %v3318_v56 = vsel %vm2398_vm11, 4294967295, %v3317_v56  ;;  %v545_v29 = vsel %vm3256_vm1, %v2313_v0, 0.0  ;;  %v727_v30 = vsel %vm3248_vm5, %v2297_v49, 0.0  ;;  %v728_v32 = vsel %vm3247_vm7, %v2310_v63, 0.0 }
 0x1cb   : > { %v546_v34 = vsel %vm3250_vm12, %v2303_v54, 0.0  ;;  %v2422_v35 = vsel %vm3246_vm13, %v2376_v27, 0.0  ;;  %v731_v36 = vadd.f32 %v727_v30, %v544_v57  ;;  %v732_v37 = vadd.f32 %v728_v32, %v545_v29 }
 0x1cc   : > { %v543_v38 = vsel %vm3252_vm15, %v2290_v47, 0.0  ;;  %v726_v39 = vsel %vm3249_vm4, %v2287_v46, 0.0  ;;  %v733_v40 = vadd.f32 %v2422_v35, %v546_v34  ;;  %v2432_v42 = vmul.f32 %v2249_v58, %v902_v33 }
 0x1cd   : > { %795 = vrot.lane.b32.xlu1 %v2310_v63, %s2016_s28  ;;  %v730_v41 = vadd.f32 %v726_v39, %v543_v38  ;;  %vm3258_vm14 = vcmp.eq.s32.totalorder %v2195_v3, 2  ;;  %v3320_v43 = vmov 0  ;;  %v2445_v45 = vmul.f32 %v2249_v58, %v1087_v44 }
 0x1ce   : > { %612 = vrot.lane.b32.xlu0 %v2313_v0, %s2016_s28  ;;  %3319 = vst [vmem:[#allocation32_spill] sm:$0xff] %v2432_v42  ;;  %vm2439_vm13 = vmxor %vm3258_vm14, %vm3259_vm9  ;;  %vm3266_vm7 = vcmp.eq.s32.totalorder %v2197_v4, 3  ;;  %vm3265_vm5 = vcmp.eq.s32.totalorder %v2204_v10, 3  ;;  %v1572_v48 = vsel %vm3252_vm15, 1.0, %v2015_v17  ;;  %v1573_v51 = vsel %vm3251_vm0, 1.0, %v2015_v17 }
 0x1cf   : > { %v3321_v43 = vsel %vm2439_vm13, 4294967295, %v3320_v43  ;;  %1081 = vst [vmem:[#allocation3 + $0x10] sm:$0xff] %v2432_v42  ;;  %3322 = vst [vmem:[#allocation33_spill] sm:$0xff] %v2445_v45  ;;  %vm3253_vm4 = vcmp.eq.s32.totalorder %v2199_v5, 2  ;;  %v3323_v58 = vmov 0  ;;  %v551_v52 = vadd.f32 %v544_v57, %v543_v38 }
 0x1d0   : > { %1266 = vst [vmem:[#allocation3 + $0x18] sm:$0xff] %v2445_v45  ;;  %vm2461_vm12 = vmxor %vm3265_vm5, %vm3266_vm7  ;;  %v912_v53 = vsel %vm3259_vm9, %v2340_v9, 0.0  ;;  %v563_v2 = vadd.f32 %v2300_v50, %v2290_v47  ;;  %v913_v6 = vsel %vm3258_vm14, %v2352_v14, 0.0  ;;  %v914_v12 = vsel %vm3253_vm4, %v2432_v42, 0.0 }
 0x1d1   : > { %978 = vrot.lane.b32.xlu1 %v2340_v9, %s2016_s28  ;;  %v3324_v58 = vsel %vm2461_vm12, 4294967295, %v3323_v58  ;;  %v916_v13 = vadd.f32 %v912_v53, %v731_v36  ;;  %v583_v22 = vadd.f32 %v1573_v51, %v1572_v48  ;;  %v911_v23 = vsel %vm3267_vm10, %v2343_v11, 0.0 }
 0x1d2   : > { %976 = vrot.lane.b32.xlu0 %v2343_v11, %s2016_s28  ;;  %v917_v24 = vadd.f32 %v913_v6, %v732_v37  ;;  %v918_v57 = vadd.f32 %v914_v12, %v733_v40  ;;  %v1574_v33 = vsel %vm3256_vm1, 1.0, %v2015_v17  ;;  %v915_v38 = vadd.f32 %v911_v23, %v730_v41 }
 0x1d3   : > { %vm3264_vm0 = vcmp.eq.s32.totalorder %v2195_v3, 3  ;;  %v552_v44 = vadd.f32 %v551_v52, %v545_v29  ;;  %v3325_v36 = vmov 0  ;;  %v564_v48 = vadd.f32 %v563_v2, %v2313_v0 }
 0x1d4   : > { %vm2487_vm15 = vmxor %vm3264_vm0, %vm3265_vm5  ;;  %v584_v37 = vadd.f32 %v1574_v33, %v583_v22  ;;  %vm3328_vm4 = vcmp.eq.s32.totalorder %v2199_v5, 0  ;;  %v746_v41 = vadd.f32 %v2297_v49, %v2287_v46  ;;  %v734_v51 = vadd.f32 %v727_v30, %v726_v39 }
 0x1d5   : > { %1161 = vrot.lane.b32.xlu1 %v2355_v15, %s2016_s28  ;;  %v3326_v36 = vsel %vm2487_vm15, 4294967295, %v3325_v36  ;;  %v1575_v40 = vsel %vm3328_vm4, 1.0, %v2015_v17  ;;  %v553_v29 = vadd.f32 %v552_v44, %v546_v34  ;;  %v565_v52 = vadd.f32 %v564_v48, %v2303_v54 }
 0x1d6   : > { %980 = vrot.lane.b32.xlu0 %v2352_v14, %s2016_s28  ;;  %3327 = vst [vmem:[#allocation34_spill] sm:$0xff] %v3326_v36  ;;  %v585_v1 = vadd.f32 %v1575_v40, %v584_v37  ;;  %vm3329_vm1 = vcmp.eq.s32.totalorder %v2197_v4, 1  ;;  %vm3330_vm14 = vcmp.eq.s32.totalorder %v2204_v10, 1  ;;  %vm3263_vm9 = vcmp.eq.s32.totalorder %v2199_v5, 3 }
 0x1d7   : > { %v1587_v61 = vsel %vm3329_vm1, 1.0, %v2015_v17  ;;  %v1588_v2 = vsel %vm3330_vm14, 1.0, %v2015_v17  ;;  %v747_v22 = vadd.f32 %v746_v41, %v2310_v63  ;;  %v735_v33 = vadd.f32 %v734_v51, %v728_v32 }
 0x1d8   : > { %v931_v30 = vadd.f32 %v2340_v9, %v2343_v11  ;;  %v1097_v34 = vsel %vm3265_vm5, %v2370_v55, 0.0  ;;  %v1096_v39 = vsel %vm3266_vm7, %v2355_v15, 0.0  ;;  %v1098_v44 = vsel %vm3264_vm0, %v2373_v26, 0.0 }
 0x1d9   : > { %1165 = vrot.lane.b32.xlu1 %v2373_v26, %s2016_s28  ;;  %v1099_v32 = vsel %vm3263_vm9, %v2445_v45, 0.0  ;;  %v2520_v48 = vadd.f32 %v1097_v34, %v916_v13  ;;  %v766_v37 = vadd.f32 %v1588_v2, %v1587_v61  ;;  %v2522_v40 = vadd.f32 %v1098_v44, %v917_v24 }
 0x1da   : > { %1163 = vrot.lane.b32.xlu0 %v2370_v55, %s2016_s28  ;;  %v2524_v41 = vadd.f32 %v1099_v32, %v918_v57  ;;  %v2526_v51 = vadd.f32 %v1096_v39, %v915_v38  ;;  %vm3335_vm1 = vcmp.eq.s32.totalorder %v2195_v3, 1  ;;  %v748_v21 = vadd.f32 %v747_v22, %v2376_v27 }
 0x1db   : > { %3331 = vst [vmem:[#allocation35_spill] sm:$0xff] %v2520_v48  ;;  %3332 = vst [vmem:[#allocation36_spill] sm:$0xff] %v2522_v40  ;;  %v932_v36 = vadd.f32 %v931_v30, %v2352_v14  ;;  %v1116_v13 = vadd.f32 %v2370_v55, %v2355_v15  ;;  %v736_v61 = vadd.f32 %v735_v33, %v2422_v35  ;;  %vm3336_vm4 = vcmp.eq.s32.totalorder %v2199_v5, 1 }
 0x1dc   : > { %3333 = vst [vmem:[#allocation37_spill] sm:$0xff] %v2524_v41  ;;  %3334 = vst [vmem:[#allocation38_spill] sm:$0xff] %v2526_v51  ;;  %v919_v57 = vadd.f32 %v912_v53, %v911_v23  ;;  %v1590_v38 = vsel %vm3336_vm4, 1.0, %v2015_v17  ;;  %vm3337_vm14 = vcmp.eq.s32.totalorder %v2204_v10, 2  ;;  %v1104_v41 = vadd.f32 %v1097_v34, %v1096_v39 }
 0x1dd   : > { %v1603_v2 = vsel %vm3337_vm14, 1.0, %v2015_v17  ;;  %v933_v22 = vadd.f32 %v932_v36, %v2432_v42  ;;  %vm3339_vm4 = vcmp.eq.s32.totalorder %v2199_v5, 2  ;;  %v1618_v36 = vsel %vm3265_vm5, 1.0, %v2015_v17 }
 0x1de   : > { %v920_v53 = vadd.f32 %v919_v57, %v913_v6  ;;  %v1617_v6 = vsel %vm3266_vm7, 1.0, %v2015_v17  ;;  %v1620_v57 = vsel %vm3263_vm9, 1.0, %v2015_v17  ;;  %vm807_vm14 = vcmp.eq.f32.partialorder %v2220_v20, 1.0 }
 0x1df   : > { %vm808_vm5 = vcmp.eq.f32.partialorder %v2226_v25, 1.0  ;;  %vm3341_vm7 = vcmp.eq.s32.totalorder %v2197_v4, 0  ;;  %vm625_vm15 = vcmp.eq.f32.partialorder %v2226_v25, 0.0  ;;  %vm641_vm8 = vcmp.eq.f32.partialorder %v2257_v62, 0.0 }
 0x1f9   : > { %554 = vadd.xlane.f32.xlu0 %v553_v29  ;;  %v1589_v29 = vsel %vm3335_vm1, 1.0, %v2015_v17  ;;  %vm3338_vm1 = vcmp.eq.s32.totalorder %v2195_v3, 2 }
 0x1fa   : > { %v767_v24 = vadd.f32 %v1589_v29, %v766_v37  ;;  %v1604_v33 = vsel %vm3338_vm1, 1.0, %v2015_v17  ;;  %v921_v37 = vadd.f32 %v920_v53, %v914_v12  ;;  %v1619_v12 = vsel %vm3264_vm0, 1.0, %v2015_v17 }
 0x1fb   : > { %vm624_vm1 = vcmp.eq.f32.partialorder %v2220_v20, 0.0  ;;  %vm823_vm0 = vcmp.eq.f32.partialorder %v2253_v60, 1.0 }
 0x1fc   : > { %v768_v35 = vadd.f32 %v1590_v38, %v767_v24  ;;  %v1136_v24 = vadd.f32 %v1618_v36, %v1617_v6  ;;  %v779_v38 = vrot.slane %v2287_v46, 1  ;;  %v781_v6 = vrot.slane %v2310_v63, 1 }
 0x1fd   : > { %586 = vadd.xlane.f32.xlu0 %v585_v1  ;;  %566 = vadd.xlane.f32.xlu1 %v565_v52  ;;  %v1602_v1 = vsel %vm3267_vm10, 1.0, %v2015_v17  ;;  %v1117_v52 = vadd.f32 %v1116_v13, %v2373_v26  ;;  %vm628_vm10 = vmxor %vm624_vm1, %vm3341_vm7  ;;  %vm3346_vm1 = vcmp.eq.s32.totalorder %v2204_v10, 0 }
 0x1fe   : > { %v951_v23 = vadd.f32 %v1603_v2, %v1602_v1  ;;  %v1137_v39 = vadd.f32 %v1619_v12, %v1136_v24  ;;  %v596_v2 = vrot.slane %v2290_v47, 1  ;;  %vm629_vm11 = vmxor %vm625_vm15, %vm3346_vm1  ;;  %vm809_vm15 = vcmp.eq.f32.partialorder %v2217_v19, 1.0 }
 0x1ff   : > { %v1118_v30 = vadd.f32 %v1117_v52, %v2445_v45  ;;  %v1577_v12 = vsel %vm629_vm11, 1.0, %v2015_v17  ;;  %vm3349_vm11 = vmmov %vm3346_vm1 }
 0x200   : > { %v952_v29 = vadd.f32 %v1604_v33, %v951_v23  ;;  %v1138_v1 = vadd.f32 %v1620_v57, %v1137_v39 }
 0x201   : > { %749 = vadd.xlane.f32.xlu0 %v748_v21  ;;  %737 = vadd.xlane.f32.xlu1 %v736_v61  ;;  %v1605_v21 = vsel %vm3339_vm4, 1.0, %v2015_v17  ;;  %v1105_v61 = vadd.f32 %v1104_v41, %v1098_v44  ;;  %v783_v44 = vsub.f32 %v779_v38, %v2287_v46  ;;  %v780_v41 = vrot.slane %v2297_v49, 1 }
 0x202   : > { %v953_v13 = vadd.f32 %v1605_v21, %v952_v29  ;;  %vm3340_vm4 = vcmp.eq.s32.totalorder %v2197_v4, 1  ;;  %v964_v38 = vrot.slane %v2343_v11, 1 }
 0x203   : > { %v1106_v34 = vadd.f32 %v1105_v61, %v1099_v32  ;;  %v597_v32 = vrot.slane %v2300_v50, 1  ;;  %vm811_vm9 = vmxor %vm807_vm14, %vm3340_vm4  ;;  %v787_v52 = vand.u32 2147483647, %v783_v44  ;;  %vm640_vm14 = vcmp.eq.f32.partialorder %v2253_v60, 0.0 }
 0x204   : > { %v1591_v53 = vsel %vm811_vm9, 1.0, %v2015_v17  ;;  %vm3342_vm12 = vmmov %vm3340_vm4  ;;  %vm3345_vm4 = vcmp.eq.s32.totalorder %v2204_v10, 1  ;;  %vm3347_vm9 = vcmp.eq.s32.totalorder %v2197_v4, 0  ;;  %v598_v61 = vrot.slane %v2313_v0, 1 }
 0x205   : > { %934 = vadd.xlane.f32.xlu0 %v933_v22  ;;  %769 = vadd.xlane.f32.xlu1 %v768_v35  ;;  %v600_v22 = vsub.f32 %v596_v2, %v2290_v47  ;;  %v784_v35 = vsub.f32 %v780_v41, %v2297_v49  ;;  %vm2585_vm13 = vmxor %vm823_vm0, %vm3342_vm12  ;;  %v601_v33 = vsub.f32 %v597_v32, %v2300_v50  ;;  %vm824_vm12 = vcmp.eq.f32.partialorder %v2257_v62, 1.0 }
 0x206   : > { %vm812_vm7 = vmxor %vm808_vm5, %vm3345_vm4  ;;  %v839_v29 = vsub.f32 %v787_v52, %v1591_v53  ;;  %v2609_v39 = vsel %vm2585_vm13, 1.0, %v2015_v17  ;;  %v785_v2 = vsub.f32 %v781_v6, %v2310_v63  ;;  %v966_v44 = vrot.slane %v2352_v14, 1 }
 0x207   : > { %vm644_vm0 = vmxor %vm640_vm14, %vm3347_vm9  ;;  %v788_v21 = vand.u32 2147483647, %v784_v35  ;;  %v1592_v36 = vsel %vm812_vm7, 1.0, %v2015_v17  ;;  %vm825_vm14 = vcmp.eq.f32.partialorder %v2251_v59, 1.0  ;;  %vm626_vm7 = vcmp.eq.f32.partialorder %v2217_v19, 0.0 }
 0x208   : > { %v2612_v57 = vsel %vm644_vm0, 1.0, %v2015_v17  ;;  %vm3348_vm5 = vmmov %vm3345_vm4  ;;  %v2624_v41 = vmul.f32 %v2233_v31, %v839_v29  ;;  %vm3350_vm13 = vcmp.eq.s32.totalorder %v2195_v3, 1  ;;  %v602_v52 = vsub.f32 %v598_v61, %v2313_v0 }
 0x209   : > { %1119 = vadd.xlane.f32.xlu0 %v1118_v30  ;;  %922 = vadd.xlane.f32.xlu1 %v921_v37  ;;  %v604_v30 = vand.u32 2147483647, %v600_v22  ;;  %v1576_v37 = vsel %vm628_vm10, 1.0, %v2015_v17  ;;  %vm828_vm10 = vmxor %vm824_vm12, %vm3348_vm5  ;;  %vm992_vm12 = vcmp.eq.f32.partialorder %v2220_v20, 2.0  ;;  %v1149_v29 = vrot.slane %v2355_v15, 1 }
 0x20a   : > { %vm645_vm4 = vmxor %vm641_vm8, %vm3349_vm11  ;;  %vm993_vm8 = vcmp.eq.f32.partialorder %v2226_v25, 2.0  ;;  %v2638_v53 = vsel %vm828_vm10, 1.0, %v2015_v17  ;;  %vm994_vm10 = vcmp.eq.f32.partialorder %v2217_v19, 2.0  ;;  %v789_v6 = vand.u32 2147483647, %v785_v2 }
 0x20b   : > { %v656_v24 = vsub.f32 %v604_v30, %v1576_v37  ;;  %vm2628_vm1 = vmxor %vm809_vm15, %vm3350_vm13  ;;  %v2649_v30 = vsel %vm645_vm4, 1.0, %v2015_v17  ;;  %vm3356_vm15 = vcmp.eq.s32.totalorder %v2195_v3, 0  ;;  %v968_v37 = vsub.f32 %v964_v38, %v2343_v11 }
 0x20c   : > { %vm3353_vm9 = vmmov %vm3350_vm13  ;;  %vm3357_vm11 = vcmp.eq.s32.totalorder %v2204_v10, 2  ;;  %v1593_v61 = vsel %vm2628_vm1, 1.0, %v2015_v17  ;;  %vm1009_vm4 = vcmp.eq.f32.partialorder %v2257_v62, 2.0  ;;  %vm1177_vm1 = vcmp.eq.f32.partialorder %v2220_v20, 3.0 }
 0x20d   : > { %954 = vadd.xlane.f32.xlu1 %v953_v13  ;;  %v605_v13 = vand.u32 2147483647, %v601_v33  ;;  %v2635_v35 = vmul.f32 %v2233_v31, %v656_v24  ;;  %vm2642_vm0 = vmxor %vm825_vm14, %vm3353_vm9  ;;  %vm642_vm14 = vcmp.eq.f32.partialorder %v2251_v59, 0.0  ;;  %v606_v24 = vand.u32 2147483647, %v602_v52 }
 0x20e   : > { %vm630_vm5 = vmxor %vm626_vm7, %vm3356_vm15  ;;  %vm3358_vm7 = vcmp.eq.s32.totalorder %v2197_v4, 2  ;;  %v1150_v38 = vrot.slane %v2370_v55, 1  ;;  %v841_v22 = vsub.f32 %v789_v6, %v1593_v61  ;;  %v2714_v6 = vsel %vm2642_vm0, 1.0, %v2015_v17 }
 0x20f   : > { %v657_v32 = vsub.f32 %v605_v13, %v1577_v12  ;;  %vm997_vm13 = vmxor %vm993_vm8, %vm3357_vm11  ;;  %v1578_v12 = vsel %vm630_vm5, 1.0, %v2015_v17  ;;  %vm3359_vm8 = vcmp.eq.s32.totalorder %v2195_v3, 2  ;;  %vm3360_vm11 = vcmp.eq.s32.totalorder %v2195_v3, 0 }
 0x210   : > { %vm996_vm9 = vmxor %vm992_vm12, %vm3358_vm7  ;;  %v1607_v2 = vsel %vm997_vm13, 1.0, %v2015_v17  ;;  %vm1008_vm12 = vcmp.eq.f32.partialorder %v2253_v60, 2.0  ;;  %vm3363_vm5 = vcmp.eq.s32.totalorder %v2204_v10, 2  ;;  %v658_v40 = vsub.f32 %v606_v24, %v1578_v12 }
 0x211   : > { %1107 = vadd.xlane.f32.xlu1 %v1106_v34  ;;  %v965_v34 = vrot.slane %v2340_v9, 1  ;;  %v2664_v13 = vmul.f32 %v2233_v31, %v657_v32  ;;  %vm998_vm15 = vmxor %vm994_vm10, %vm3359_vm8  ;;  %v1153_v32 = vsub.f32 %v1149_v29, %v2355_v15  ;;  %v1606_v52 = vsel %vm996_vm9, 1.0, %v2015_v17 }
 0x212   : > { %vm2685_vm6 = vmxor %vm642_vm14, %vm3360_vm11  ;;  %vm1010_vm14 = vcmp.eq.f32.partialorder %v2251_v59, 2.0  ;;  %v1608_v48 = vsel %vm998_vm15, 1.0, %v2015_v17  ;;  %vm3366_vm13 = vcmp.eq.s32.totalorder %v2197_v4, 3  ;;  %vm1178_vm8 = vcmp.eq.f32.partialorder %v2226_v25, 3.0 }
 0x213   : > { %v969_v33 = vsub.f32 %v965_v34, %v2340_v9  ;;  %vm2694_vm10 = vmxor %vm1009_vm4, %vm3363_vm5  ;;  %v1151_v29 = vrot.slane %v2373_v26, 1  ;;  %vm3369_vm4 = vcmp.eq.s32.totalorder %v2197_v4, 2  ;;  %vm1193_vm15 = vcmp.eq.f32.partialorder %v2253_v60, 3.0 }
 0x214   : > { %vm2703_vm7 = vmxor %vm1177_vm1, %vm3366_vm13  ;;  %v1154_v24 = vsub.f32 %v1150_v38, %v2370_v55  ;;  %v2729_v12 = vsel %vm2685_vm6, 1.0, %v2015_v17  ;;  %vm3372_vm0 = vcmp.eq.s32.totalorder %v2195_v3, 2  ;;  %vm1194_vm11 = vcmp.eq.f32.partialorder %v2257_v62, 3.0 }
 0x215   : > { %1139 = vadd.xlane.f32.xlu1 %v1138_v1  ;;  %v840_v1 = vsub.f32 %v788_v21, %v1592_v36  ;;  %v970_v36 = vsub.f32 %v966_v44, %v2352_v14  ;;  %v973_v34 = vand.u32 2147483647, %v969_v33  ;;  %v972_v44 = vand.u32 2147483647, %v968_v37  ;;  %vm2720_vm9 = vmxor %vm1008_vm12, %vm3369_vm4 }
 0x216   : > { %vm2733_vm1 = vmxor %vm1010_vm14, %vm3372_vm0  ;;  %v2739_v51 = vmul.f32 %v2233_v31, %v841_v22  ;;  %v1621_v38 = vsel %vm2703_vm7, 1.0, %v2015_v17  ;;  %vm3375_vm6 = vcmp.eq.s32.totalorder %v2204_v10, 3  ;;  %vm1179_vm5 = vcmp.eq.f32.partialorder %v2217_v19, 3.0 }
 0x217   : > { %v2657_v21 = vmul.f32 %v2233_v31, %v840_v1  ;;  %v974_v33 = vand.u32 2147483647, %v970_v36  ;;  %v1025_v36 = vsub.f32 %v973_v34, %v1607_v2  ;;  %v1024_v23 = vsub.f32 %v972_v44, %v1606_v52  ;;  %vm1182_vm12 = vmxor %vm1178_vm8, %vm3375_vm6 }
 0x218   : > { %v1157_v2 = vand.u32 2147483647, %v1153_v32  ;;  %v2750_v1 = vmul.f32 %v2233_v31, %v658_v40  ;;  %v2755_v44 = vsel %vm2694_vm10, 1.0, %v2015_v17  ;;  %vm3376_vm14 = vmmov %vm3366_vm13  ;;  %v1155_v32 = vsub.f32 %v1151_v29, %v2373_v26 }
 0x219   : > { %v1026_v60 = vsub.f32 %v974_v33, %v1608_v48  ;;  %vm2759_vm13 = vmxor %vm1193_vm15, %vm3376_vm14  ;;  %vm1195_vm7 = vcmp.eq.f32.partialorder %v2251_v59, 3.0  ;;  %v2768_v25 = vmul.f32 %v2233_v31, %v1025_v36  ;;  %v2773_v40 = vsel %vm2720_vm9, 1.0, %v2015_v17 }
 0x21a   : > { %v1158_v4 = vand.u32 2147483647, %v1154_v24  ;;  %vm3379_vm10 = vmmov %vm3375_vm6  ;;  %v676_v59 = vsub.f32 %v2300_v50, %v2290_v47  ;;  %v2782_v22 = vmul.f32 %v2233_v31, %v1024_v23  ;;  %v1209_v20 = vsub.f32 %v1157_v2, %v1621_v38 }
 0x21b   : > { %vm1198_vm8 = vmxor %vm1194_vm11, %vm3379_vm10  ;;  %v1622_v52 = vsel %vm1182_vm12, 1.0, %v2015_v17  ;;  %vm3380_vm4 = vcmp.eq.s32.totalorder %v2195_v3, 3  ;;  %v677_v10 = vsub.f32 %v2313_v0, %v2300_v50  ;;  %v2794_v62 = vsel %vm2733_vm1, 1.0, %v2015_v17 }
 0x21c   : > { %vm1183_vm9 = vmxor %vm1179_vm5, %vm3380_vm4  ;;  %v2797_v33 = vmul.f32 %v2233_v31, %v1026_v60  ;;  %v678_v37 = vsub.f32 %v2303_v54, %v2313_v0  ;;  %v859_v19 = vsub.f32 %v2297_v49, %v2287_v46  ;;  %v2808_v29 = vsel %vm2759_vm13, 1.0, %v2015_v17 }
 0x21d   : > { %vm3381_vm15 = vmmov %vm3380_vm4  ;;  %v2811_v36 = vsel %vm1198_vm8, 1.0, %v2015_v17  ;;  %v1159_v61 = vand.u32 2147483647, %v1155_v32  ;;  %v860_v24 = vsub.f32 %v2310_v63, %v2297_v49  ;;  %v2815_v23 = vsub.f32 %v1158_v4, %v1622_v52 }
 0x21e   : > { %vm1199_vm0 = vmxor %vm1195_vm7, %vm3381_vm15  ;;  %3382 = vst [vmem:[#allocation39_spill] sm:$0xff] %v2811_v36  ;;  %v1623_v34 = vsel %vm1183_vm9, 1.0, %v2015_v17  ;;  %v2818_v2 = vand.u32 2147483647, %v676_v59  ;;  %vm3384_vm1 = vcmp.eq.s32.totalorder %v2195_v3, 0  ;;  %vm3385_vm11 = vcmp.eq.s32.totalorder %v2199_v5, 0 }
 0x21f   : > { %3383 = vst [vmem:[#allocation40_spill] sm:$0xff] %v2815_v23  ;;  %vm684_vm6 = vmxor %vm3385_vm11, %vm3384_vm1  ;;  %v861_v60 = vsub.f32 %v2376_v27, %v2310_v63  ;;  %v2827_v38 = vmul.f32 %v2233_v31, %v1209_v20  ;;  %v2830_v48 = vsel %vm1199_vm0, 1.0, %v2015_v17  ;;  %v2832_v32 = vand.u32 2147483647, %v677_v10 }
 0x220   : > { %3387 = vst [vmem:[#allocation42_spill] sm:$0xff] %v2830_v48  ;;  %v2837_v4 = vsel %vm2323_vm2, 1.0, %v2015_v17  ;;  %v2839_v59 = vand.u32 2147483647, %v678_v37  ;;  %v2844_v52 = vsel %vm2331_vm3, 1.0, %v2015_v17  ;;  %vm3388_vm12 = vcmp.eq.s32.totalorder %v2195_v3, 1 }
 0x221   : > { %3386 = vst [vmem:[#allocation41_spill] sm:$0xff] %v2827_v38  ;;  %vm3389_vm5 = vcmp.eq.s32.totalorder %v2199_v5, 1  ;;  %v1044_v20 = vsub.f32 %v2340_v9, %v2343_v11  ;;  %v2852_v10 = vsub.f32 %v1159_v61, %v1623_v34  ;;  %v2855_v7 = vsel %vm684_vm6, 1.0, %v2015_v17 }
 0x222   : > { %vm867_vm14 = vmxor %vm3389_vm5, %vm3388_vm12  ;;  %v2857_v37 = vand.u32 2147483647, %v860_v24  ;;  %vm3391_vm2 = vnez %v3313_v16  ;;  %v691_v48 = vsub.f32 %v2818_v2, %v2837_v4  ;;  %v2864_v36 = vand.u32 2147483647, %v861_v60 }
 0x223   : > { %3390 = vst [vmem:[#allocation43_spill] sm:$0xff] %v2852_v10  ;;  %v1599_v8 = vsel %vm3391_vm2, 1.0, %v2015_v17  ;;  %vm3392_vm3 = vnez %v3316_v28  ;;  %v1045_v24 = vsub.f32 %v2352_v14, %v2340_v9  ;;  %v2878_v31 = vsel %vm867_vm14, 1.0, %v2015_v17 }
 0x224   : > { %v2869_v61 = vsel %vm3392_vm3, 1.0, %v2015_v17  ;;  %v1046_v28 = vsub.f32 %v2432_v42, %v2352_v14  ;;  %v2884_v4 = vand.u32 2147483647, %v1044_v20  ;;  %vm3393_vm13 = vcmp.eq.s32.totalorder %v2195_v3, 2 }
 0x225   : > { %vm3394_vm7 = vcmp.eq.s32.totalorder %v2199_v5, 2  ;;  %vm3395_vm8 = vnez %v3318_v56  ;;  %vm3396_vm4 = vnez %v3321_v43  ;;  %v1230_v20 = vsub.f32 %v2373_v26, %v2370_v55 }
 0x226   : > { %614 = vrot.lane.b32.xlu1 %v2303_v54, %s2016_s28  ;;  %v862_v54 = vand.u32 2147483647, %v859_v19  ;;  %vm1052_vm10 = vmxor %vm3394_vm7, %vm3393_vm13  ;;  %v2912_v2 = vand.u32 2147483647, %v1046_v28  ;;  %v1231_v28 = vsub.f32 %v2445_v45, %v2373_v26  ;;  %vm3397_vm9 = vnez %v3324_v58 }
 0x227   : > { %vm3400_vm0 = vcmp.eq.s32.totalorder %v2195_v3, 3  ;;  %vm3401_vm1 = vcmp.eq.s32.totalorder %v2199_v5, 3  ;;  %vm3417_vm12 = vcmp.eq.s32.totalorder %v2199_v5, 0  ;;  %vm3420_vm3 = vmmov %vm3394_vm7 }
 0x228   : > { %v874_v60 = vsub.f32 %v862_v54, %v1599_v8  ;;  %v2899_v8 = vand.u32 2147483647, %v1045_v24  ;;  %v2915_v24 = vsel %vm1052_vm10, 1.0, %v2015_v17  ;;  %vm1237_vm11 = vmxor %vm3401_vm1, %vm3400_vm0 }
 0x229   : > { %vm3421_vm7 = vmmov %vm3417_vm12 }
 0x22a   : > { %982 = vrot.lane.b32.xlu1 %v2432_v42, %s2016_s28  ;;  %vm3423_vm0 = vmmov %vm3401_vm1 }
 0x22e   : > { %1167 = vrot.lane.b32.xlu1 %v2445_v45, %s2016_s28  ;;  %v2940_v45 = vand.u32 2147483647, %v1230_v20  ;;  %v1061_v20 = vsub.f32 %v2912_v2, %v2915_v24 }
 0x237   : > { %v792_v19 = vpop.permute.xlu1 %791 }
 0x238   : > { %v609_v27 = vpop.permute.xlu0 %608  ;;  %v799_v34 = vsub.f32 %v792_v19, %v2287_v46  ;;  %v875_v46 = vsub.f32 %v2857_v37, %v2869_v61  ;;  %v2904_v37 = vsel %vm3396_vm4, 1.0, %v2015_v17  ;;  %v1229_v19 = vsub.f32 %v2370_v55, %v2355_v15 }
 0x239   : > { %v616_v16 = vsub.f32 %v609_v27, %v2290_v47  ;;  %v2895_v47 = vsel %vm3395_vm8, 1.0, %v2015_v17 }
 0x23a   : > { %v803_v23 = vand.u32 2147483647, %v799_v34 }
 0x23b   : > { %v620_v38 = vand.u32 2147483647, %v616_v16  ;;  %v794_v54 = vpop.permute.xlu1 %793 }
 0x23c   : > { %v611_v27 = vpop.permute.xlu0 %610  ;;  %v847_v61 = vsub.f32 %v803_v23, %v2609_v39  ;;  %v800_v34 = vsub.f32 %v794_v54, %v2297_v49  ;;  %v2927_v54 = vand.u32 2147483647, %v1229_v19  ;;  %v3398_v19 = vld [vmem:[#allocation34_spill] sm:$0xff] }
 0x23d   : > { %v664_v56 = vsub.f32 %v620_v38, %v2612_v57  ;;  %v617_v16 = vsub.f32 %v611_v27, %v2300_v50  ;;  %v2932_v27 = vsel %vm3397_vm9, 1.0, %v2015_v17  ;;  %vm3399_vm15 = vnez %v3398_v19  ;;  %vm3422_vm9 = vmmov %vm3420_vm3 }
 0x23e   : > { %v851_v10 = vmul.f32 %v2214_v18, %v847_v61  ;;  %v804_v57 = vand.u32 2147483647, %v800_v34  ;;  %v2945_v58 = vsel %vm3399_vm15, 1.0, %v2015_v17 }
 0x23f   : > { %v668_v39 = vmul.f32 %v2214_v18, %v664_v56  ;;  %v621_v23 = vand.u32 2147483647, %v617_v16  ;;  %v796_v49 = vpop.permute.xlu1 %795 }
 0x240   : > { %v613_v38 = vpop.permute.xlu0 %612  ;;  %v855_v61 = vadd.f32 %v851_v10, %v2624_v41  ;;  %v848_v34 = vsub.f32 %v804_v57, %v2638_v53  ;;  %v801_v50 = vsub.f32 %v796_v49, %v2310_v63 }
 0x241   : > { %v672_v56 = vadd.f32 %v668_v39, %v2635_v35  ;;  %v665_v16 = vsub.f32 %v621_v23, %v2649_v30  ;;  %v618_v43 = vsub.f32 %v613_v38, %v2313_v0  ;;  %v2955_v39 = vand.u32 2147483647, %v1231_v28 }
 0x242   : > { %v852_v42 = vmul.f32 %v2214_v18, %v848_v34  ;;  %v877_v10 = vadd.f32 %v874_v60, %v855_v61  ;;  %v805_v63 = vand.u32 2147483647, %v801_v50  ;;  %v1244_v38 = vsub.f32 %v2927_v54, %v2932_v27 }
 0x243   : > { %v669_v41 = vmul.f32 %v2214_v18, %v665_v16  ;;  %v694_v35 = vadd.f32 %v691_v48, %v672_v56  ;;  %v622_v0 = vand.u32 2147483647, %v618_v43  ;;  %v979_v53 = vpop.permute.xlu1 %978  ;;  %v2964_v43 = vsel %vm1237_vm11, 1.0, %v2015_v17 }
 0x244   : > { %v977_v30 = vpop.permute.xlu0 %976  ;;  %v856_v57 = vadd.f32 %v852_v42, %v2657_v21  ;;  %v985_v48 = vsub.f32 %v979_v53, %v2340_v9  ;;  %v849_v60 = vsub.f32 %v805_v63, %v2714_v6  ;;  %v3402_v42 = vsub.f32 %v2832_v32, %v2844_v52 }
 0x245   : > { %v673_v23 = vadd.f32 %v669_v41, %v2664_v13  ;;  %v984_v3 = vsub.f32 %v977_v30, %v2343_v11  ;;  %v666_v49 = vsub.f32 %v622_v0, %v2729_v12  ;;  %v697_v12 = vmul.f32 %v694_v35, %v694_v35 }
 0x246   : > { %v989_v50 = vand.u32 2147483647, %v985_v48  ;;  %v878_v13 = vadd.f32 %v875_v46, %v856_v57  ;;  %v853_v9 = vmul.f32 %v2214_v18, %v849_v60  ;;  %v880_v56 = vmul.f32 %v877_v10, %v877_v10 }
 0x247   : > { %v988_v28 = vand.u32 2147483647, %v984_v3  ;;  %v695_v21 = vadd.f32 %v3402_v42, %v673_v23  ;;  %v670_v11 = vmul.f32 %v2214_v18, %v666_v49  ;;  %v1162_v61 = vpop.permute.xlu1 %1161  ;;  %v3407_v42 = vld [vmem:[#allocation41_spill] sm:$0xff] }
 0x248   : > { %v981_v6 = vpop.permute.xlu0 %980  ;;  %v1033_v34 = vsub.f32 %v989_v50, %v2755_v44  ;;  %v1169_v27 = vsub.f32 %v1162_v61, %v2355_v15  ;;  %v857_v32 = vadd.f32 %v853_v9, %v2739_v51  ;;  %v881_v19 = vmul.f32 %v878_v13, %v878_v13 }
 0x249   : > { %v1032_v16 = vsub.f32 %v988_v28, %v2773_v40  ;;  %v986_v54 = vsub.f32 %v981_v6, %v2352_v14  ;;  %v674_v52 = vadd.f32 %v670_v11, %v2750_v1  ;;  %v698_v46 = vmul.f32 %v695_v21, %v695_v21  ;;  %v3408_v11 = vld [vmem:[#allocation40_spill] sm:$0xff] }
 0x24a   : > { %v1037_v41 = vmul.f32 %v2214_v18, %v1033_v34  ;;  %v1173_v10 = vand.u32 2147483647, %v1169_v27  ;;  %v3403_v40 = vsub.f32 %v2839_v59, %v2855_v7  ;;  %v3404_v15 = vsub.f32 %v2864_v36, %v2878_v31  ;;  %v3409_v6 = vld [vmem:[#allocation28_spill] sm:$0xff] }
 0x24b   : > { %v1036_v63 = vmul.f32 %v2214_v18, %v1032_v16  ;;  %v990_v35 = vand.u32 2147483647, %v986_v54  ;;  %v1166_v44 = vpop.permute.xlu1 %1165  ;;  %v700_v53 = vadd.f32 %v698_v46, %v697_v12  ;;  %v883_v1 = vadd.f32 %v881_v19, %v880_v56  ;;  %v3410_v12 = vld [vmem:[#allocation39_spill] sm:$0xff] }
 0x24c   : > { %v1164_v0 = vpop.permute.xlu0 %1163  ;;  %v696_v14 = vadd.f32 %v3403_v40, %v674_v52  ;;  %v879_v51 = vadd.f32 %v3404_v15, %v857_v32  ;;  %v1041_v30 = vadd.f32 %v1037_v41, %v2768_v25  ;;  %v1217_v48 = vsub.f32 %v1173_v10, %v2808_v29 }
 0x24d   : > { %v1040_v57 = vadd.f32 %v1036_v63, %v2782_v22  ;;  %v1034_v23 = vsub.f32 %v990_v35, %v2794_v62  ;;  %v1170_v3 = vsub.f32 %v1164_v0, %v2370_v55  ;;  %v1171_v60 = vsub.f32 %v1166_v44, %v2373_v26  ;;  %v3413_v44 = vld [vmem:[#allocation31_spill] sm:$0xff] }
 0x24e   : > { %v699_v59 = vmul.f32 %v696_v14, %v696_v14  ;;  %v882_v7 = vmul.f32 %v879_v51, %v879_v51  ;;  %v1221_v31 = vmul.f32 %v2214_v18, %v1217_v48  ;;  %v3405_v36 = vsub.f32 %v2884_v4, %v2895_v47  ;;  %v3411_v47 = vld [vmem:[#allocation43_spill] sm:$0xff] }
 0x24f   : > { %v1038_v49 = vmul.f32 %v2214_v18, %v1034_v23  ;;  %v3406_v22 = vsub.f32 %v2899_v8, %v2904_v37  ;;  %v1174_v50 = vand.u32 2147483647, %v1170_v3  ;;  %v1175_v29 = vand.u32 2147483647, %v1171_v60  ;;  %v3412_v8 = vld [vmem:[#allocation42_spill] sm:$0xff] }
 0x250   : > { %v1062_v25 = vadd.f32 %v3405_v36, %v1040_v57  ;;  %v701_v28 = vadd.f32 %v700_v53, %v699_v59  ;;  %v884_v55 = vadd.f32 %v883_v1, %v882_v7  ;;  %v1225_v21 = vadd.f32 %v1221_v31, %v3407_v42  ;;  %v3416_v42 = vld [vmem:[#allocation32_spill] sm:$0xff] }
 0x251   : > { %v1063_v62 = vadd.f32 %v3406_v22, %v1041_v30  ;;  %v1042_v26 = vadd.f32 %v1038_v49, %v2797_v33  ;;  %v1214_v61 = vmul.f32 %v3409_v6, %v3408_v11  ;;  %v1218_v4 = vsub.f32 %v1174_v50, %v3410_v12  ;;  %v3418_v11 = vld [vmem:[#allocation29_spill] sm:$0xff] }
 0x252   : > { %v1065_v13 = vmul.f32 %v1062_v25, %v1062_v25  ;;  %v1215_v56 = vmul.f32 %v3409_v6, %v3411_v47  ;;  %v1219_v37 = vsub.f32 %v1175_v29, %v3412_v8  ;;  %702 = vadd.xlane.f32.xlu0 %v701_v28  ;;  %v1247_v16 = vadd.f32 %v1244_v38, %v1225_v21  ;;  %v3414_v29 = vld [vmem:[#allocation30_spill] sm:$0xff] }
 0x253   : > { %v1066_v9 = vmul.f32 %v1063_v62, %v1063_v62  ;;  %v1064_v34 = vadd.f32 %v1061_v20, %v1042_v26  ;;  %v1222_v54 = vmul.f32 %v2214_v18, %v1218_v4  ;;  %v1245_v32 = vsub.f32 %v2940_v45, %v2945_v58  ;;  %v3415_v26 = vld [vmem:[#allocation27_spill] sm:$0xff]  ;;  %v3419_v4 = vld [vmem:[#allocation33_spill] sm:$0xff] }
 0x254   : > { %v1223_v27 = vmul.f32 %v2214_v18, %v1219_v37  ;;  %v1246_v52 = vsub.f32 %v2955_v39, %v2964_v43  ;;  %v1250_v24 = vmul.f32 %v1247_v16, %v1247_v16  ;;  %v599_v28 = vrot.slane %v3414_v29, 1 }
 0x255   : > { %v1068_v33 = vadd.f32 %v1066_v9, %v1065_v13  ;;  %v1067_v46 = vmul.f32 %v1064_v34, %v1064_v34  ;;  %v1226_v19 = vadd.f32 %v1222_v54, %v1214_v61  ;;  %vm627_vm6 = vcmp.eq.f32.partialorder %v3415_v26, 0.0 }
 0x256   : > { %v1227_v41 = vadd.f32 %v1223_v27, %v1215_v56  ;;  %885 = vadd.xlane.f32.xlu0 %v884_v55  ;;  %v967_v21 = vrot.slane %v3416_v42, 1  ;;  %v603_v13 = vsub.f32 %v599_v28, %v3414_v29  ;;  %vm631_vm5 = vmxor %vm627_vm6, %vm3417_vm12  ;;  %vm995_vm14 = vcmp.eq.f32.partialorder %v3415_v26, 2.0 }
 0x257   : > { %v1069_v63 = vadd.f32 %v1068_v33, %v1067_v46  ;;  %v1248_v35 = vadd.f32 %v1245_v32, %v1226_v19  ;;  %vm643_vm2 = vcmp.eq.f32.partialorder %v3418_v11, 0.0  ;;  %v1152_v47 = vrot.slane %v3419_v4, 1  ;;  %vm999_vm13 = vmxor %vm995_vm14, %vm3420_vm3 }
 0x258   : > { %v1249_v2 = vadd.f32 %v1246_v52, %v1227_v41  ;;  %v971_v61 = vsub.f32 %v967_v21, %v3416_v42  ;;  %v607_v12 = vand.u32 2147483647, %v603_v13  ;;  %v1579_v56 = vsel %vm631_vm5, 1.0, %v2015_v17  ;;  %vm647_vm10 = vmxor %vm643_vm2, %vm3421_vm7 }
 0x259   : > { %v1251_v20 = vmul.f32 %v1248_v35, %v1248_v35  ;;  %vm1011_vm8 = vcmp.eq.f32.partialorder %v3418_v11, 2.0  ;;  %vm1180_vm4 = vcmp.eq.f32.partialorder %v3415_v26, 3.0  ;;  %v1609_v16 = vsel %vm999_vm13, 1.0, %v2015_v17  ;;  %vm3424_vm6 = vmmov %vm3423_vm0 }
 0x25a   : > { %1070 = vadd.xlane.f32.xlu0 %v1069_v63  ;;  %v1252_v38 = vmul.f32 %v1249_v2, %v1249_v2  ;;  %v975_v37 = vand.u32 2147483647, %v971_v61  ;;  %v659_v34 = vsub.f32 %v607_v12, %v1579_v56  ;;  %v1156_v54 = vsub.f32 %v1152_v47, %v3419_v4  ;;  %vm1015_vm15 = vmxor %vm1011_vm8, %vm3422_vm9 }
 0x25b   : > { %v1253_v10 = vadd.f32 %v1251_v20, %v1250_v24  ;;  %v1583_v27 = vsel %vm647_vm10, 1.0, %v2015_v17  ;;  %vm1184_vm1 = vmxor %vm1180_vm4, %vm3423_vm0  ;;  %vm1196_vm11 = vcmp.eq.f32.partialorder %v3418_v11, 3.0  ;;  %v1613_v2 = vsel %vm1015_vm15, 1.0, %v2015_v17 }
 0x25c   : > { %v1027_v52 = vsub.f32 %v975_v37, %v1609_v16  ;;  %v663_v19 = vmul.f32 %v3409_v6, %v659_v34  ;;  %v1160_v35 = vand.u32 2147483647, %v1156_v54  ;;  %v1624_v24 = vsel %vm1184_vm1, 1.0, %v2015_v17  ;;  %vm1200_vm12 = vmxor %vm1196_vm11, %vm3424_vm6 }
 0x25d   : > { %v1254_v0 = vadd.f32 %v1253_v10, %v1252_v38  ;;  %vm810_vm5 = vcmp.eq.f32.partialorder %v3415_v26, 1.0  ;;  %vm3425_vm14 = vcmp.eq.s32.totalorder %v2199_v5, 1  ;;  %vm826_vm3 = vcmp.eq.f32.partialorder %v3418_v11, 1.0 }
 0x25e   : > { %v1031_v10 = vmul.f32 %v3409_v6, %v1027_v52  ;;  %vm814_vm2 = vmxor %vm810_vm5, %vm3425_vm14 }
 0x25f   : > { %1255 = vadd.xlane.f32.xlu0 %v1254_v0  ;;  %vm3426_vm13 = vmmov %vm3425_vm14 }
 0x260   : > { %vm830_vm7 = vmxor %vm826_vm3, %vm3426_vm13 }
 0x275   : > { %797 = vrot.lane.b32.xlu0 %v3413_v44, %s2016_s28 }
 0x282   : > { %v555_v45 = vpop.xlane.xlu0 %554 }
 0x283   : > { %v556_v58 = vrot.slane %v555_v45, 4 }
 0x285   : > { %v557_v39 = vadd.f32 %v556_v58, %v555_v45  ;;  %v1212_v58 = vsub.f32 %v1160_v35, %v1624_v24 }
 0x286   : > { %v587_v43 = vpop.xlane.xlu0 %586  ;;  %v567_v14 = vpop.xlane.xlu1 %566 }
 0x287   : > { %v558_v40 = vrot.slane %v557_v39, 2  ;;  %v588_v53 = vrot.slane %v587_v43, 4  ;;  %v568_v15 = vrot.slane %v567_v14, 4 }
 0x289   : > { %v589_v51 = vadd.f32 %v588_v53, %v587_v43  ;;  %v559_v1 = vadd.f32 %v558_v40, %v557_v39  ;;  %v569_v30 = vadd.f32 %v568_v15, %v567_v14  ;;  %v1628_v43 = vsel %vm1200_vm12, 1.0, %v2015_v17 }
 0x28a   : > { %v3020_v23 = vpop.xlane.xlu1 %737  ;;  %v1216_v15 = vmul.f32 %v3409_v6, %v1212_v58 }
 0x28b   : > { %v590_v57 = vrot.slane %v589_v51, 2  ;;  %v560_v48 = vrot.slane %v559_v1, 1  ;;  %v570_v3 = vrot.slane %v569_v30, 2 }
 0x28d   : > { %v561_v60 = vadd.f32 %v560_v48, %v559_v1  ;;  %v591_v59 = vadd.f32 %v590_v57, %v589_v51  ;;  %v571_v7 = vadd.f32 %v570_v3, %v569_v30  ;;  %v750_v57 = vpop.xlane.xlu0 %749 }
 0x28e   : > { %v3022_v49 = vpop.xlane.xlu1 %769  ;;  %v751_v48 = vrot.slane %v750_v57, 4 }
 0x28f   : > { %1644 = vpush %v561_v60  ;;  %v592_v31 = vrot.slane %v591_v59, 1  ;;  %v572_v36 = vrot.slane %v571_v7, 1  ;;  %v739_v60 = vrot.slane %v3020_v23, 4 }
 0x291   : > { %v593_v25 = vadd.f32 %v592_v31, %v591_v59  ;;  %v573_v22 = vadd.f32 %v572_v36, %v571_v7  ;;  %v935_v3 = vpop.xlane.xlu0 %934  ;;  %v752_v59 = vadd.f32 %v751_v48, %v750_v57  ;;  %v771_v7 = vrot.slane %v3022_v49, 4 }
 0x292   : > { %v3024_v62 = vpop.xlane.xlu1 %922  ;;  %v740_v31 = vadd.f32 %v739_v60, %v3020_v23  ;;  %v936_v36 = vrot.slane %v935_v3, 4 }
 0x293   : > { %1646 = vpush %v573_v22  ;;  %v924_v22 = vrot.slane %v3024_v62, 4  ;;  %v772_v28 = vadd.f32 %v771_v7, %v3022_v49 }
 0x294   : > { %1648 = vpush %v593_v25  ;;  %v741_v21 = vrot.slane %v740_v31, 2  ;;  %v937_v13 = vadd.f32 %v936_v36, %v935_v3 }
 0x295   : > { %v1120_v25 = vpop.xlane.xlu0 %1119  ;;  %v925_v61 = vadd.f32 %v924_v22, %v3024_v62 }
 0x296   : > { %v3026_v50 = vpop.xlane.xlu1 %954  ;;  %v1121_v56 = vrot.slane %v1120_v25, 4  ;;  %v742_v16 = vadd.f32 %v741_v21, %v740_v31  ;;  %v938_v49 = vrot.slane %v937_v13, 2 }
 0x297   : > { %v926_v54 = vrot.slane %v925_v61, 2 }
 0x298   : > { %v1122_v52 = vadd.f32 %v1121_v56, %v1120_v25 }
 0x29a   : > { %v3029_v55 = vpop.xlane.xlu1 %1107  ;;  %v1123_v58 = vrot.slane %v1122_v52, 2 }
 0x29c   : > { %v1124_v36 = vadd.f32 %v1123_v58, %v1122_v52 }
 0x29e   : > { %v3037_v9 = vpop.xlane.xlu1 %1139 }
 0x29f   : > { %v1141_v47 = vrot.slane %v3037_v9, 4 }
 0x2a1   : > { %v1142_v62 = vadd.f32 %v1141_v47, %v3037_v9 }
 0x2a2   : > { %v615_v8 = vpop.permute.xlu1 %614 }
 0x2a3   : > { %v619_v33 = vsub.f32 %v615_v8, %v3414_v29  ;;  %v753_v29 = vrot.slane %v752_v59, 2  ;;  %v773_v8 = vrot.slane %v772_v28, 2 }
 0x2a5   : > { %v623_v32 = vand.u32 2147483647, %v619_v33  ;;  %v754_v34 = vadd.f32 %v753_v29, %v752_v59  ;;  %v774_v35 = vadd.f32 %v773_v8, %v772_v28  ;;  %v1125_v8 = vrot.slane %v1124_v36, 1 }
 0x2a6   : > { %v983_v46 = vpop.permute.xlu1 %982 }
 0x2a7   : > { %v667_v41 = vsub.f32 %v623_v32, %v1583_v27  ;;  %v987_v63 = vsub.f32 %v983_v46, %v3416_v42  ;;  %v956_v42 = vrot.slane %v3026_v50, 4  ;;  %v1126_v52 = vadd.f32 %v1125_v8, %v1124_v36 }
 0x2a9   : > { %v671_v20 = vmul.f32 %v2214_v18, %v667_v41  ;;  %v991_v38 = vand.u32 2147483647, %v987_v63  ;;  %v957_v37 = vadd.f32 %v956_v42, %v3026_v50  ;;  %v755_v63 = vrot.slane %v754_v34, 1  ;;  %v3091_v50 = vld [vmem:[#allocation3] sm:$0xff] }
 0x2aa   : > { %v1168_v0 = vpop.permute.xlu1 %1167 }
 0x2ab   : > { %v675_v44 = vadd.f32 %v671_v20, %v663_v19  ;;  %v1035_v45 = vsub.f32 %v991_v38, %v1613_v2  ;;  %v1172_v39 = vsub.f32 %v1168_v0, %v3419_v4  ;;  %v1109_v4 = vrot.slane %v3029_v55, 4 }
 0x2ac   : > { %v958_v41 = vrot.slane %v957_v37, 2  ;;  %v743_v20 = vrot.slane %v742_v16, 1  ;;  %v782_v38 = vrot.slane %v3091_v50, 1  ;;  %v1143_v0 = vrot.slane %v1142_v62, 2 }
 0x2ad   : > { %713 = vst [vmem:[#allocation4 + $0x8] sm:$0xff] %v675_v44  ;;  %v1039_v40 = vmul.f32 %v2214_v18, %v1035_v45  ;;  %v1176_v14 = vand.u32 2147483647, %v1172_v39  ;;  %v1110_v27 = vadd.f32 %v1109_v4, %v3029_v55  ;;  %v927_v55 = vadd.f32 %v926_v54, %v925_v61 }
 0x2ae   : > { %v939_v45 = vadd.f32 %v938_v49, %v937_v13  ;;  %v744_v57 = vadd.f32 %v743_v20, %v742_v16  ;;  %v1144_v60 = vadd.f32 %v1143_v0, %v1142_v62  ;;  %v1594_v4 = vsel %vm814_vm2, 1.0, %v2015_v17 }
 0x2af   : > { %v1043_v53 = vadd.f32 %v1039_v40, %v1031_v10  ;;  %v1220_v51 = vsub.f32 %v1176_v14, %v1628_v43  ;;  %v1111_v10 = vrot.slane %v1110_v27, 2  ;;  %v756_v40 = vadd.f32 %v755_v63, %v754_v34 }
 0x2b0   : > { %v775_v14 = vrot.slane %v774_v35, 1  ;;  %v928_v48 = vrot.slane %v927_v55, 1  ;;  %v940_v31 = vrot.slane %v939_v45, 1  ;;  %v1598_v62 = vsel %vm830_vm7, 1.0, %v2015_v17 }
 0x2b1   : > { %1083 = vst [vmem:[#allocation4 + $0x18] sm:$0xff] %v1043_v53  ;;  %v1224_v1 = vmul.f32 %v2214_v18, %v1220_v51  ;;  %v959_v53 = vadd.f32 %v958_v41, %v957_v37  ;;  %v1112_v3 = vadd.f32 %v1111_v10, %v1110_v27 }
 0x2b2   : > { %v776_v25 = vadd.f32 %v775_v14, %v774_v35  ;;  %v929_v13 = vadd.f32 %v928_v48, %v927_v55  ;;  %v941_v56 = vadd.f32 %v940_v31, %v939_v45 }
 0x2b3   : > { %v1228_v30 = vadd.f32 %v1224_v1, %v1216_v15  ;;  %v960_v22 = vrot.slane %v959_v53, 1  ;;  %v1113_v61 = vrot.slane %v1112_v3, 1 }
 0x2b5   : > { %1268 = vst [vmem:[#allocation4] sm:$0xff] %v1228_v30  ;;  %v786_v30 = vsub.f32 %v782_v38, %v3091_v50  ;;  %v961_v37 = vadd.f32 %v960_v22, %v959_v53  ;;  %v1114_v27 = vadd.f32 %v1113_v61, %v1112_v3 }
 0x2b7   : > { %v790_v21 = vand.u32 2147483647, %v786_v30 }
 0x2b9   : > { %v842_v49 = vsub.f32 %v790_v21, %v1594_v4 }
 0x2c0   : > { %s3071_s24 = spop %1644 }
 0x2c4   : > { %s3073_s4 = spop %1646 }
 0x2c5   : > { %s3075_s30 = spop %1648 }
 0x2db   : > { %v703_v12 = vpop.xlane.xlu0 %702 }
 0x2dc   : > { %v704_v23 = vrot.slane %v703_v12, 4 }
 0x2de   : > { %v705_v33 = vadd.f32 %v704_v23, %v703_v12  ;;  %v1145_v12 = vrot.slane %v1144_v60, 1 }
 0x2df   : > { %v886_v32 = vpop.xlane.xlu0 %885 }
 0x2e0   : > { %v706_v46 = vrot.slane %v705_v33, 2  ;;  %v887_v19 = vrot.slane %v886_v32, 4 }
 0x2e2   : > { %v888_v2 = vadd.f32 %v887_v19, %v886_v32  ;;  %v707_v24 = vadd.f32 %v706_v46, %v705_v33  ;;  %v1146_v32 = vadd.f32 %v1145_v12, %v1144_v60  ;;  %v846_v19 = vmul.f32 %v3409_v6, %v842_v49 }
 0x2e3   : > { %v1071_v44 = vpop.xlane.xlu0 %1070 }
 0x2e4   : > { %v889_v9 = vrot.slane %v888_v2, 2  ;;  %v1072_v39 = vrot.slane %v1071_v44, 4  ;;  %v708_v43 = vrot.slane %v707_v24, 1 }
 0x2e6   : > { %v1073_v15 = vadd.f32 %v1072_v39, %v1071_v44  ;;  %v709_v51 = vadd.f32 %v708_v43, %v707_v24  ;;  %v890_v1 = vadd.f32 %v889_v9, %v888_v2 }
 0x2e8   : > { %v1074_v59 = vrot.slane %v1073_v15, 2  ;;  %1650 = vpush %v709_v51  ;;  %v891_v7 = vrot.slane %v890_v1, 1  ;;  %v1256_v26 = vpop.xlane.xlu0 %1255 }
 0x2e9   : > { %1652 = vpush %v744_v57  ;;  %v1257_v29 = vrot.slane %v1256_v26, 4 }
 0x2ea   : > { %1654 = vpush %v756_v40  ;;  %v892_v28 = vadd.f32 %v891_v7, %v890_v1  ;;  %v1075_v42 = vadd.f32 %v1074_v59, %v1073_v15 }
 0x2eb   : > { %1656 = vpush %v776_v25  ;;  %v1258_v47 = vadd.f32 %v1257_v29, %v1256_v26 }
 0x2ec   : > { %1658 = vpush %v892_v28  ;;  %v1076_v23 = vrot.slane %v1075_v42, 1  ;;  %v798_v34 = vpop.permute.xlu0 %797 }
 0x2ed   : > { %1660 = vpush %v929_v13  ;;  %v1259_v33 = vrot.slane %v1258_v47, 2  ;;  %v802_v54 = vsub.f32 %v798_v34, %v3091_v50 }
 0x2ee   : > { %1662 = vpush %v941_v56  ;;  %v1077_v16 = vadd.f32 %v1076_v23, %v1075_v42 }
 0x2ef   : > { %1664 = vpush %v961_v37  ;;  %v1260_v5 = vadd.f32 %v1259_v33, %v1258_v47  ;;  %v806_v46 = vand.u32 2147483647, %v802_v54 }
 0x2f0   : > { %1666 = vpush %v1077_v16 }
 0x2f1   : > { %1668 = vpush %v1114_v27  ;;  %v1261_v11 = vrot.slane %v1260_v5, 1  ;;  %v850_v41 = vsub.f32 %v806_v46, %v1598_v62 }
 0x2f2   : > { %1670 = vpush %v1126_v52 }
 0x2f3   : > { %1672 = vpush %v1146_v32  ;;  %v1262_v63 = vadd.f32 %v1261_v11, %v1260_v5  ;;  %v854_v35 = vmul.f32 %v2214_v18, %v850_v41 }
 0x2f5   : > { %1674 = vpush %v1262_v63  ;;  %v858_v2 = vadd.f32 %v854_v35, %v846_v19 }
 0x2f7   : > { %898 = vst [vmem:[#allocation4 + $0x10] sm:$0xff] %v858_v2 }
 0x319   : > { %s1651_s7 = spop %1650 }
 0x31a   : > { %s3108_s6 = spop %1652 }
 0x31b   : > { %s3110_s22 = spop %1654 }
 0x31c   : > { %s3112_s11 = spop %1656 }
 0x31d   : > { %s1659_s5 = spop %1658 }
 0x31e   : > { %s3116_s28 = spop %1660  ;;  %s894_s25 = sadd.f32 %s1659_s5, %s1651_s7 }
 0x31f   : > { %s3118_s21 = spop %1662 }
 0x320   : > { %s3120_s20 = spop %1664 }
 0x321   : > { %s963_s8 = sadd.f32 %s3120_s20, %s3118_s21  ;;  %s1667_s23 = spop %1666 }
 0x322   : > { %s3124_s29 = spop %1668  ;;  %s3132_s0 = sadd.f32 %s1667_s23, %s894_s25 }
 0x323   : > { %s3126_s14 = spop %1670  ;;  %1272 = sbr.rel (%p1632_p4) target bundleno = 1026 (0x402), region = 48 }
 0x324   : > { %s3128_s12 = spop %1672 }
 0x326   : > { %s3134_s1 = spop %1674 }
 0x328   : > { %v1297_v17 = vld [vmem:[#allocation4 + $0x18] sm:$0xff]  ;;  %v1273_v18 = vld [vmem:[#allocation4 + $0x8] sm:$0xff]  ;;  %v1309_v6 = vld [vmem:[#allocation4] sm:$0xff] }
 0x329   : > { %v1298_v24 = vmul.f32 %v1297_v17, %v1297_v17  ;;  %v1274_v20 = vmul.f32 %v1273_v18, %v1273_v18  ;;  %v1285_v50 = vld [vmem:[#allocation4 + $0x10] sm:$0xff]  ;;  %v1310_v38 = vmul.f32 %v1309_v6, %v1309_v6  ;;  %v1321_v21 = vld [vmem:[%s2191_s27] sm:$0x1] }
 0x32a   : > { %v1286_v10 = vmul.f32 %v1285_v50, %v1285_v50  ;;  %v3427_v42 = vld [vmem:[#allocation26_spill] sm:$0xff] }
 0x32b   : > { %1299 = vadd.xlane.f32.xlu1 %v1298_v24  ;;  %1275 = vadd.xlane.f32.xlu0 %v1274_v20  ;;  %vm1322_vm10 = vcmp.eq.s32.totalorder %v3427_v42, 9 }
 0x32f   : > { %1311 = vadd.xlane.f32.xlu1 %v1310_v38  ;;  %1287 = vadd.xlane.f32.xlu0 %v1286_v10 }
 0x3b4   : > { %v1300_v0 = vpop.xlane.xlu1 %1299  ;;  %v1276_v44 = vpop.xlane.xlu0 %1275 }
 0x3b5   : > { %v1301_v55 = vrot.slane %v1300_v0, 4  ;;  %v1277_v45 = vrot.slane %v1276_v44, 4 }
 0x3b7   : > { %v1302_v58 = vadd.f32 %v1301_v55, %v1300_v0  ;;  %v1278_v9 = vadd.f32 %v1277_v45, %v1276_v44 }
 0x3b8   : > { %v1312_v39 = vpop.xlane.xlu1 %1311  ;;  %v1288_v43 = vpop.xlane.xlu0 %1287 }
 0x3b9   : > { %v1303_v40 = vrot.slane %v1302_v58, 2  ;;  %v1279_v14 = vrot.slane %v1278_v9, 2  ;;  %v1313_v53 = vrot.slane %v1312_v39, 4  ;;  %v1289_v15 = vrot.slane %v1288_v43, 4 }
 0x3bb   : > { %v1314_v51 = vadd.f32 %v1313_v53, %v1312_v39  ;;  %v1290_v1 = vadd.f32 %v1289_v15, %v1288_v43  ;;  %v1280_v30 = vadd.f32 %v1279_v14, %v1278_v9  ;;  %v1304_v57 = vadd.f32 %v1303_v40, %v1302_v58 }
 0x3bd   : > { %v1315_v48 = vrot.slane %v1314_v51, 2  ;;  %v1291_v3 = vrot.slane %v1290_v1, 2  ;;  %v1281_v60 = vrot.slane %v1280_v30, 1  ;;  %v1305_v36 = vrot.slane %v1304_v57, 1 }
 0x3bf   : > { %v1316_v59 = vadd.f32 %v1315_v48, %v1314_v51  ;;  %v1292_v7 = vadd.f32 %v1291_v3, %v1290_v1  ;;  %v1282_v31 = vadd.f32 %v1281_v60, %v1280_v30  ;;  %v1306_v28 = vadd.f32 %v1305_v36, %v1304_v57 }
 0x3c1   : > { %1676 = vpush %v1282_v31  ;;  %v1293_v25 = vrot.slane %v1292_v7, 1  ;;  %v1317_v26 = vrot.slane %v1316_v59, 1 }
 0x3c3   : > { %v1294_v22 = vadd.f32 %v1293_v25, %v1292_v7  ;;  %v1318_v29 = vadd.f32 %v1317_v26, %v1316_v59 }
 0x3c5   : > { %1678 = vpush %v1294_v22 }
 0x3c6   : > { %1680 = vpush %v1306_v28 }
 0x3c7   : > { %1682 = vpush %v1318_v29 }
 0x3f2   : > { %s1677_s15 = spop %1676 }
 0x3f6   : > { %s1679_s7 = spop %1678 }
 0x3f7   : > { %s1296_s5 = sadd.f32 %s1679_s7, %s1677_s15  ;;  %s1681_s23 = spop %1680 }
 0x3f8   : > { %s1683_s18 = spop %1682 }
 0x3f9   : > { %s1308_s25 = sadd.f32 %s1681_s23, %s1296_s5 }
 0x3fb   : > { %s1320_s26 = sadd.f32 %s1683_s18, %s1308_s25 }
 0x3fd   : > { %v1323_v13 = vstv %s1320_s26 }
 0x3fe   : > { %v1324_v61 = vsel %vm1322_vm10, %v1323_v13, 0.0 }
 0x3ff   : > { %v1325_v12 = vadd.f32 %v1324_v61, %v1321_v21 }
 0x401   : > { %1326 = vst [vmem:[%s2191_s27] sm:$0x1] %v1325_v12 }
 0x402 PF: > { %v3428_v4 = vld [vmem:[#allocation38_spill] sm:$0xff]  ;;  %v3429_v56 = vld [vmem:[#allocation35_spill] sm:$0xff]  ;;  %v3430_v8 = vld [vmem:[#allocation36_spill] sm:$0xff]  ;;  %v1372_v48 = vstv %s3071_s24  ;;  %v1375_v60 = vstv %s3108_s6  ;;  %v1378_v7 = vstv %s3116_s28  ;;  %v1381_v36 = vstv %s3124_s29  ;;  %s3433_s18 = sadd.f32 %s3075_s30, %s3073_s4  ;;  %s3437_s21 = sand.u32 1, %s1967_s10  }
 0x403   : > { %v1327_v47 = vmax.f32 %v3428_v4, 1e-30  ;;  %v1328_v23 = vmax.f32 %v3429_v56, 1e-30  ;;  %v1329_v37 = vmax.f32 %v3430_v8, 1e-30  ;;  %s3434_s24 = sadd.f32 %s3112_s11, %s3110_s22  ;;  %v1390_v42 = vstv %s963_s8 }
 0x404   : > { %v3431_v34 = vld [vmem:[#allocation37_spill] sm:$0xff]  ;;  %v1343_v16 = vsub.f32 1.0, %v3428_v4  ;;  %v1344_v49 = vsub.f32 1.0, %v3429_v56  ;;  %v1345_v54 = vsub.f32 1.0, %v3430_v8  ;;  %v3432_v57 = vld [vmem:[#allocation26_spill] sm:$0xff]  ;;  %v1384_v26 = vstv %s3433_s18  ;;  %s3435_s6 = sadd.f32 %s3128_s12, %s3126_s14  ;;  %s1633_s22 = sshll.u32 %s1991_s16, 4 }
 0x405   : > { %v1330_v33 = vmax.f32 %v3431_v34, 1e-30  ;;  %1845 = vlog2.f32 %v1327_v47  ;;  %v1346_v27 = vsub.f32 1.0, %v3431_v34  ;;  %vm1371_vm8 = vcmp.eq.s32.totalorder %v3432_v57, 0  ;;  %s3436_s30 = sadd.f32 %s3134_s1, %s3132_s0  ;;  %s1417_s11 = sshll.u32 %s2191_s27, 4  ;;  %s1418_s11 = int_to_ptr.vmem [resolvable:$true] %s1417_s11 }
 0x406   : > { %1847 = vlog2.f32 %v1328_v23  ;;  %v1347_v32 = vmul.f32 %v1343_v16, %v1343_v16  ;;  %v1348_v62 = vmul.f32 %v1344_v49, %v1344_v49  ;;  %v1349_v52 = vmul.f32 %v1345_v54, %v1345_v54  ;;  %s1415_s28 = scalar_lea.hbm %s3239_s2, %s1633_s22  ;;  %s1405_s20 = scalar_lea.sflag [#allocation8], %s3437_s21 }
 0x407   : > { %1849 = vlog2.f32 %v1329_v37  ;;  %v1350_v46 = vmul.f32 %v1346_v27, %v1346_v27  ;;  %v1373_v3 = vsel %vm1371_vm8, %v1372_v48, 0.0  ;;  %vm1374_vm4 = vcmp.eq.s32.totalorder %v3432_v57, 1  ;;  %s1879_s8 = scalar_lea.vmem %s1418_s11, 16  ;;  %s2018_s1 = smov [#allocation11]  }
 0x408   : > { %1851 = vlog2.f32 %v1330_v33  ;;  %v1351_v41 = vmul.f32 0.25, %v1347_v32  ;;  %v1352_v2 = vmul.f32 0.25, %v1348_v62  ;;  %v1353_v24 = vmul.f32 0.25, %v1349_v52  ;;  %v1401_v47 = vld [vmem:[%s2191_s27] sm:$0x1]  ;;  %p1880_p5 = scmp.ne.s32.totalorder %s1418_s11, %s1879_s8  ;;  %s1883_s0 = sshll.u32 %s2018_s1, 4  ;;  %s1884_s0 = int_to_ptr.vmem [resolvable:$false] %s1883_s0 }
 0x409   : > { %v1354_v38 = vmul.f32 0.25, %v1350_v46  ;;  %v1376_v59 = vsel %vm1374_vm4, %v1375_v60, %v1373_v3  ;;  %vm1377_vm9 = vcmp.eq.s32.totalorder %v3432_v57, 2  ;;  %vm1380_vm15 = vcmp.eq.s32.totalorder %v3432_v57, 3  ;;  %s1885_s16 = scalar_lea.vmem %s1884_s0, 32  ;;  %p1886_p9 = scmp.lt.s32.totalorder %s1418_s11, %s1884_s0 }
 0x40a   : > { %v1379_v31 = vsel %vm1377_vm9, %v1378_v7, %v1376_v59  ;;  %vm1383_vm0 = vcmp.eq.s32.totalorder %v3432_v57, 4  ;;  %vm1386_vm1 = vcmp.eq.s32.totalorder %v3432_v57, 5  ;;  %v1387_v29 = vstv %s3434_s24  ;;  %p1881_p6 = pnand %p1880_p5, %p2116_p12  ;;  %p1887_p10 = scmp.lt.s32.totalorder %s1885_s16, %s1879_s8 }
 0x40b   : > { %v1382_v25 = vsel %vm1380_vm15, %v1381_v36, %v1379_v31  ;;  %vm1389_vm11 = vcmp.eq.s32.totalorder %v3432_v57, 6  ;;  %vm1392_vm6 = vcmp.eq.s32.totalorder %v3432_v57, 7  ;;  %v1393_v13 = vstv %s3435_s6 }
 0x40c   : > { %v1385_v22 = vsel %vm1383_vm0, %v1384_v26, %v1382_v25  ;;  %vm1395_vm12 = vcmp.eq.s32.totalorder %v3432_v57, 8  ;;  %vm1398_vm5 = vcmp.eq.s32.totalorder %v3432_v57, 9  ;;  %v1399_v12 = vstv %s3436_s30  ;;  %p1882_p8 = pneg %p1881_p6  ;;  %p1888_p11 = por %p1887_p10, %p1886_p9 }
 0x40d   : > { %v1388_v28 = vsel %vm1386_vm1, %v1387_v29, %v1385_v22 }
 0x40e   : > { %v1391_v21 = vsel %vm1389_vm11, %v1390_v42, %v1388_v28  ;;  %p1889_p13 = pnand %p1888_p11, %p1882_p8 }
 0x40f   : > { %v1394_v61 = vsel %vm1392_vm6, %v1393_v13, %v1391_v21 }
 0x412   : > { %v1846_v5 = vpop.eup %1845 }
 0x413   : > { %v1848_v11 = vpop.eup %1847  ;;  %v1332_v19 = vmul.f32 0.6931472, %v1846_v5 }
 0x414   : > { %v1850_v63 = vpop.eup %1849  ;;  %v1334_v35 = vmul.f32 0.6931472, %v1848_v11 }
 0x415   : > { %v1852_v17 = vpop.eup %1851  ;;  %v1336_v18 = vmul.f32 0.6931472, %v1850_v63  ;;  %v1339_v6 = vsub.f32 0.0, %v1332_v19 }
 0x416   : > { %v1338_v20 = vmul.f32 0.6931472, %v1852_v17  ;;  %v1340_v50 = vsub.f32 0.0, %v1334_v35 }
 0x417   : > { %v1341_v10 = vsub.f32 0.0, %v1336_v18  ;;  %v1355_v0 = vmul.f32 %v1351_v41, %v1339_v6 }
 0x418   : > { %v1342_v44 = vsub.f32 0.0, %v1338_v20  ;;  %v1356_v55 = vmul.f32 %v1352_v2, %v1340_v50 }
 0x419   : > { %v1357_v45 = vmul.f32 %v1353_v24, %v1341_v10 }
 0x41a   : > { %v1358_v58 = vmul.f32 %v1354_v38, %v1342_v44  ;;  %v1359_v9 = vadd.f32 %v1356_v55, %v1355_v0 }
 0x41c   : > { %v1360_v39 = vadd.f32 %v1359_v9, %v1357_v45 }
 0x41e   : > { %v1361_v43 = vadd.f32 %v1360_v39, %v1358_v58 }
 0x420   : > { %1362 = vadd.xlane.f32.xlu0 %v1361_v43 }
 0x4a9   : > { %v1363_v40 = vpop.xlane.xlu0 %1362 }
 0x4aa   : > { %v1364_v14 = vrot.slane %v1363_v40, 4 }
 0x4ac   : > { %v1365_v53 = vadd.f32 %v1364_v14, %v1363_v40 }
 0x4ae   : > { %v1366_v15 = vrot.slane %v1365_v53, 2 }
 0x4b0   : > { %v1367_v51 = vadd.f32 %v1366_v15, %v1365_v53 }
 0x4b2   : > { %v1368_v1 = vrot.slane %v1367_v51, 1 }
 0x4b4   : > { %v1369_v30 = vadd.f32 %v1368_v1, %v1367_v51 }
 0x4b6   : > { %1684 = vpush %v1369_v30 }
 0x4e7   : > { %s1685_s4 = spop %1684 }
 0x4e8   : > { %v1396_v4 = vstv %s1685_s4 }
 0x4e9   : > { %v1397_v56 = vsel %vm1395_vm12, %v1396_v4, %v1394_v61 }
 0x4ea   : > { %v1400_v23 = vsel %vm1398_vm5, %v1399_v12, %v1397_v56 }
 0x4eb   : > { %v1402_v8 = vadd.f32 %v1401_v47, %v1400_v23 }
 0x4ed   : > { %1403 = vst [vmem:[%s2191_s27] sm:$0x1] %v1402_v8 }
 0x4ee   : > { %1892 = shalt.err (!%p1889_p13)
}
 0x4ef   : > { %s1893_s29 = scalar_lea.hbm %s1415_s28, 16  ;;  %s1897_s15 = scalar_lea.hbm %s3239_s2, 32 }
 0x4f0   : > { %p1894_p0 = scmp.ne.s32.totalorder %s1415_s28, %s1893_s29  ;;  %p1898_p7 = scmp.lt.s32.totalorder %s1415_s28, %s3239_s2 }
 0x4f1   : > { %p1899_p4 = scmp.lt.s32.totalorder %s1897_s15, %s1893_s29 }
 0x4f2   : > { %p1895_p2 = pnand %p1894_p0, %p2116_p12 }
 0x4f3   : > { %p1900_p5 = por %p1899_p4, %p1898_p7 }
 0x4f4   : > { %p1896_p3 = pneg %p1895_p2 }
 0x4f6   : > { %p1901_p6 = pnand %p1900_p5, %p1896_p3 }
 0x4f8   : > { %1904 = shalt.err (!%p1901_p6)
}
 0x4f9   : > { %1697 = dma.vmem_to_hbm [thread:$0]  (%p2116_p12), %s1418_s11, 16, %s1415_s28, %s1405_s20  }
 0x4fa PF: > { %p1703_p8 = scmp.ge.s32.totalorder %s2003_s19, 2  ;;  %s1429_s25 = sand.u32 1, %s1963_s9  }
 0x4fb   : > { %s1430_s18 = scalar_lea.sflag [#allocation8], %s1429_s25 }
 0x4fc   : > { %p1700_p9 = pnand %p1703_p8, %p2128_p1 }
 0x4fe   : > { %p1701_p10 = pneg %p1700_p9 }
 0x500   : > { %1958 = dma.done.wait (%p1701_p10), %s1430_s18, 16  }
 0x501   : > { %1960 = vsyncadd (%p1701_p10), %s1430_s18, 4294967280  ;;  %s21_s19 = sadd.s32 1, %s2003_s19   ;;  %s3439_s24 = sld [smem:[#allocation18_spill]] }
 0x502   : > { %p18_p11 = scmp.ge.s32.totalorder %s21_s19, 6   ;;  %s3440_s11 = sld [smem:[#allocation23_spill]] }
 0x503   : > { %s3441_s3 = sld [smem:[#allocation19_spill]]  ;;  %s3446_s9 = smov %s1967_s10 }
 0x504   : > { %s3442_s14 = sld [smem:[#allocation24_spill]]  ;;  %s3448_s12 = smov %s1979_s13 }
 0x505   : > { %s3443_s16 = sld [smem:[#allocation20_spill]]  ;;  %s3450_s15 = smov %s1995_s17 }
 0x506   : > { %s3444_s6 = sld [smem:[#allocation21_spill]] }
 0x507   : > { %s3445_s18 = sld [smem:[#allocation22_spill]]  ;;  %s3447_s10 = smov %s3439_s24 }
 0x508   :  { %20 = sbr.rel (!%p18_p11) target bundleno = 14 (0xe), region = 121 }
 0x509   : > { %s3449_s13 = smov %s3441_s3 }
 0x50c   : > { %s3451_s17 = smov %s3444_s6 }
 0x50d   :  { %1434 = vsyncpa [#allocation7], 1 }
 0x50e   :  { %1436 = vsyncpa [#allocation7 + $0x1], 1 }
 0x50f   :  { %1437 = vsyncpa [#allocation10], 1 }
 0x510   :  { %1439 = vsyncpa [#allocation10 + $0x1], 1 }
 0x511   :  { %1440 = vsyncpa [#allocation8], 1 }
 0x512   :  { %1442 = vsyncpa [#allocation8 + $0x1], 1 }

</bundles_post_ra>
